<compile_context>
chip_gen: v7x
topology: tpu7x:2x2x1
jax: 0.10.0
libtpu: 0.0.40
codegen_flags: <defaults>
</compile_context>

<pallas_src>
import functools

import jax
import jax.numpy as jnp
from jax.experimental import pallas as pl
from jax.experimental.pallas import tpu as pltpu


def _round_up(x, m):
    return ((x + m - 1) // m) * m


# ----------------------------------------------------------------------------
# Pallas kernel: on-chip im2col + fused (W @ patches) + bias + LeakyReLU(0.2)
# ----------------------------------------------------------------------------
def _conv3d_lrelu_kernel(x_ref, w_ref, o_ref, p_ref, *, cin, k, hp, wp, kdim):
    # x_ref: (cin, q_pad)     one sample, spatially-flattened padded volume (VMEM resident)
    # w_ref: (cout, kdim_pad) weights, offset-major layout, bias folded into column `kdim`
    # o_ref: (cout, tm)       lane-dense output columns (stride-1 "full" conv positions)
    # p_ref: (kdim_pad, tm)   VMEM scratch: on-chip im2col patch matrix
    tm = o_ref.shape[-1]
    kdim_pad = p_ref.shape[0]

    # Pad rows: zeros, except the all-ones bias row at index `kdim`.
    # Re-written every grid step so the kernel stays correct when the "parallel"
    # grid axis is split across TensorCores (each core has its own scratch).
    p_ref[kdim:, :] = jnp.zeros((kdim_pad - kdim, tm), dtype=p_ref.dtype)
    p_ref[kdim:kdim + 1, :] = jnp.ones((1, tm), dtype=p_ref.dtype)

    # On-chip im2col: k^3 contiguous shifted windows of the flattened volume.
    idx = 0
    for kd in range(k):
        for kh in range(k):
            for kw in range(k):
                col = (kd * hp + kh) * wp + kw          # static column offset
                row = idx * cin                         # static row offset
                p_ref[row:row + cin, :] = x_ref[:, col:col + tm]
                idx += 1

    # Single 128-deep MXU contraction; bias rides along via the ones row.
    acc = jnp.dot(w_ref[...], p_ref[...], preferred_element_type=jnp.float32)
    acc = jnp.where(acc >= 0, acc, 0.2 * acc)           # LeakyReLU(negative_slope=0.2)
    o_ref[...] = acc.astype(o_ref.dtype)


# ----------------------------------------------------------------------------
# LeakyReLUConv3d forward (ReplicationPad3d(p) -> Conv3d(padding=p, bias) -> LeakyReLU)
# ----------------------------------------------------------------------------
def leaky_relu_conv3d(x, weight, bias, *, kernel_size, stride, padding):
    """x: (N, Cin, D, H, W) f32, weight: (Cout, Cin, k, k, k), bias: (Cout,)."""
    k, s, p = kernel_size, stride, padding
    n, cin, _, _, _ = x.shape
    cout = weight.shape[0]

    # 1) nn.ReplicationPad3d(padding): edge-replicate spatial dims.
    # 2) Conv3d's own padding=padding: zero pad (the module applies BOTH pads).
    if p > 0:
        x = jnp.pad(x, ((0, 0), (0, 0), (p, p), (p, p), (p, p)), mode="edge")
        x = jnp.pad(x, ((0, 0), (0, 0), (p, p), (p, p), (p, p)), mode="constant")
    dp, hp, wp = x.shape[2:]
    do = (dp - k) // s + 1
    ho = (hp - k) // s + 1
    wo = (wp - k) // s + 1

    # Flatten spatial dims (contiguous reshape: NO 27x im2col expansion, NO transpose).
    q = dp * hp * wp
    xflat = x.reshape(n, cin, q)

    # Number of stride-1 "full" conv columns needed so valid outputs can be
    # extracted with a plain reshape + strided slice afterwards.
    m_need = ((do - 1) * s + 1) * hp * wp
    tm = max(_round_up(m_need, 128), 256)               # lane-dense output width
    max_off = ((k - 1) * hp + (k - 1)) * wp + (k - 1)    # largest in-kernel shift
    q_pad = _round_up(max(q, max_off + tm), 128)
    if q_pad > q:
        xflat = jnp.pad(xflat, ((0, 0), (0, 0), (0, q_pad - q)))

    # Weights: offset-major (kd, kh, kw, cin) flattening so patch rows are contiguous
    # per offset; pad the contraction to 128 and fold the bias into column `kdim`.
    kdim = cin * k * k * k
    kdim_pad = _round_up(kdim + 1, 128)
    w_mat = jnp.transpose(weight, (0, 2, 3, 4, 1)).reshape(cout, kdim)
    w_mat = jnp.pad(w_mat, ((0, 0), (0, kdim_pad - kdim)))
    w_mat = w_mat.at[:, kdim].set(bias)

    kernel = functools.partial(
        _conv3d_lrelu_kernel, cin=cin, k=k, hp=hp, wp=wp, kdim=kdim)

    out_cols = pl.pallas_call(
        kernel,
        out_shape=jax.ShapeDtypeStruct((n, cout, tm), x.dtype),
        grid_spec=pltpu.PrefetchScalarGridSpec(
            num_scalar_prefetch=0,
            grid=(n,),                                   # >= 2 parallel steps (v7x megacore)
            in_specs=[
                pl.BlockSpec((None, cin, q_pad), lambda i: (i, 0, 0)),  # one sample, VMEM resident
                pl.BlockSpec((cout, kdim_pad), lambda i: (0, 0)),       # weights resident
            ],
            out_specs=pl.BlockSpec((None, cout, tm), lambda i: (i, 0, 0)),
            scratch_shapes=[pltpu.VMEM((kdim_pad, tm), jnp.float32)],
        ),
        compiler_params=pltpu.CompilerParams(
            dimension_semantics=("parallel",),
            vmem_limit_bytes=32 * 1024 * 1024),
    )(xflat, w_mat)

    # Extract the valid output positions: pure reshape + strided slice (no gather).
    y = out_cols[:, :, :m_need].reshape(n, cout, (do - 1) * s + 1, hp, wp)
    y = y[:, :, ::s, : (ho - 1) * s + 1 : s, : (wo - 1) * s + 1 : s]
    return y                                             # (N, Cout, Do, Ho, Wo)


# ----------------------------------------------------------------------------
# TimeDistributed2 forward (reshape plumbing, faithful to the PyTorch reference)
# ----------------------------------------------------------------------------
def time_distributed2(module_fn, x1, x2, *, batch_first=False):
    if x1.ndim <= 2:
        return module_fn(x1)
    x1_reshape = x1.reshape((-1,) + x1.shape[2:])
    if x2.ndim <= 2:
        return module_fn(x2)
    x2_reshape = x2.reshape((-1,) + x2.shape[2:])
    y = module_fn(x1_reshape, x2_reshape)
    output_size = y.shape[1:]
    if batch_first:
        return y.reshape((x1.shape[0], -1) + output_size)
    return y.reshape((-1, x1.shape[1]) + output_size)


# ----------------------------------------------------------------------------
# Pure-JAX reference (for a silent correctness check)
# ----------------------------------------------------------------------------
def _reference_td2(x1, x2, weight, bias, *, kernel_size, stride, padding, batch_first):
    x1r = x1.reshape((-1,) + x1.shape[2:])
    x2r = x2.reshape((-1,) + x2.shape[2:])
    xc = jnp.concatenate([x1r, x2r], axis=1)
    p = padding
    if p > 0:
        xc = jnp.pad(xc, ((0, 0), (0, 0), (p, p), (p, p), (p, p)), mode="edge")
    y = jax.lax.conv_general_dilated(
        xc, weight,
        window_strides=(stride, stride, stride),
        padding=[(p, p), (p, p), (p, p)],
        dimension_numbers=("NCDHW", "OIDHW", "NCDHW"))
    y = y + bias.reshape(1, -1, 1, 1, 1)
    y = jnp.where(y >= 0, y, 0.2 * y)
    if batch_first:
        return y.reshape((x1.shape[0], -1) + y.shape[1:])
    return y.reshape((-1, x1.shape[1]) + y.shape[1:])


# ----------------------------------------------------------------------------
if __name__ == "__main__":
    # x1/x2: (batch=2, time=4, channels=2, D=H=W=8); inner module: Cin=4 -> Cout=8, k=3, s=1, p=1
    B, T, c1, c2 = 2, 4, 2, 2
    D = H = W = 8
    n_out, ksz, stride, padding = 8, 3, 1, 1
    cin = c1 + c2

    key = jax.random.PRNGKey(0)
    k1, k2, kw_, kb_ = jax.random.split(key, 4)
    x1 = jax.random.normal(k1, (B, T, c1, D, H, W), dtype=jnp.float32)
    x2 = jax.random.normal(k2, (B, T, c2, D, H, W), dtype=jnp.float32)
    # gaussian_weights_init: weight ~ N(0, 0.02); bias synthetic-deterministic.
    weight = 0.02 * jax.random.normal(kw_, (n_out, cin, ksz, ksz, ksz), dtype=jnp.float32)
    bias = 0.02 * jax.random.normal(kb_, (n_out,), dtype=jnp.float32)

    def inner_module(*xs):
        # Representative two-input module: channel-concat -> LeakyReLUConv3d (Pallas).
        xcat = xs[0] if len(xs) == 1 else jnp.concatenate(xs, axis=1)
        return leaky_relu_conv3d(xcat, weight, bias,
                                 kernel_size=ksz, stride=stride, padding=padding)

    fwd = jax.jit(functools.partial(time_distributed2, inner_module, batch_first=True))
    out = fwd(x1, x2)
    jax.block_until_ready(out)

    ref = _reference_td2(x1, x2, weight, bias, kernel_size=ksz, stride=stride,
                         padding=padding, batch_first=True)
    assert out.shape == ref.shape, (out.shape, ref.shape)
    assert jnp.allclose(out, ref, atol=5e-4, rtol=5e-4)

    print("KERNEL_OK")
</pallas_src>

<mosaic_0001>
module attributes {stable_mosaic.version = 11 : i64} {
  func.func @_conv3d_lrelu_kernel(%arg0: i32, %arg1: memref<1x4x1920xf32, #tpu.memory_space<vmem>>, %arg2: memref<8x128xf32, #tpu.memory_space<vmem>>, %arg3: memref<1x8x1536xf32, #tpu.memory_space<vmem>>, %arg4: memref<128x1536xf32, #tpu.memory_space<vmem>>) attributes {dimension_semantics = [#tpu.dimension_semantics<parallel>], iteration_bounds = array<i64: 8>, scalar_prefetch = 0 : i64, scratch_operands = 1 : i64, tpu.core_type = #tpu.core_type<tc>, window_params = [{transform_indices = @transform_0, window_bounds = array<i64: 1, 4, 1920>}, {pipeline_mode = #tpu.pipeline_mode<synchronous>, transform_indices = @transform_1, window_bounds = array<i64: 8, 128>}, {transform_indices = @transform_2, window_bounds = array<i64: 1, 8, 1536>}]} {
    %cst = arith.constant 0.000000e+00 : f32
    %0 = vector.broadcast %cst : f32 to vector<20x1536xf32>
    %c108 = arith.constant 108 : index
    %c0 = arith.constant 0 : index
    %1 = vector.load %arg4[%c108, %c0] : memref<128x1536xf32, #tpu.memory_space<vmem>>, vector<20x1536xf32>
    tpu.vector_store %arg4[%c108, %c0], %0 {strides = array<i32>} : memref<128x1536xf32, #tpu.memory_space<vmem>>, vector<20x1536xf32>,
    %cst_0 = arith.constant 1.000000e+00 : f32
    %2 = vector.broadcast %cst_0 : f32 to vector<1x1536xf32>
    %c108_1 = arith.constant 108 : index
    %c0_2 = arith.constant 0 : index
    %3 = vector.load %arg4[%c108_1, %c0_2] : memref<128x1536xf32, #tpu.memory_space<vmem>>, vector<1x1536xf32>
    tpu.vector_store %arg4[%c108_1, %c0_2], %2 {strides = array<i32>} : memref<128x1536xf32, #tpu.memory_space<vmem>>, vector<1x1536xf32>,
    %c0_3 = arith.constant 0 : index
    %c0_4 = arith.constant 0 : index
    %c0_5 = arith.constant 0 : index
    %4 = vector.load %arg1[%c0_3, %c0_4, %c0_5] : memref<1x4x1920xf32, #tpu.memory_space<vmem>>, vector<1x4x1536xf32>
    %5 = vector.shape_cast %4 : vector<1x4x1536xf32> to vector<4x1536xf32>
    %c0_6 = arith.constant 0 : index
    %c0_7 = arith.constant 0 : index
    %6 = vector.load %arg4[%c0_6, %c0_7] : memref<128x1536xf32, #tpu.memory_space<vmem>>, vector<4x1536xf32>
    tpu.vector_store %arg4[%c0_6, %c0_7], %5 {strides = array<i32>} : memref<128x1536xf32, #tpu.memory_space<vmem>>, vector<4x1536xf32>,
    %c0_8 = arith.constant 0 : index
    %c0_9 = arith.constant 0 : index
    %c1 = arith.constant 1 : index
    %7 = vector.load %arg1[%c0_8, %c0_9, %c1] : memref<1x4x1920xf32, #tpu.memory_space<vmem>>, vector<1x4x1536xf32>
    %8 = vector.shape_cast %7 : vector<1x4x1536xf32> to vector<4x1536xf32>
    %c4 = arith.constant 4 : index
    %c0_10 = arith.constant 0 : index
    %9 = vector.load %arg4[%c4, %c0_10] : memref<128x1536xf32, #tpu.memory_space<vmem>>, vector<4x1536xf32>
    tpu.vector_store %arg4[%c4, %c0_10], %8 {strides = array<i32>} : memref<128x1536xf32, #tpu.memory_space<vmem>>, vector<4x1536xf32>,
    %c0_11 = arith.constant 0 : index
    %c0_12 = arith.constant 0 : index
    %c2 = arith.constant 2 : index
    %10 = vector.load %arg1[%c0_11, %c0_12, %c2] : memref<1x4x1920xf32, #tpu.memory_space<vmem>>, vector<1x4x1536xf32>
    %11 = vector.shape_cast %10 : vector<1x4x1536xf32> to vector<4x1536xf32>
    %c8 = arith.constant 8 : index
    %c0_13 = arith.constant 0 : index
    %12 = vector.load %arg4[%c8, %c0_13] : memref<128x1536xf32, #tpu.memory_space<vmem>>, vector<4x1536xf32>
    tpu.vector_store %arg4[%c8, %c0_13], %11 {strides = array<i32>} : memref<128x1536xf32, #tpu.memory_space<vmem>>, vector<4x1536xf32>,
    %c0_14 = arith.constant 0 : index
    %c0_15 = arith.constant 0 : index
    %c12 = arith.constant 12 : index
    %13 = vector.load %arg1[%c0_14, %c0_15, %c12] : memref<1x4x1920xf32, #tpu.memory_space<vmem>>, vector<1x4x1536xf32>
    %14 = vector.shape_cast %13 : vector<1x4x1536xf32> to vector<4x1536xf32>
    %c12_16 = arith.constant 12 : index
    %c0_17 = arith.constant 0 : index
    %15 = vector.load %arg4[%c12_16, %c0_17] : memref<128x1536xf32, #tpu.memory_space<vmem>>, vector<4x1536xf32>
    tpu.vector_store %arg4[%c12_16, %c0_17], %14 {strides = array<i32>} : memref<128x1536xf32, #tpu.memory_space<vmem>>, vector<4x1536xf32>,
    %c0_18 = arith.constant 0 : index
    %c0_19 = arith.constant 0 : index
    %c13 = arith.constant 13 : index
    %16 = vector.load %arg1[%c0_18, %c0_19, %c13] : memref<1x4x1920xf32, #tpu.memory_space<vmem>>, vector<1x4x1536xf32>
    %17 = vector.shape_cast %16 : vector<1x4x1536xf32> to vector<4x1536xf32>
    %c16 = arith.constant 16 : index
    %c0_20 = arith.constant 0 : index
    %18 = vector.load %arg4[%c16, %c0_20] : memref<128x1536xf32, #tpu.memory_space<vmem>>, vector<4x1536xf32>
    tpu.vector_store %arg4[%c16, %c0_20], %17 {strides = array<i32>} : memref<128x1536xf32, #tpu.memory_space<vmem>>, vector<4x1536xf32>,
    %c0_21 = arith.constant 0 : index
    %c0_22 = arith.constant 0 : index
    %c14 = arith.constant 14 : index
    %19 = vector.load %arg1[%c0_21, %c0_22, %c14] : memref<1x4x1920xf32, #tpu.memory_space<vmem>>, vector<1x4x1536xf32>
    %20 = vector.shape_cast %19 : vector<1x4x1536xf32> to vector<4x1536xf32>
    %c20 = arith.constant 20 : index
    %c0_23 = arith.constant 0 : index
    %21 = vector.load %arg4[%c20, %c0_23] : memref<128x1536xf32, #tpu.memory_space<vmem>>, vector<4x1536xf32>
    tpu.vector_store %arg4[%c20, %c0_23], %20 {strides = array<i32>} : memref<128x1536xf32, #tpu.memory_space<vmem>>, vector<4x1536xf32>,
    %c0_24 = arith.constant 0 : index
    %c0_25 = arith.constant 0 : index
    %c24 = arith.constant 24 : index
    %22 = vector.load %arg1[%c0_24, %c0_25, %c24] : memref<1x4x1920xf32, #tpu.memory_space<vmem>>, vector<1x4x1536xf32>
    %23 = vector.shape_cast %22 : vector<1x4x1536xf32> to vector<4x1536xf32>
    %c24_26 = arith.constant 24 : index
    %c0_27 = arith.constant 0 : index
    %24 = vector.load %arg4[%c24_26, %c0_27] : memref<128x1536xf32, #tpu.memory_space<vmem>>, vector<4x1536xf32>
    tpu.vector_store %arg4[%c24_26, %c0_27], %23 {strides = array<i32>} : memref<128x1536xf32, #tpu.memory_space<vmem>>, vector<4x1536xf32>,
    %c0_28 = arith.constant 0 : index
    %c0_29 = arith.constant 0 : index
    %c25 = arith.constant 25 : index
    %25 = vector.load %arg1[%c0_28, %c0_29, %c25] : memref<1x4x1920xf32, #tpu.memory_space<vmem>>, vector<1x4x1536xf32>
    %26 = vector.shape_cast %25 : vector<1x4x1536xf32> to vector<4x1536xf32>
    %c28 = arith.constant 28 : index
    %c0_30 = arith.constant 0 : index
    %27 = vector.load %arg4[%c28, %c0_30] : memref<128x1536xf32, #tpu.memory_space<vmem>>, vector<4x1536xf32>
    tpu.vector_store %arg4[%c28, %c0_30], %26 {strides = array<i32>} : memref<128x1536xf32, #tpu.memory_space<vmem>>, vector<4x1536xf32>,
    %c0_31 = arith.constant 0 : index
    %c0_32 = arith.constant 0 : index
    %c26 = arith.constant 26 : index
    %28 = vector.load %arg1[%c0_31, %c0_32, %c26] : memref<1x4x1920xf32, #tpu.memory_space<vmem>>, vector<1x4x1536xf32>
    %29 = vector.shape_cast %28 : vector<1x4x1536xf32> to vector<4x1536xf32>
    %c32 = arith.constant 32 : index
    %c0_33 = arith.constant 0 : index
    %30 = vector.load %arg4[%c32, %c0_33] : memref<128x1536xf32, #tpu.memory_space<vmem>>, vector<4x1536xf32>
    tpu.vector_store %arg4[%c32, %c0_33], %29 {strides = array<i32>} : memref<128x1536xf32, #tpu.memory_space<vmem>>, vector<4x1536xf32>,
    %c0_34 = arith.constant 0 : index
    %c0_35 = arith.constant 0 : index
    %c144 = arith.constant 144 : index
    %31 = vector.load %arg1[%c0_34, %c0_35, %c144] : memref<1x4x1920xf32, #tpu.memory_space<vmem>>, vector<1x4x1536xf32>
    %32 = vector.shape_cast %31 : vector<1x4x1536xf32> to vector<4x1536xf32>
    %c36 = arith.constant 36 : index
    %c0_36 = arith.constant 0 : index
    %33 = vector.load %arg4[%c36, %c0_36] : memref<128x1536xf32, #tpu.memory_space<vmem>>, vector<4x1536xf32>
    tpu.vector_store %arg4[%c36, %c0_36], %32 {strides = array<i32>} : memref<128x1536xf32, #tpu.memory_space<vmem>>, vector<4x1536xf32>,
    %c0_37 = arith.constant 0 : index
    %c0_38 = arith.constant 0 : index
    %c145 = arith.constant 145 : index
    %34 = vector.load %arg1[%c0_37, %c0_38, %c145] : memref<1x4x1920xf32, #tpu.memory_space<vmem>>, vector<1x4x1536xf32>
    %35 = vector.shape_cast %34 : vector<1x4x1536xf32> to vector<4x1536xf32>
    %c40 = arith.constant 40 : index
    %c0_39 = arith.constant 0 : index
    %36 = vector.load %arg4[%c40, %c0_39] : memref<128x1536xf32, #tpu.memory_space<vmem>>, vector<4x1536xf32>
    tpu.vector_store %arg4[%c40, %c0_39], %35 {strides = array<i32>} : memref<128x1536xf32, #tpu.memory_space<vmem>>, vector<4x1536xf32>,
    %c0_40 = arith.constant 0 : index
    %c0_41 = arith.constant 0 : index
    %c146 = arith.constant 146 : index
    %37 = vector.load %arg1[%c0_40, %c0_41, %c146] : memref<1x4x1920xf32, #tpu.memory_space<vmem>>, vector<1x4x1536xf32>
    %38 = vector.shape_cast %37 : vector<1x4x1536xf32> to vector<4x1536xf32>
    %c44 = arith.constant 44 : index
    %c0_42 = arith.constant 0 : index
    %39 = vector.load %arg4[%c44, %c0_42] : memref<128x1536xf32, #tpu.memory_space<vmem>>, vector<4x1536xf32>
    tpu.vector_store %arg4[%c44, %c0_42], %38 {strides = array<i32>} : memref<128x1536xf32, #tpu.memory_space<vmem>>, vector<4x1536xf32>,
    %c0_43 = arith.constant 0 : index
    %c0_44 = arith.constant 0 : index
    %c156 = arith.constant 156 : index
    %40 = vector.load %arg1[%c0_43, %c0_44, %c156] : memref<1x4x1920xf32, #tpu.memory_space<vmem>>, vector<1x4x1536xf32>
    %41 = vector.shape_cast %40 : vector<1x4x1536xf32> to vector<4x1536xf32>
    %c48 = arith.constant 48 : index
    %c0_45 = arith.constant 0 : index
    %42 = vector.load %arg4[%c48, %c0_45] : memref<128x1536xf32, #tpu.memory_space<vmem>>, vector<4x1536xf32>
    tpu.vector_store %arg4[%c48, %c0_45], %41 {strides = array<i32>} : memref<128x1536xf32, #tpu.memory_space<vmem>>, vector<4x1536xf32>,
    %c0_46 = arith.constant 0 : index
    %c0_47 = arith.constant 0 : index
    %c157 = arith.constant 157 : index
    %43 = vector.load %arg1[%c0_46, %c0_47, %c157] : memref<1x4x1920xf32, #tpu.memory_space<vmem>>, vector<1x4x1536xf32>
    %44 = vector.shape_cast %43 : vector<1x4x1536xf32> to vector<4x1536xf32>
    %c52 = arith.constant 52 : index
    %c0_48 = arith.constant 0 : index
    %45 = vector.load %arg4[%c52, %c0_48] : memref<128x1536xf32, #tpu.memory_space<vmem>>, vector<4x1536xf32>
    tpu.vector_store %arg4[%c52, %c0_48], %44 {strides = array<i32>} : memref<128x1536xf32, #tpu.memory_space<vmem>>, vector<4x1536xf32>,
    %c0_49 = arith.constant 0 : index
    %c0_50 = arith.constant 0 : index
    %c158 = arith.constant 158 : index
    %46 = vector.load %arg1[%c0_49, %c0_50, %c158] : memref<1x4x1920xf32, #tpu.memory_space<vmem>>, vector<1x4x1536xf32>
    %47 = vector.shape_cast %46 : vector<1x4x1536xf32> to vector<4x1536xf32>
    %c56 = arith.constant 56 : index
    %c0_51 = arith.constant 0 : index
    %48 = vector.load %arg4[%c56, %c0_51] : memref<128x1536xf32, #tpu.memory_space<vmem>>, vector<4x1536xf32>
    tpu.vector_store %arg4[%c56, %c0_51], %47 {strides = array<i32>} : memref<128x1536xf32, #tpu.memory_space<vmem>>, vector<4x1536xf32>,
    %c0_52 = arith.constant 0 : index
    %c0_53 = arith.constant 0 : index
    %c168 = arith.constant 168 : index
    %49 = vector.load %arg1[%c0_52, %c0_53, %c168] : memref<1x4x1920xf32, #tpu.memory_space<vmem>>, vector<1x4x1536xf32>
    %50 = vector.shape_cast %49 : vector<1x4x1536xf32> to vector<4x1536xf32>
    %c60 = arith.constant 60 : index
    %c0_54 = arith.constant 0 : index
    %51 = vector.load %arg4[%c60, %c0_54] : memref<128x1536xf32, #tpu.memory_space<vmem>>, vector<4x1536xf32>
    tpu.vector_store %arg4[%c60, %c0_54], %50 {strides = array<i32>} : memref<128x1536xf32, #tpu.memory_space<vmem>>, vector<4x1536xf32>,
    %c0_55 = arith.constant 0 : index
    %c0_56 = arith.constant 0 : index
    %c169 = arith.constant 169 : index
    %52 = vector.load %arg1[%c0_55, %c0_56, %c169] : memref<1x4x1920xf32, #tpu.memory_space<vmem>>, vector<1x4x1536xf32>
    %53 = vector.shape_cast %52 : vector<1x4x1536xf32> to vector<4x1536xf32>
    %c64 = arith.constant 64 : index
    %c0_57 = arith.constant 0 : index
    %54 = vector.load %arg4[%c64, %c0_57] : memref<128x1536xf32, #tpu.memory_space<vmem>>, vector<4x1536xf32>
    tpu.vector_store %arg4[%c64, %c0_57], %53 {strides = array<i32>} : memref<128x1536xf32, #tpu.memory_space<vmem>>, vector<4x1536xf32>,
    %c0_58 = arith.constant 0 : index
    %c0_59 = arith.constant 0 : index
    %c170 = arith.constant 170 : index
    %55 = vector.load %arg1[%c0_58, %c0_59, %c170] : memref<1x4x1920xf32, #tpu.memory_space<vmem>>, vector<1x4x1536xf32>
    %56 = vector.shape_cast %55 : vector<1x4x1536xf32> to vector<4x1536xf32>
    %c68 = arith.constant 68 : index
    %c0_60 = arith.constant 0 : index
    %57 = vector.load %arg4[%c68, %c0_60] : memref<128x1536xf32, #tpu.memory_space<vmem>>, vector<4x1536xf32>
    tpu.vector_store %arg4[%c68, %c0_60], %56 {strides = array<i32>} : memref<128x1536xf32, #tpu.memory_space<vmem>>, vector<4x1536xf32>,
    %c0_61 = arith.constant 0 : index
    %c0_62 = arith.constant 0 : index
    %c288 = arith.constant 288 : index
    %58 = vector.load %arg1[%c0_61, %c0_62, %c288] : memref<1x4x1920xf32, #tpu.memory_space<vmem>>, vector<1x4x1536xf32>
    %59 = vector.shape_cast %58 : vector<1x4x1536xf32> to vector<4x1536xf32>
    %c72 = arith.constant 72 : index
    %c0_63 = arith.constant 0 : index
    %60 = vector.load %arg4[%c72, %c0_63] : memref<128x1536xf32, #tpu.memory_space<vmem>>, vector<4x1536xf32>
    tpu.vector_store %arg4[%c72, %c0_63], %59 {strides = array<i32>} : memref<128x1536xf32, #tpu.memory_space<vmem>>, vector<4x1536xf32>,
    %c0_64 = arith.constant 0 : index
    %c0_65 = arith.constant 0 : index
    %c289 = arith.constant 289 : index
    %61 = vector.load %arg1[%c0_64, %c0_65, %c289] : memref<1x4x1920xf32, #tpu.memory_space<vmem>>, vector<1x4x1536xf32>
    %62 = vector.shape_cast %61 : vector<1x4x1536xf32> to vector<4x1536xf32>
    %c76 = arith.constant 76 : index
    %c0_66 = arith.constant 0 : index
    %63 = vector.load %arg4[%c76, %c0_66] : memref<128x1536xf32, #tpu.memory_space<vmem>>, vector<4x1536xf32>
    tpu.vector_store %arg4[%c76, %c0_66], %62 {strides = array<i32>} : memref<128x1536xf32, #tpu.memory_space<vmem>>, vector<4x1536xf32>,
    %c0_67 = arith.constant 0 : index
    %c0_68 = arith.constant 0 : index
    %c290 = arith.constant 290 : index
    %64 = vector.load %arg1[%c0_67, %c0_68, %c290] : memref<1x4x1920xf32, #tpu.memory_space<vmem>>, vector<1x4x1536xf32>
    %65 = vector.shape_cast %64 : vector<1x4x1536xf32> to vector<4x1536xf32>
    %c80 = arith.constant 80 : index
    %c0_69 = arith.constant 0 : index
    %66 = vector.load %arg4[%c80, %c0_69] : memref<128x1536xf32, #tpu.memory_space<vmem>>, vector<4x1536xf32>
    tpu.vector_store %arg4[%c80, %c0_69], %65 {strides = array<i32>} : memref<128x1536xf32, #tpu.memory_space<vmem>>, vector<4x1536xf32>,
    %c0_70 = arith.constant 0 : index
    %c0_71 = arith.constant 0 : index
    %c300 = arith.constant 300 : index
    %67 = vector.load %arg1[%c0_70, %c0_71, %c300] : memref<1x4x1920xf32, #tpu.memory_space<vmem>>, vector<1x4x1536xf32>
    %68 = vector.shape_cast %67 : vector<1x4x1536xf32> to vector<4x1536xf32>
    %c84 = arith.constant 84 : index
    %c0_72 = arith.constant 0 : index
    %69 = vector.load %arg4[%c84, %c0_72] : memref<128x1536xf32, #tpu.memory_space<vmem>>, vector<4x1536xf32>
    tpu.vector_store %arg4[%c84, %c0_72], %68 {strides = array<i32>} : memref<128x1536xf32, #tpu.memory_space<vmem>>, vector<4x1536xf32>,
    %c0_73 = arith.constant 0 : index
    %c0_74 = arith.constant 0 : index
    %c301 = arith.constant 301 : index
    %70 = vector.load %arg1[%c0_73, %c0_74, %c301] : memref<1x4x1920xf32, #tpu.memory_space<vmem>>, vector<1x4x1536xf32>
    %71 = vector.shape_cast %70 : vector<1x4x1536xf32> to vector<4x1536xf32>
    %c88 = arith.constant 88 : index
    %c0_75 = arith.constant 0 : index
    %72 = vector.load %arg4[%c88, %c0_75] : memref<128x1536xf32, #tpu.memory_space<vmem>>, vector<4x1536xf32>
    tpu.vector_store %arg4[%c88, %c0_75], %71 {strides = array<i32>} : memref<128x1536xf32, #tpu.memory_space<vmem>>, vector<4x1536xf32>,
    %c0_76 = arith.constant 0 : index
    %c0_77 = arith.constant 0 : index
    %c302 = arith.constant 302 : index
    %73 = vector.load %arg1[%c0_76, %c0_77, %c302] : memref<1x4x1920xf32, #tpu.memory_space<vmem>>, vector<1x4x1536xf32>
    %74 = vector.shape_cast %73 : vector<1x4x1536xf32> to vector<4x1536xf32>
    %c92 = arith.constant 92 : index
    %c0_78 = arith.constant 0 : index
    %75 = vector.load %arg4[%c92, %c0_78] : memref<128x1536xf32, #tpu.memory_space<vmem>>, vector<4x1536xf32>
    tpu.vector_store %arg4[%c92, %c0_78], %74 {strides = array<i32>} : memref<128x1536xf32, #tpu.memory_space<vmem>>, vector<4x1536xf32>,
    %c0_79 = arith.constant 0 : index
    %c0_80 = arith.constant 0 : index
    %c312 = arith.constant 312 : index
    %76 = vector.load %arg1[%c0_79, %c0_80, %c312] : memref<1x4x1920xf32, #tpu.memory_space<vmem>>, vector<1x4x1536xf32>
    %77 = vector.shape_cast %76 : vector<1x4x1536xf32> to vector<4x1536xf32>
    %c96 = arith.constant 96 : index
    %c0_81 = arith.constant 0 : index
    %78 = vector.load %arg4[%c96, %c0_81] : memref<128x1536xf32, #tpu.memory_space<vmem>>, vector<4x1536xf32>
    tpu.vector_store %arg4[%c96, %c0_81], %77 {strides = array<i32>} : memref<128x1536xf32, #tpu.memory_space<vmem>>, vector<4x1536xf32>,
    %c0_82 = arith.constant 0 : index
    %c0_83 = arith.constant 0 : index
    %c313 = arith.constant 313 : index
    %79 = vector.load %arg1[%c0_82, %c0_83, %c313] : memref<1x4x1920xf32, #tpu.memory_space<vmem>>, vector<1x4x1536xf32>
    %80 = vector.shape_cast %79 : vector<1x4x1536xf32> to vector<4x1536xf32>
    %c100 = arith.constant 100 : index
    %c0_84 = arith.constant 0 : index
    %81 = vector.load %arg4[%c100, %c0_84] : memref<128x1536xf32, #tpu.memory_space<vmem>>, vector<4x1536xf32>
    tpu.vector_store %arg4[%c100, %c0_84], %80 {strides = array<i32>} : memref<128x1536xf32, #tpu.memory_space<vmem>>, vector<4x1536xf32>,
    %c0_85 = arith.constant 0 : index
    %c0_86 = arith.constant 0 : index
    %c314 = arith.constant 314 : index
    %82 = vector.load %arg1[%c0_85, %c0_86, %c314] : memref<1x4x1920xf32, #tpu.memory_space<vmem>>, vector<1x4x1536xf32>
    %83 = vector.shape_cast %82 : vector<1x4x1536xf32> to vector<4x1536xf32>
    %c104 = arith.constant 104 : index
    %c0_87 = arith.constant 0 : index
    %84 = vector.load %arg4[%c104, %c0_87] : memref<128x1536xf32, #tpu.memory_space<vmem>>, vector<4x1536xf32>
    tpu.vector_store %arg4[%c104, %c0_87], %83 {strides = array<i32>} : memref<128x1536xf32, #tpu.memory_space<vmem>>, vector<4x1536xf32>,
    %c0_88 = arith.constant 0 : index
    %c0_89 = arith.constant 0 : index
    %85 = vector.load %arg2[%c0_88, %c0_89] : memref<8x128xf32, #tpu.memory_space<vmem>>, vector<8x128xf32>
    %c0_90 = arith.constant 0 : index
    %c0_91 = arith.constant 0 : index
    %86 = vector.load %arg4[%c0_90, %c0_91] : memref<128x1536xf32, #tpu.memory_space<vmem>>, vector<128x1536xf32>
    %cst_92 = arith.constant dense<0.000000e+00> : vector<8x1536xf32>
    %87 = tpu.matmul %85, %86, %cst_92 {dimension_numbers = #tpu.dot_dimension_numbers<[1], [0], [0], [1], [0, 0, 1, 1], [], []>} : vector<8x128xf32>, vector<128x1536xf32>, vector<8x1536xf32> -> vector<8x1536xf32>
    %cst_93 = arith.constant 0.000000e+00 : f32
    %88 = vector.broadcast %cst_93 : f32 to vector<8x1536xf32>
    %89 = arith.cmpf oge, %87, %88 : vector<8x1536xf32>
    %cst_94 = arith.constant 2.000000e-01 : f32
    %90 = vector.broadcast %cst_94 : f32 to vector<8x1536xf32>
    %91 = arith.mulf %90, %87 : vector<8x1536xf32>
    %92 = arith.select %89, %87, %91 : vector<8x1536xi1>, vector<8x1536xf32>
    %c0_95 = arith.constant 0 : index
    %c0_96 = arith.constant 0 : index
    %c0_97 = arith.constant 0 : index
    %93 = vector.load %arg3[%c0_95, %c0_96, %c0_97] : memref<1x8x1536xf32, #tpu.memory_space<vmem>>, vector<1x8x1536xf32>
    %94 = vector.shape_cast %93 : vector<1x8x1536xf32> to vector<8x1536xf32>
    %95 = vector.shape_cast %92 : vector<8x1536xf32> to vector<1x8x1536xf32>
    tpu.vector_store %arg3[%c0_95, %c0_96, %c0_97], %95 {strides = array<i32>} : memref<1x8x1536xf32, #tpu.memory_space<vmem>>, vector<1x8x1536xf32>,
    return
  }
  func.func @transform_0(%arg0: i32) -> (i32, i32, i32) {
    %c0_i32 = arith.constant 0 : i32
    %c0_i32_0 = arith.constant 0 : i32
    %c0_i32_1 = arith.constant 0 : i32
    return %arg0, %c0_i32, %c0_i32_0 : i32, i32, i32
  }
  func.func @transform_1(%arg0: i32) -> (i32, i32) {
    %c0_i32 = arith.constant 0 : i32
    %c0_i32_0 = arith.constant 0 : i32
    %c0_i32_1 = arith.constant 0 : i32
    return %c0_i32, %c0_i32_0 : i32, i32
  }
  func.func @transform_2(%arg0: i32) -> (i32, i32, i32) {
    %c0_i32 = arith.constant 0 : i32
    %c0_i32_0 = arith.constant 0 : i32
    %c0_i32_1 = arith.constant 0 : i32
    return %arg0, %c0_i32, %c0_i32_0 : i32, i32, i32
  }
}

</mosaic_0001>

<bundles_post_ra>
// kernel: time_distributed2.1
= control target key start
LH: loop header
LB: loop body
LE: loop exit
PB: predicated region body
PF: predicated region fallthrough
CT: control target
= control target key end

     0   :  { %s3472_s9 = smov 0   ;;  %s4874_s0 = inlined_call_operand.vmem [shape: f32[8,4,1920], index: 0, kind: input, shape index: {}]   ;;  %s4875_s1 = inlined_call_operand.vmem [shape: f32[8,128], index: 1, kind: input, shape index: {}]   ;;  %s4876_s2 = inlined_call_operand.vmem [shape: f32[8,8,1536], index: 2, kind: output, shape index: {}]  }
   0x1 LB: > { %s3119_s10 = sadd.s32 4294967295, %s3426_s9   ;;  %p3123_p0 = scmp.ge.s32.totalorder %s3426_s9, 1  ;;  %s3426_s9 = sphi %s3472_s9, %s12_s9  }
   0x2   : > { %p112_p1 = scmp.lt.s32.totalorder %s3426_s9, 9 }
   0x4   : > { %p113_p2 = pnand %p3123_p0, %p112_p1 }
   0x5   : > { %p134_p3 = scmp.lt.s32.totalorder (!%p113_p2), %s3119_s10, 7  ;;  %s3428_s15 = smov (!%p113_p2), 127   ;;  %vm273_vm0 = vcmask (!%p113_p2), 1039360   ;;  %vm356_vm1 = vcmask (!%p113_p2), 1031168   ;;  %vm440_vm2 = vcmask (!%p113_p2), 949248   ;;  %vm523_vm3 = vcmask (!%p113_p2), 941056  }
   0x6   : > { %116 = sbr.rel (%p113_p2) target bundleno = 1042 (0x412), region = 28  ;;  %s3429_s16 = smov (!%p113_p2), 126   ;;  %vm607_vm4 = vcmask (!%p113_p2), 932864   ;;  %vm690_vm5 = vcmask (!%p113_p2), 850944   ;;  %vm774_vm6 = vcmask (!%p113_p2), 842752   ;;  %vm857_vm7 = vcmask (!%p113_p2), 834560  }
   0x7   : > { %s3430_s17 = smov (!%p113_p2), 116   ;;  %s3431_s18 = smov (!%p113_p2), 115   ;;  %vm941_vm8 = vcmask (!%p113_p2), 916480   ;;  %vm1024_vm9 = vcmask (!%p113_p2), 908288   ;;  %vm1108_vm10 = vcmask (!%p113_p2), 900096   ;;  %vm1191_vm11 = vcmask (!%p113_p2), 818176  }
   0x8   : > { %s3432_s19 = smov (!%p113_p2), 114   ;;  %s3433_s20 = smov (!%p113_p2), 104   ;;  %vm1275_vm12 = vcmask (!%p113_p2), 809984   ;;  %vm1358_vm13 = vcmask (!%p113_p2), 801792   ;;  %vm1442_vm14 = vcmask (!%p113_p2), 719872   ;;  %vm1525_vm15 = vcmask (!%p113_p2), 711680  }
   0x9   : > { %s3434_s21 = smov (!%p113_p2), 103   ;;  %s3435_s22 = smov (!%p113_p2), 102  }
   0xa   : > { %s3436_s23 = smov (!%p113_p2), 112   ;;  %s3437_s24 = smov (!%p113_p2), 111  }
   0xb   : > { %s3438_s25 = smov (!%p113_p2), 110   ;;  %s3439_s26 = smov (!%p113_p2), 100  }
   0xc   : > { %s3440_s27 = smov (!%p113_p2), 99   ;;  %s3441_s28 = smov (!%p113_p2), 98  }
   0xd   : > { %s4878_s10 = smov (!%p134_p3, %s3119_s10), 7  ;;  %s3442_s29 = smov 88  }
   0xe   : > { %s3320_s11 = smul.u32 60, %s4878_s10  ;;  %s3443_s30 = smov 87  }
   0xf   : > { %s3444_s3 = smov 86   ;;  %s3445_s4 = smov 96  }
  0x10   : > { %s3486_s14 = scalar_lea.vmem %s4874_s0, %s3320_s11  ;;  %s3446_s5 = smov 95  }
  0x11   : > { %v3489_v0 = vld [vmem:[%s3486_s14 + $0x8] sm:$0xff]  ;;  %v3492_v1 = vld [vmem:[%s3486_s14] sm:$0xff]  ;;  %v3505_v3 = vld [vmem:[%s3486_s14 + $0x10] sm:$0xff]  ;;  %s3447_s6 = smov 94   ;;  %s3448_s7 = smov 84  }
  0x12   : > { %253 = vrot.lane.b32.xlu1 %v3489_v0, %s3428_s15  ;;  %249 = vrot.lane.b32.xlu0 %v3492_v1, %s3428_s15  ;;  %v3500_v2 = vcombine.low %v3492_v1, %v3492_v1  ;;  %214 = vst [vmem:[#allocation2] sm:$0xf] %v3492_v1  ;;  %216 = vst [vmem:[#allocation2 + $0x10] sm:$0xf] %v3489_v0  ;;  %v3509_v4 = vcombine.high %v3492_v1, %v3492_v1  ;;  %v3516_v6 = vld [vmem:[%s3486_s14 + $0x18] sm:$0xff]  ;;  %v192_v11 = vld [vmem:[%s3486_s14 + $0x10] sm:$0xff] }
  0x13   : > { %v3513_v5 = vcombine.high %v3489_v0, %v3489_v0  ;;  %v3522_v7 = vcombine.low %v3489_v0, %v3489_v0  ;;  %v3526_v8 = vcombine.low %v3505_v3, %v3505_v3  ;;  %v193_v9 = vld [vmem:[%s3486_s14 + $0x18] sm:$0xff]  ;;  %v204_v12 = vcombine.high %v192_v11, %v192_v11  ;;  %218 = vst [vmem:[#allocation2 + $0x20] sm:$0xf] %v192_v11  ;;  %v194_v14 = vld [vmem:[%s3486_s14 + $0x20] sm:$0xff]  ;;  %v195_v17 = vld [vmem:[%s3486_s14 + $0x28] sm:$0xff]  ;;  %s3449_s8 = smov 83  }
  0x14   : > { %215 = vst [vmem:[#allocation2 + $0x8] sm:$0xf] %v3509_v4  ;;  %v205_v10 = vcombine.high %v193_v9, %v193_v9  ;;  %220 = vst [vmem:[#allocation2 + $0x30] sm:$0xf] %v193_v9  ;;  %v3540_v13 = vcombine.low %v3516_v6, %v3516_v6  ;;  %v3544_v15 = vld [vmem:[%s3486_s14 + $0x20] sm:$0xff]  ;;  %v206_v16 = vcombine.high %v194_v14, %v194_v14  ;;  %v3556_v20 = vld [vmem:[%s3486_s14 + $0x28] sm:$0xff] }
  0x15   : > { %217 = vst [vmem:[#allocation2 + $0x18] sm:$0xf] %v3513_v5  ;;  %219 = vst [vmem:[#allocation2 + $0x28] sm:$0xf] %v204_v12  ;;  %v207_v18 = vcombine.high %v195_v17, %v195_v17  ;;  %v3553_v19 = vcombine.low %v3544_v15, %v3544_v15  ;;  %v3564_v21 = vcombine.low %v3556_v20, %v3556_v20  ;;  %v3365_v22 = vld [vmem:[%s3486_s14 + $0x30] ss:$0 sps:$4 sm:$0xff]  }
  0x16   : > { %257 = vrot.lane.b32.xlu1 %v3505_v3, %s3428_s15  ;;  %247 = vrot.lane.b32.xlu0 %v3500_v2, %s3428_s15  ;;  %221 = vst [vmem:[#allocation2 + $0x38] sm:$0xf] %v205_v10  ;;  %222 = vst [vmem:[#allocation2 + $0x40] sm:$0xf] %v194_v14  ;;  %v3577_v23 = vcombine.high %v3505_v3, %v3505_v3  ;;  %v3583_v24 = vcombine.high %v3516_v6, %v3516_v6  ;;  %v316_v27 = vld [vmem:[%s3486_s14 + $0x30] sm:$0xf] }
  0x17   : > { %224 = vst [vmem:[#allocation2 + $0x50] sm:$0xf] %v195_v17  ;;  %223 = vst [vmem:[#allocation2 + $0x48] sm:$0xf] %v206_v16  ;;  %v3589_v25 = vcombine.high %v3544_v15, %v3544_v15  ;;  %v3595_v26 = vcombine.high %v3556_v20, %v3556_v20  ;;  %v3371_v28 = vld [vmem:[%s3486_s14 + $0x30] ss:$0 sps:$4 sm:$0xff]  }
  0x18   : > { %225 = vst [vmem:[#allocation2 + $0x58] sm:$0xf] %v207_v18  ;;  %v483_v29 = vld [vmem:[%s3486_s14 + $0x30] sm:$0xf]  ;;  %s3450_s11 = smov 82   ;;  %s3451_s12 = smov 72  }
  0x19   : > { %v3372_v41 = vld [vmem:[%s3486_s14 + $0x30] ss:$0 sps:$4 sm:$0xff]   ;;  %s3453_s13 = smov 71  }
  0x1a   : > { %251 = vrot.lane.b32.xlu1 %v3522_v7, %s3428_s15  ;;  %255 = vrot.lane.b32.xlu0 %v3526_v8, %s3428_s15  ;;  %v650_v10 = vld [vmem:[%s3486_s14 + $0x30] sm:$0xf] }
  0x1e   : > { %261 = vrot.lane.b32.xlu1 %v3516_v6, %s3428_s15  ;;  %259 = vrot.lane.b32.xlu0 %v3540_v13, %s3428_s15 }
  0x22   : > { %265 = vrot.lane.b32.xlu1 %v3544_v15, %s3428_s15  ;;  %263 = vrot.lane.b32.xlu0 %v3553_v19, %s3428_s15 }
  0x26   : > { %269 = vrot.lane.b32.xlu1 %v3556_v20, %s3428_s15  ;;  %267 = vrot.lane.b32.xlu0 %v3564_v21, %s3428_s15 }
  0x2a   : > { %330 = vrot.lane.b32.xlu1 %v3492_v1, %s3429_s16  ;;  %271 = vrot.lane.b32.xlu0 %v3365_v22, %s3428_s15  ;;  %s3455_s15 = smov 70  }
  0x2e   : > { %334 = vrot.lane.b32.xlu1 %v3489_v0, %s3429_s16  ;;  %332 = vrot.lane.b32.xlu0 %v3509_v4, %s3429_s16 }
  0x32   : > { %338 = vrot.lane.b32.xlu1 %v3505_v3, %s3429_s16  ;;  %336 = vrot.lane.b32.xlu0 %v3513_v5, %s3429_s16 }
  0x36   : > { %342 = vrot.lane.b32.xlu1 %v3516_v6, %s3429_s16  ;;  %340 = vrot.lane.b32.xlu0 %v3577_v23, %s3429_s16 }
  0x3a   : > { %346 = vrot.lane.b32.xlu1 %v3544_v15, %s3429_s16  ;;  %344 = vrot.lane.b32.xlu0 %v3583_v24, %s3429_s16 }
  0x3e   : > { %350 = vrot.lane.b32.xlu1 %v3556_v20, %s3429_s16  ;;  %348 = vrot.lane.b32.xlu0 %v3589_v25, %s3429_s16 }
  0x42   : > { %354 = vrot.lane.b32.xlu1 %v316_v27, %s3429_s16  ;;  %352 = vrot.lane.b32.xlu0 %v3595_v26, %s3429_s16 }
  0x46   : > { %416 = vrot.lane.b32.xlu1 %v3492_v1, %s3430_s17  ;;  %414 = vrot.lane.b32.xlu0 %v3500_v2, %s3430_s17 }
  0x4a   : > { %420 = vrot.lane.b32.xlu1 %v3489_v0, %s3430_s17  ;;  %418 = vrot.lane.b32.xlu0 %v3522_v7, %s3430_s17 }
  0x4e   : > { %424 = vrot.lane.b32.xlu1 %v3505_v3, %s3430_s17  ;;  %422 = vrot.lane.b32.xlu0 %v3526_v8, %s3430_s17 }
  0x52   : > { %428 = vrot.lane.b32.xlu1 %v3516_v6, %s3430_s17  ;;  %426 = vrot.lane.b32.xlu0 %v3540_v13, %s3430_s17 }
  0x56   : > { %432 = vrot.lane.b32.xlu1 %v3544_v15, %s3430_s17  ;;  %430 = vrot.lane.b32.xlu0 %v3553_v19, %s3430_s17 }
  0x5a   : > { %436 = vrot.lane.b32.xlu1 %v3556_v20, %s3430_s17  ;;  %434 = vrot.lane.b32.xlu0 %v3564_v21, %s3430_s17 }
  0x5e   : > { %497 = vrot.lane.b32.xlu1 %v3492_v1, %s3431_s18  ;;  %438 = vrot.lane.b32.xlu0 %v3371_v28, %s3430_s17 }
  0x62   : > { %501 = vrot.lane.b32.xlu1 %v3489_v0, %s3431_s18  ;;  %499 = vrot.lane.b32.xlu0 %v3509_v4, %s3431_s18 }
  0x66   : > { %505 = vrot.lane.b32.xlu1 %v3505_v3, %s3431_s18  ;;  %503 = vrot.lane.b32.xlu0 %v3513_v5, %s3431_s18 }
  0x6a   : > { %509 = vrot.lane.b32.xlu1 %v3516_v6, %s3431_s18  ;;  %507 = vrot.lane.b32.xlu0 %v3577_v23, %s3431_s18 }
  0x6e   : > { %513 = vrot.lane.b32.xlu1 %v3544_v15, %s3431_s18  ;;  %511 = vrot.lane.b32.xlu0 %v3583_v24, %s3431_s18 }
  0x72   : > { %517 = vrot.lane.b32.xlu1 %v3556_v20, %s3431_s18  ;;  %515 = vrot.lane.b32.xlu0 %v3589_v25, %s3431_s18 }
  0x76   : > { %521 = vrot.lane.b32.xlu1 %v483_v29, %s3431_s18  ;;  %519 = vrot.lane.b32.xlu0 %v3595_v26, %s3431_s18 }
  0x7a   : > { %583 = vrot.lane.b32.xlu1 %v3492_v1, %s3432_s19  ;;  %581 = vrot.lane.b32.xlu0 %v3500_v2, %s3432_s19 }
  0x7e   : > { %587 = vrot.lane.b32.xlu1 %v3489_v0, %s3432_s19  ;;  %585 = vrot.lane.b32.xlu0 %v3522_v7, %s3432_s19 }
  0x82   : > { %591 = vrot.lane.b32.xlu1 %v3505_v3, %s3432_s19  ;;  %589 = vrot.lane.b32.xlu0 %v3526_v8, %s3432_s19 }
  0x84   : > { %v254_v30 = vpop.permute.xlu1 %253  ;;  %v250_v31 = vpop.permute.xlu0 %249 }
  0x86   : > { %595 = vrot.lane.b32.xlu1 %v3516_v6, %s3432_s19  ;;  %593 = vrot.lane.b32.xlu0 %v3540_v13, %s3432_s19 }
  0x88   : > { %v258_v32 = vpop.permute.xlu1 %257  ;;  %v248_v33 = vpop.permute.xlu0 %247 }
  0x89   : > { %v274_v34 = vsel %vm273_vm0, %v248_v33, %v250_v31 }
  0x8a   : > { %298 = vst [vmem:[#allocation2] sm:$0xf0] %v274_v34  ;;  %599 = vrot.lane.b32.xlu1 %v3544_v15, %s3432_s19  ;;  %597 = vrot.lane.b32.xlu0 %v3553_v19, %s3432_s19 }
  0x8c   : > { %v252_v35 = vpop.permute.xlu1 %251  ;;  %v256_v36 = vpop.permute.xlu0 %255 }
  0x8d   : > { %v275_v37 = vsel %vm273_vm0, %v250_v31, %v252_v35  ;;  %v276_v38 = vsel %vm273_vm0, %v252_v35, %v254_v30  ;;  %v277_v39 = vsel %vm273_vm0, %v254_v30, %v256_v36  ;;  %v278_v40 = vsel %vm273_vm0, %v256_v36, %v258_v32 }
  0x8e   : > { %299 = vst [vmem:[#allocation2 + $0x8] sm:$0xf0] %v275_v37  ;;  %300 = vst [vmem:[#allocation2 + $0x10] sm:$0xf0] %v276_v38  ;;  %603 = vrot.lane.b32.xlu1 %v3556_v20, %s3432_s19  ;;  %601 = vrot.lane.b32.xlu0 %v3564_v21, %s3432_s19 }
  0x8f   : > { %301 = vst [vmem:[#allocation2 + $0x18] sm:$0xf0] %v277_v39  ;;  %302 = vst [vmem:[#allocation2 + $0x20] sm:$0xf0] %v278_v40 }
  0x90   : > { %v262_v42 = vpop.permute.xlu1 %261  ;;  %v260_v43 = vpop.permute.xlu0 %259 }
  0x91   : > { %v279_v44 = vsel %vm273_vm0, %v258_v32, %v260_v43  ;;  %v280_v45 = vsel %vm273_vm0, %v260_v43, %v262_v42  ;;  %v3373_v43 = vld [vmem:[%s3486_s14 + $0x30] ss:$0 sps:$4 sm:$0xff]  }
  0x92   : > { %303 = vst [vmem:[#allocation2 + $0x28] sm:$0xf0] %v279_v44  ;;  %304 = vst [vmem:[#allocation2 + $0x30] sm:$0xf0] %v280_v45  ;;  %664 = vrot.lane.b32.xlu1 %v3492_v1, %s3433_s20  ;;  %605 = vrot.lane.b32.xlu0 %v3372_v41, %s3432_s19 }
  0x94   : > { %v266_v46 = vpop.permute.xlu1 %265  ;;  %v264_v47 = vpop.permute.xlu0 %263 }
  0x95   : > { %v281_v48 = vsel %vm273_vm0, %v262_v42, %v264_v47  ;;  %v282_v49 = vsel %vm273_vm0, %v264_v47, %v266_v46 }
  0x96   : > { %305 = vst [vmem:[#allocation2 + $0x38] sm:$0xf0] %v281_v48  ;;  %306 = vst [vmem:[#allocation2 + $0x40] sm:$0xf0] %v282_v49  ;;  %668 = vrot.lane.b32.xlu1 %v3489_v0, %s3433_s20  ;;  %666 = vrot.lane.b32.xlu0 %v3509_v4, %s3433_s20  ;;  %v2399_v48 = vld [vmem:[#allocation2 + $0x8] sm:$0xff] }
  0x98   : > { %v270_v50 = vpop.permute.xlu1 %269  ;;  %v268_v51 = vpop.permute.xlu0 %267 }
  0x99   : > { %v283_v52 = vsel %vm273_vm0, %v266_v46, %v268_v51  ;;  %v284_v53 = vsel %vm273_vm0, %v268_v51, %v270_v50 }
  0x9a   : > { %307 = vst [vmem:[#allocation2 + $0x48] sm:$0xf0] %v283_v52  ;;  %308 = vst [vmem:[#allocation2 + $0x50] sm:$0xf0] %v284_v53  ;;  %672 = vrot.lane.b32.xlu1 %v3505_v3, %s3433_s20  ;;  %670 = vrot.lane.b32.xlu0 %v3513_v5, %s3433_s20 }
  0x9c   : > { %v331_v54 = vpop.permute.xlu1 %330  ;;  %v272_v55 = vpop.permute.xlu0 %271 }
  0x9d   : > { %v285_v56 = vsel %vm273_vm0, %v270_v50, %v272_v55  ;;  %vm1609_vm0 = vcmask 703488  }
  0x9e   : > { %309 = vst [vmem:[#allocation2 + $0x58] sm:$0xf0] %v285_v56  ;;  %676 = vrot.lane.b32.xlu1 %v3516_v6, %s3433_s20  ;;  %674 = vrot.lane.b32.xlu0 %v3577_v23, %s3433_s20 }
  0xa0   : > { %v335_v57 = vpop.permute.xlu1 %334  ;;  %v333_v58 = vpop.permute.xlu0 %332 }
  0xa1   : > { %v357_v59 = vsel %vm356_vm1, %v331_v54, %v333_v58  ;;  %v358_v60 = vsel %vm356_vm1, %v333_v58, %v335_v57 }
  0xa2   : > { %381 = vst [vmem:[#allocation2 + $0x60] sm:$0xf] %v357_v59  ;;  %382 = vst [vmem:[#allocation2 + $0x68] sm:$0xf] %v358_v60  ;;  %680 = vrot.lane.b32.xlu1 %v3544_v15, %s3433_s20  ;;  %678 = vrot.lane.b32.xlu0 %v3583_v24, %s3433_s20  ;;  %v2400_v59 = vld [vmem:[#allocation2 + $0x10] sm:$0xff] }
  0xa4   : > { %v339_v61 = vpop.permute.xlu1 %338  ;;  %v337_v62 = vpop.permute.xlu0 %336 }
  0xa5   : > { %v359_v63 = vsel %vm356_vm1, %v335_v57, %v337_v62  ;;  %v360_v9 = vsel %vm356_vm1, %v337_v62, %v339_v61  ;;  %v2401_v57 = vld [vmem:[#allocation2 + $0x18] sm:$0xff] }
  0xa6   : > { %383 = vst [vmem:[#allocation2 + $0x70] sm:$0xf] %v359_v63  ;;  %384 = vst [vmem:[#allocation2 + $0x78] sm:$0xf] %v360_v9  ;;  %684 = vrot.lane.b32.xlu1 %v3556_v20, %s3433_s20  ;;  %682 = vrot.lane.b32.xlu0 %v3589_v25, %s3433_s20 }
  0xa8   : > { %v343_v11 = vpop.permute.xlu1 %342  ;;  %v341_v12 = vpop.permute.xlu0 %340 }
  0xa9   : > { %v361_v14 = vsel %vm356_vm1, %v339_v61, %v341_v12  ;;  %v362_v16 = vsel %vm356_vm1, %v341_v12, %v343_v11 }
  0xaa   : > { %385 = vst [vmem:[#allocation2 + $0x80] sm:$0xf] %v361_v14  ;;  %386 = vst [vmem:[#allocation2 + $0x88] sm:$0xf] %v362_v16  ;;  %688 = vrot.lane.b32.xlu1 %v650_v10, %s3433_s20  ;;  %686 = vrot.lane.b32.xlu0 %v3595_v26, %s3433_s20 }
  0xac   : > { %v347_v17 = vpop.permute.xlu1 %346  ;;  %v345_v18 = vpop.permute.xlu0 %344 }
  0xad   : > { %v363_v22 = vsel %vm356_vm1, %v343_v11, %v345_v18  ;;  %v364_v27 = vsel %vm356_vm1, %v345_v18, %v347_v17 }
  0xae   : > { %387 = vst [vmem:[#allocation2 + $0x90] sm:$0xf] %v363_v22  ;;  %388 = vst [vmem:[#allocation2 + $0x98] sm:$0xf] %v364_v27  ;;  %750 = vrot.lane.b32.xlu1 %v3492_v1, %s3434_s21  ;;  %748 = vrot.lane.b32.xlu0 %v3500_v2, %s3434_s21 }
  0xb0   : > { %v351_v28 = vpop.permute.xlu1 %350  ;;  %v349_v29 = vpop.permute.xlu0 %348 }
  0xb1   : > { %v365_v30 = vsel %vm356_vm1, %v347_v17, %v349_v29  ;;  %v366_v31 = vsel %vm356_vm1, %v349_v29, %v351_v28  ;;  %v817_v17 = vld [vmem:[%s3486_s14 + $0x30] sm:$0xf] }
  0xb2   : > { %389 = vst [vmem:[#allocation2 + $0xa0] sm:$0xf] %v365_v30  ;;  %390 = vst [vmem:[#allocation2 + $0xa8] sm:$0xf] %v366_v31  ;;  %754 = vrot.lane.b32.xlu1 %v3489_v0, %s3434_s21  ;;  %752 = vrot.lane.b32.xlu0 %v3522_v7, %s3434_s21 }
  0xb4   : > { %v355_v32 = vpop.permute.xlu1 %354  ;;  %v353_v33 = vpop.permute.xlu0 %352 }
  0xb5   : > { %v367_v34 = vsel %vm356_vm1, %v351_v28, %v353_v33  ;;  %v368_v2 = vsel %vm356_vm1, %v353_v33, %v355_v32  ;;  %v3794_v32 = vld [vmem:[%s3486_s14 + $0x14] sm:$0xff]  ;;  %vm1692_vm1 = vcmask 785408  }
  0xb6   : > { %391 = vst [vmem:[#allocation2 + $0xb0] sm:$0xf] %v367_v34  ;;  %392 = vst [vmem:[#allocation2 + $0xb8] sm:$0xf] %v368_v2  ;;  %758 = vrot.lane.b32.xlu1 %v3505_v3, %s3434_s21  ;;  %756 = vrot.lane.b32.xlu0 %v3526_v8, %s3434_s21 }
  0xb8   : > { %v417_v35 = vpop.permute.xlu1 %416  ;;  %v415_v36 = vpop.permute.xlu0 %414 }
  0xb9   : > { %v441_v37 = vsel %vm440_vm2, %v415_v36, %v417_v35  ;;  %v3804_v36 = vcombine.low %v3794_v32, %v3794_v32 }
  0xba   : > { %465 = vst [vmem:[#allocation2 + $0x60] sm:$0xf0] %v441_v37  ;;  %762 = vrot.lane.b32.xlu1 %v3516_v6, %s3434_s21  ;;  %760 = vrot.lane.b32.xlu0 %v3540_v13, %s3434_s21  ;;  %v3807_v37 = vld [vmem:[%s3486_s14 + $0x1c] sm:$0xff] }
  0xbc   : > { %v421_v7 = vpop.permute.xlu1 %420  ;;  %v419_v38 = vpop.permute.xlu0 %418 }
  0xbd   : > { %v442_v39 = vsel %vm440_vm2, %v417_v35, %v419_v38  ;;  %v443_v40 = vsel %vm440_vm2, %v419_v38, %v421_v7 }
  0xbe   : > { %466 = vst [vmem:[#allocation2 + $0x68] sm:$0xf0] %v442_v39  ;;  %467 = vst [vmem:[#allocation2 + $0x70] sm:$0xf0] %v443_v40  ;;  %766 = vrot.lane.b32.xlu1 %v3544_v15, %s3434_s21  ;;  %764 = vrot.lane.b32.xlu0 %v3553_v19, %s3434_s21 }
  0xc0   : > { %v425_v8 = vpop.permute.xlu1 %424  ;;  %v423_v41 = vpop.permute.xlu0 %422 }
  0xc1   : > { %v444_v42 = vsel %vm440_vm2, %v421_v7, %v423_v41  ;;  %v445_v13 = vsel %vm440_vm2, %v423_v41, %v425_v8  ;;  %v2410_v46 = vld [vmem:[#allocation2 + $0x60] sm:$0xff] }
  0xc2   : > { %468 = vst [vmem:[#allocation2 + $0x78] sm:$0xf0] %v444_v42  ;;  %469 = vst [vmem:[#allocation2 + $0x80] sm:$0xf0] %v445_v13  ;;  %770 = vrot.lane.b32.xlu1 %v3556_v20, %s3434_s21  ;;  %768 = vrot.lane.b32.xlu0 %v3564_v21, %s3434_s21  ;;  %v2398_v21 = vld [vmem:[#allocation2] sm:$0xff] }
  0xc3   : > { %v3130_v51 = vpack.c.bf16 %v2410_v46, %v2398_v21  ;;  %v3820_v41 = vld [vmem:[%s3486_s14 + $0x24] sm:$0xff] }
  0xc4   : > { %v429_v44 = vpop.permute.xlu1 %428  ;;  %v427_v45 = vpop.permute.xlu0 %426 }
  0xc5   : > { %v446_v19 = vsel %vm440_vm2, %v425_v8, %v427_v45  ;;  %v447_v47 = vsel %vm440_vm2, %v427_v45, %v429_v44  ;;  %v2411_v49 = vld [vmem:[#allocation2 + $0x68] sm:$0xff]  ;;  %v2412_v54 = vld [vmem:[#allocation2 + $0x70] sm:$0xff]  ;;  %v3817_v8 = vcombine.low %v3807_v37, %v3807_v37 }
  0xc6   : > { %470 = vst [vmem:[#allocation2 + $0x88] sm:$0xf0] %v446_v19  ;;  %471 = vst [vmem:[#allocation2 + $0x90] sm:$0xf0] %v447_v47  ;;  %831 = vrot.lane.b32.xlu1 %v3492_v1, %s3435_s22  ;;  %772 = vrot.lane.b32.xlu0 %v3373_v43, %s3434_s21  ;;  %v3128_v50 = vpack.c.bf16 %v2411_v49, %v2399_v48  ;;  %v3162_v60 = vpack.c.bf16 %v2412_v54, %v2400_v59  ;;  %v3832_v45 = vld [vmem:[%s3486_s14 + $0x2c] sm:$0xff] }
  0xc7   : > { %v3842_v49 = vcombine.low %v3832_v45, %v3832_v45 }
  0xc8   : > { %v433_v52 = vpop.permute.xlu1 %432  ;;  %v431_v53 = vpop.permute.xlu0 %430  ;;  %3129 = vmatprep.subr.bf16.mxu0 %v3128_v50 }
  0xc9   : > { %v448_v55 = vsel %vm440_vm2, %v429_v44, %v431_v53  ;;  %v449_v56 = vsel %vm440_vm2, %v431_v53, %v433_v52  ;;  %3131 = vmatpush1.bf16.msra.mxu0 %v3130_v51  ;;  %v2413_v58 = vld [vmem:[#allocation2 + $0x78] sm:$0xff]  ;;  %v3829_v44 = vcombine.low %v3820_v41, %v3820_v41  ;;  %v3381_v53 = vld [vmem:[%s3486_s14 + $0x34] ss:$0 sps:$4 sm:$0xff]  }
  0xca   : > { %472 = vst [vmem:[#allocation2 + $0x98] sm:$0xf0] %v448_v55  ;;  %473 = vst [vmem:[#allocation2 + $0xa0] sm:$0xf0] %v449_v56  ;;  %835 = vrot.lane.b32.xlu1 %v3489_v0, %s3435_s22  ;;  %833 = vrot.lane.b32.xlu0 %v3509_v4, %s3435_s22  ;;  %v3160_v1 = vpack.c.bf16 %v2413_v58, %v2401_v57 }
  0xcc   : > { %v437_v61 = vpop.permute.xlu1 %436  ;;  %v435_v62 = vpop.permute.xlu0 %434  ;;  %3161 = vmatprep.subr.bf16.mxu1 %v3160_v1 }
  0xcd   : > { %v450_v63 = vsel %vm440_vm2, %v433_v52, %v435_v62  ;;  %v451_v9 = vsel %vm440_vm2, %v435_v62, %v437_v61  ;;  %3163 = vmatpush1.bf16.msra.mxu1 %v3162_v60 }
  0xce   : > { %474 = vst [vmem:[#allocation2 + $0xa8] sm:$0xf0] %v450_v63  ;;  %475 = vst [vmem:[#allocation2 + $0xb0] sm:$0xf0] %v451_v9  ;;  %839 = vrot.lane.b32.xlu1 %v3505_v3, %s3435_s22  ;;  %837 = vrot.lane.b32.xlu0 %v3513_v5, %s3435_s22 }
  0xd0   : > { %v498_v0 = vpop.permute.xlu1 %497  ;;  %v439_v4 = vpop.permute.xlu0 %438 }
  0xd1   : > { %v452_v10 = vsel %vm440_vm2, %v437_v61, %v439_v4  ;;  %vm1776_vm2 = vcmask 777216  }
  0xd2   : > { %476 = vst [vmem:[#allocation2 + $0xb8] sm:$0xf0] %v452_v10  ;;  %843 = vrot.lane.b32.xlu1 %v3516_v6, %s3435_s22  ;;  %841 = vrot.lane.b32.xlu0 %v3577_v23, %s3435_s22  ;;  %v3874_v10 = vcombine.high %v3794_v32, %v3794_v32 }
  0xd4   : > { %v502_v11 = vpop.permute.xlu1 %501  ;;  %v500_v12 = vpop.permute.xlu0 %499 }
  0xd5   : > { %v524_v3 = vsel %vm523_vm3, %v498_v0, %v500_v12  ;;  %v525_v5 = vsel %vm523_vm3, %v500_v12, %v502_v11 }
  0xd6   : > { %548 = vst [vmem:[#allocation2 + $0xc0] sm:$0xf] %v524_v3  ;;  %549 = vst [vmem:[#allocation2 + $0xc8] sm:$0xf] %v525_v5  ;;  %847 = vrot.lane.b32.xlu1 %v3544_v15, %s3435_s22  ;;  %845 = vrot.lane.b32.xlu0 %v3583_v24, %s3435_s22  ;;  %v3769_v15 = vld [vmem:[%s3486_s14 + $0x4] sm:$0xff]  ;;  %v3883_v5 = vcombine.high %v3807_v37, %v3807_v37 }
  0xd7   : > { %v3855_v58 = vcombine.high %v3769_v15, %v3769_v15 }
  0xd8   : > { %v506_v6 = vpop.permute.xlu1 %505  ;;  %v504_v14 = vpop.permute.xlu0 %503 }
  0xd9   : > { %v526_v23 = vsel %vm523_vm3, %v502_v11, %v504_v14  ;;  %v527_v16 = vsel %vm523_vm3, %v504_v14, %v506_v6 }
  0xda   : > { %550 = vst [vmem:[#allocation2 + $0xd0] sm:$0xf] %v526_v23  ;;  %551 = vst [vmem:[#allocation2 + $0xd8] sm:$0xf] %v527_v16  ;;  %851 = vrot.lane.b32.xlu1 %v3556_v20, %s3435_s22  ;;  %849 = vrot.lane.b32.xlu0 %v3589_v25, %s3435_s22  ;;  %v3778_v20 = vcombine.low %v3769_v15, %v3769_v15  ;;  %v3781_v25 = vld [vmem:[%s3486_s14 + $0xc] sm:$0xff] }
  0xdb   : > { %v3864_v62 = vcombine.high %v3781_v25, %v3781_v25 }
  0xdc   : > { %v510_v18 = vpop.permute.xlu1 %509  ;;  %v508_v24 = vpop.permute.xlu0 %507 }
  0xdd   : > { %v528_v22 = vsel %vm523_vm3, %v506_v6, %v508_v24  ;;  %v529_v27 = vsel %vm523_vm3, %v508_v24, %v510_v18 }
  0xde   : > { %552 = vst [vmem:[#allocation2 + $0xe0] sm:$0xf] %v528_v22  ;;  %553 = vst [vmem:[#allocation2 + $0xe8] sm:$0xf] %v529_v27  ;;  %855 = vrot.lane.b32.xlu1 %v817_v17, %s3435_s22  ;;  %853 = vrot.lane.b32.xlu0 %v3595_v26, %s3435_s22  ;;  %v3791_v26 = vcombine.low %v3781_v25, %v3781_v25  ;;  %v3893_v17 = vcombine.high %v3820_v41, %v3820_v41 }
  0xe0   : > { %v514_v28 = vpop.permute.xlu1 %513  ;;  %v512_v29 = vpop.permute.xlu0 %511 }
  0xe1   : > { %v530_v30 = vsel %vm523_vm3, %v510_v18, %v512_v29  ;;  %v531_v31 = vsel %vm523_vm3, %v512_v29, %v514_v28  ;;  %v984_v29 = vld [vmem:[%s3486_s14 + $0x34] sm:$0xf] }
  0xe2   : > { %554 = vst [vmem:[#allocation2 + $0xf0] sm:$0xf] %v530_v30  ;;  %555 = vst [vmem:[#allocation2 + $0xf8] sm:$0xf] %v531_v31  ;;  %917 = vrot.lane.b32.xlu1 %v3769_v15, %s3436_s23  ;;  %915 = vrot.lane.b32.xlu0 %v3778_v20, %s3436_s23 }
  0xe4   : > { %v518_v33 = vpop.permute.xlu1 %517  ;;  %v516_v34 = vpop.permute.xlu0 %515 }
  0xe5   : > { %v532_v2 = vsel %vm523_vm3, %v514_v28, %v516_v34  ;;  %v533_v35 = vsel %vm523_vm3, %v516_v34, %v518_v33  ;;  %v3903_v28 = vcombine.high %v3832_v45, %v3832_v45 }
  0xe6   : > { %556 = vst [vmem:[#allocation2 + $0x100] sm:$0xf] %v532_v2  ;;  %557 = vst [vmem:[#allocation2 + $0x108] sm:$0xf] %v533_v35  ;;  %921 = vrot.lane.b32.xlu1 %v3781_v25, %s3436_s23  ;;  %919 = vrot.lane.b32.xlu0 %v3791_v26, %s3436_s23 }
  0xe8   : > { %v522_v7 = vpop.permute.xlu1 %521  ;;  %v520_v38 = vpop.permute.xlu0 %519 }
  0xe9   : > { %v534_v39 = vsel %vm523_vm3, %v518_v33, %v520_v38  ;;  %v535_v40 = vsel %vm523_vm3, %v520_v38, %v522_v7  ;;  %vm1859_vm3 = vcmask 769024  }
  0xea   : > { %558 = vst [vmem:[#allocation2 + $0x110] sm:$0xf] %v534_v39  ;;  %559 = vst [vmem:[#allocation2 + $0x118] sm:$0xf] %v535_v40  ;;  %925 = vrot.lane.b32.xlu1 %v3794_v32, %s3436_s23  ;;  %923 = vrot.lane.b32.xlu0 %v3804_v36, %s3436_s23 }
  0xec   : > { %v584_v42 = vpop.permute.xlu1 %583  ;;  %v582_v13 = vpop.permute.xlu0 %581 }
  0xed   : > { %v608_v43 = vsel %vm607_vm4, %v582_v13, %v584_v42 }
  0xee   : > { %632 = vst [vmem:[#allocation2 + $0xc0] sm:$0xf0] %v608_v43  ;;  %929 = vrot.lane.b32.xlu1 %v3807_v37, %s3436_s23  ;;  %927 = vrot.lane.b32.xlu0 %v3817_v8, %s3436_s23 }
  0xf0   : > { %v588_v46 = vpop.permute.xlu1 %587  ;;  %v586_v19 = vpop.permute.xlu0 %585 }
  0xf1   : > { %v609_v47 = vsel %vm607_vm4, %v584_v42, %v586_v19  ;;  %v610_v48 = vsel %vm607_vm4, %v586_v19, %v588_v46 }
  0xf2   : > { %633 = vst [vmem:[#allocation2 + $0xc8] sm:$0xf0] %v609_v47  ;;  %634 = vst [vmem:[#allocation2 + $0xd0] sm:$0xf0] %v610_v48  ;;  %933 = vrot.lane.b32.xlu1 %v3820_v41, %s3436_s23  ;;  %931 = vrot.lane.b32.xlu0 %v3829_v44, %s3436_s23 }
  0xf4   : > { %v592_v50 = vpop.permute.xlu1 %591  ;;  %v590_v21 = vpop.permute.xlu0 %589 }
  0xf5   : > { %v611_v51 = vsel %vm607_vm4, %v588_v46, %v590_v21  ;;  %v612_v52 = vsel %vm607_vm4, %v590_v21, %v592_v50 }
  0xf6   : > { %635 = vst [vmem:[#allocation2 + $0xd8] sm:$0xf0] %v611_v51  ;;  %636 = vst [vmem:[#allocation2 + $0xe0] sm:$0xf0] %v612_v52  ;;  %937 = vrot.lane.b32.xlu1 %v3832_v45, %s3436_s23  ;;  %935 = vrot.lane.b32.xlu0 %v3842_v49, %s3436_s23 }
  0xf8   : > { %v596_v54 = vpop.permute.xlu1 %595  ;;  %v594_v55 = vpop.permute.xlu0 %593 }
  0xf9   : > { %v613_v56 = vsel %vm607_vm4, %v592_v50, %v594_v55  ;;  %v614_v57 = vsel %vm607_vm4, %v594_v55, %v596_v54 }
  0xfa   : > { %637 = vst [vmem:[#allocation2 + $0xe8] sm:$0xf0] %v613_v56  ;;  %638 = vst [vmem:[#allocation2 + $0xf0] sm:$0xf0] %v614_v57  ;;  %998 = vrot.lane.b32.xlu1 %v3769_v15, %s3437_s24  ;;  %939 = vrot.lane.b32.xlu0 %v3381_v53, %s3436_s23 }
  0xfc   : > { %v600_v1 = vpop.permute.xlu1 %599  ;;  %v598_v59 = vpop.permute.xlu0 %597 }
  0xfd   : > { %v615_v60 = vsel %vm607_vm4, %v596_v54, %v598_v59  ;;  %v616_v61 = vsel %vm607_vm4, %v598_v59, %v600_v1 }
  0xfe   : > { %639 = vst [vmem:[#allocation2 + $0xf8] sm:$0xf0] %v615_v60  ;;  %640 = vst [vmem:[#allocation2 + $0x100] sm:$0xf0] %v616_v61  ;;  %1002 = vrot.lane.b32.xlu1 %v3781_v25, %s3437_s24  ;;  %1000 = vrot.lane.b32.xlu0 %v3855_v58, %s3437_s24 }
 0x100   : > { %v604_v63 = vpop.permute.xlu1 %603  ;;  %v602_v9 = vpop.permute.xlu0 %601 }
 0x101   : > { %v617_v0 = vsel %vm607_vm4, %v600_v1, %v602_v9  ;;  %v618_v4 = vsel %vm607_vm4, %v602_v9, %v604_v63  ;;  %v3387_v1 = vld [vmem:[%s3486_s14 + $0x34] ss:$0 sps:$4 sm:$0xff]   ;;  %v2423_v9 = vld [vmem:[#allocation2 + $0xc8] sm:$0xff] }
 0x102   : > { %641 = vst [vmem:[#allocation2 + $0x108] sm:$0xf0] %v617_v0  ;;  %642 = vst [vmem:[#allocation2 + $0x110] sm:$0xf0] %v618_v4  ;;  %1006 = vrot.lane.b32.xlu1 %v3794_v32, %s3437_s24  ;;  %1004 = vrot.lane.b32.xlu0 %v3864_v62, %s3437_s24 }
 0x104   : > { %v665_v11 = vpop.permute.xlu1 %664  ;;  %v606_v12 = vpop.permute.xlu0 %605 }
 0x105   : > { %v619_v3 = vsel %vm607_vm4, %v604_v63, %v606_v12  ;;  %vm1943_vm4 = vcmask 687104  }
 0x106   : > { %643 = vst [vmem:[#allocation2 + $0x118] sm:$0xf0] %v619_v3  ;;  %1010 = vrot.lane.b32.xlu1 %v3807_v37, %s3437_s24  ;;  %1008 = vrot.lane.b32.xlu0 %v3874_v10, %s3437_s24 }
 0x108   : > { %v669_v6 = vpop.permute.xlu1 %668  ;;  %v667_v14 = vpop.permute.xlu0 %666 }
 0x109   : > { %v691_v23 = vsel %vm690_vm5, %v665_v11, %v667_v14  ;;  %v692_v16 = vsel %vm690_vm5, %v667_v14, %v669_v6 }
 0x10a   : > { %715 = vst [vmem:[#allocation2 + $0x120] sm:$0xf] %v691_v23  ;;  %716 = vst [vmem:[#allocation2 + $0x128] sm:$0xf] %v692_v16  ;;  %1014 = vrot.lane.b32.xlu1 %v3820_v41, %s3437_s24  ;;  %1012 = vrot.lane.b32.xlu0 %v3883_v5, %s3437_s24  ;;  %v2425_v16 = vld [vmem:[#allocation2 + $0xd8] sm:$0xff] }
 0x10c   : > { %v673_v18 = vpop.permute.xlu1 %672  ;;  %v671_v24 = vpop.permute.xlu0 %670 }
 0x10d   : > { %v693_v22 = vsel %vm690_vm5, %v669_v6, %v671_v24  ;;  %v694_v27 = vsel %vm690_vm5, %v671_v24, %v673_v18 }
 0x10e   : > { %717 = vst [vmem:[#allocation2 + $0x130] sm:$0xf] %v693_v22  ;;  %718 = vst [vmem:[#allocation2 + $0x138] sm:$0xf] %v694_v27  ;;  %1018 = vrot.lane.b32.xlu1 %v3832_v45, %s3437_s24  ;;  %1016 = vrot.lane.b32.xlu0 %v3893_v17, %s3437_s24  ;;  %v2424_v22 = vld [vmem:[#allocation2 + $0xd0] sm:$0xff] }
 0x110   : > { %v677_v30 = vpop.permute.xlu1 %676  ;;  %v675_v31 = vpop.permute.xlu0 %674 }
 0x111   : > { %v695_v33 = vsel %vm690_vm5, %v673_v18, %v675_v31  ;;  %v696_v34 = vsel %vm690_vm5, %v675_v31, %v677_v30 }
 0x112   : > { %719 = vst [vmem:[#allocation2 + $0x140] sm:$0xf] %v695_v33  ;;  %720 = vst [vmem:[#allocation2 + $0x148] sm:$0xf] %v696_v34  ;;  %1022 = vrot.lane.b32.xlu1 %v984_v29, %s3437_s24  ;;  %1020 = vrot.lane.b32.xlu0 %v3903_v28, %s3437_s24 }
 0x114   : > { %v681_v2 = vpop.permute.xlu1 %680  ;;  %v679_v35 = vpop.permute.xlu0 %678 }
 0x115   : > { %v697_v7 = vsel %vm690_vm5, %v677_v30, %v679_v35  ;;  %v698_v38 = vsel %vm690_vm5, %v679_v35, %v681_v2 }
 0x116   : > { %721 = vst [vmem:[#allocation2 + $0x150] sm:$0xf] %v697_v7  ;;  %722 = vst [vmem:[#allocation2 + $0x158] sm:$0xf] %v698_v38  ;;  %1084 = vrot.lane.b32.xlu1 %v3769_v15, %s3438_s25  ;;  %1082 = vrot.lane.b32.xlu0 %v3778_v20, %s3438_s25 }
 0x118   : > { %v685_v39 = vpop.permute.xlu1 %684  ;;  %v683_v40 = vpop.permute.xlu0 %682 }
 0x119   : > { %v699_v42 = vsel %vm690_vm5, %v681_v2, %v683_v40  ;;  %v700_v13 = vsel %vm690_vm5, %v683_v40, %v685_v39 }
 0x11a   : > { %723 = vst [vmem:[#allocation2 + $0x160] sm:$0xf] %v699_v42  ;;  %724 = vst [vmem:[#allocation2 + $0x168] sm:$0xf] %v700_v13  ;;  %1088 = vrot.lane.b32.xlu1 %v3781_v25, %s3438_s25  ;;  %1086 = vrot.lane.b32.xlu0 %v3791_v26, %s3438_s25 }
 0x11c   : > { %v689_v43 = vpop.permute.xlu1 %688  ;;  %v687_v46 = vpop.permute.xlu0 %686 }
 0x11d   : > { %v701_v19 = vsel %vm690_vm5, %v685_v39, %v687_v46  ;;  %v702_v47 = vsel %vm690_vm5, %v687_v46, %v689_v43  ;;  %vm2026_vm5 = vcmask 678912  }
 0x11e   : > { %725 = vst [vmem:[#allocation2 + $0x170] sm:$0xf] %v701_v19  ;;  %726 = vst [vmem:[#allocation2 + $0x178] sm:$0xf] %v702_v47  ;;  %1092 = vrot.lane.b32.xlu1 %v3794_v32, %s3438_s25  ;;  %1090 = vrot.lane.b32.xlu0 %v3804_v36, %s3438_s25 }
 0x120   : > { %v751_v48 = vpop.permute.xlu1 %750  ;;  %v749_v50 = vpop.permute.xlu0 %748 }
 0x121   : > { %v775_v21 = vsel %vm774_vm6, %v749_v50, %v751_v48 }
 0x122   : > { %799 = vst [vmem:[#allocation2 + $0x120] sm:$0xf0] %v775_v21  ;;  %1096 = vrot.lane.b32.xlu1 %v3807_v37, %s3438_s25  ;;  %1094 = vrot.lane.b32.xlu0 %v3817_v8, %s3438_s25 }
 0x124   : > { %v755_v51 = vpop.permute.xlu1 %754  ;;  %v753_v52 = vpop.permute.xlu0 %752 }
 0x125   : > { %v776_v53 = vsel %vm774_vm6, %v751_v48, %v753_v52  ;;  %v777_v54 = vsel %vm774_vm6, %v753_v52, %v755_v51 }
 0x126   : > { %800 = vst [vmem:[#allocation2 + $0x128] sm:$0xf0] %v776_v53  ;;  %801 = vst [vmem:[#allocation2 + $0x130] sm:$0xf0] %v777_v54  ;;  %1100 = vrot.lane.b32.xlu1 %v3820_v41, %s3438_s25  ;;  %1098 = vrot.lane.b32.xlu0 %v3829_v44, %s3438_s25 }
 0x128   : > { %v759_v55 = vpop.permute.xlu1 %758  ;;  %v757_v56 = vpop.permute.xlu0 %756 }
 0x129   : > { %v778_v57 = vsel %vm774_vm6, %v755_v51, %v757_v56  ;;  %v779_v8 = vsel %vm774_vm6, %v757_v56, %v759_v55  ;;  %v2434_v61 = vld [vmem:[#allocation2 + $0x120] sm:$0xff] }
 0x12a   : > { %802 = vst [vmem:[#allocation2 + $0x138] sm:$0xf0] %v778_v57  ;;  %803 = vst [vmem:[#allocation2 + $0x140] sm:$0xf0] %v779_v8  ;;  %1104 = vrot.lane.b32.xlu1 %v3832_v45, %s3438_s25  ;;  %1102 = vrot.lane.b32.xlu0 %v3842_v49, %s3438_s25  ;;  %v2422_v49 = vld [vmem:[#allocation2 + $0xc0] sm:$0xff] }
 0x12b   : > { %v3134_v11 = vpack.c.bf16 %v2434_v61, %v2422_v49 }
 0x12c   : > { %v763_v59 = vpop.permute.xlu1 %762  ;;  %v761_v60 = vpop.permute.xlu0 %760 }
 0x12d   : > { %v780_v44 = vsel %vm774_vm6, %v759_v55, %v761_v60  ;;  %v781_v63 = vsel %vm774_vm6, %v761_v60, %v763_v59  ;;  %v2435_v0 = vld [vmem:[#allocation2 + $0x128] sm:$0xff]  ;;  %v2436_v6 = vld [vmem:[#allocation2 + $0x130] sm:$0xff] }
 0x12e   : > { %804 = vst [vmem:[#allocation2 + $0x148] sm:$0xf0] %v780_v44  ;;  %805 = vst [vmem:[#allocation2 + $0x150] sm:$0xf0] %v781_v63  ;;  %1165 = vrot.lane.b32.xlu1 %v3769_v15, %s3439_s26  ;;  %1106 = vrot.lane.b32.xlu0 %v3387_v1, %s3438_s25  ;;  %v3132_v4 = vpack.c.bf16 %v2435_v0, %v2423_v9  ;;  %v3166_v27 = vpack.c.bf16 %v2436_v6, %v2424_v22 }
 0x130   : > { %v767_v12 = vpop.permute.xlu1 %766  ;;  %v765_v3 = vpop.permute.xlu0 %764  ;;  %3133 = vmatprep.subr.bf16.mxu0 %v3132_v4 }
 0x131   : > { %v782_v14 = vsel %vm774_vm6, %v763_v59, %v765_v3  ;;  %v783_v23 = vsel %vm774_vm6, %v765_v3, %v767_v12  ;;  %3135 = vmatpush1.bf16.msra.mxu0 %v3134_v11  ;;  %v2437_v18 = vld [vmem:[#allocation2 + $0x138] sm:$0xff] }
 0x132   : > { %806 = vst [vmem:[#allocation2 + $0x158] sm:$0xf0] %v782_v14  ;;  %807 = vst [vmem:[#allocation2 + $0x160] sm:$0xf0] %v783_v23  ;;  %1169 = vrot.lane.b32.xlu1 %v3781_v25, %s3439_s26  ;;  %1167 = vrot.lane.b32.xlu0 %v3855_v58, %s3439_s26  ;;  %v3164_v24 = vpack.c.bf16 %v2437_v18, %v2425_v16 }
 0x134   : > { %v771_v29 = vpop.permute.xlu1 %770  ;;  %v769_v30 = vpop.permute.xlu0 %768  ;;  %3165 = vmatprep.subr.bf16.mxu1 %v3164_v24 }
 0x135   : > { %v784_v31 = vsel %vm774_vm6, %v767_v12, %v769_v30  ;;  %v785_v33 = vsel %vm774_vm6, %v769_v30, %v771_v29  ;;  %3167 = vmatpush1.bf16.msra.mxu1 %v3166_v27 }
 0x136   : > { %808 = vst [vmem:[#allocation2 + $0x168] sm:$0xf0] %v784_v31  ;;  %809 = vst [vmem:[#allocation2 + $0x170] sm:$0xf0] %v785_v33  ;;  %1173 = vrot.lane.b32.xlu1 %v3794_v32, %s3439_s26  ;;  %1171 = vrot.lane.b32.xlu0 %v3864_v62, %s3439_s26  ;;  %v4057_v33 = vld [vmem:[%s3486_s14 + $0x10] sm:$0xff] }
 0x138   : > { %v832_v34 = vpop.permute.xlu1 %831  ;;  %v773_v2 = vpop.permute.xlu0 %772 }
 0x139   : > { %v786_v35 = vsel %vm774_vm6, %v771_v29, %v773_v2  ;;  %vm2110_vm6 = vcmask 670720  }
 0x13a   : > { %810 = vst [vmem:[#allocation2 + $0x178] sm:$0xf0] %v786_v35  ;;  %1177 = vrot.lane.b32.xlu1 %v3807_v37, %s3439_s26  ;;  %1175 = vrot.lane.b32.xlu0 %v3874_v10, %s3439_s26 }
 0x13c   : > { %v836_v7 = vpop.permute.xlu1 %835  ;;  %v834_v38 = vpop.permute.xlu0 %833 }
 0x13d   : > { %v858_v39 = vsel %vm857_vm7, %v832_v34, %v834_v38  ;;  %v859_v40 = vsel %vm857_vm7, %v834_v38, %v836_v7 }
 0x13e   : > { %882 = vst [vmem:[#allocation2 + $0x180] sm:$0xf] %v858_v39  ;;  %883 = vst [vmem:[#allocation2 + $0x188] sm:$0xf] %v859_v40  ;;  %1181 = vrot.lane.b32.xlu1 %v3820_v41, %s3439_s26  ;;  %1179 = vrot.lane.b32.xlu0 %v3883_v5, %s3439_s26  ;;  %v4076_v40 = vld [vmem:[%s3486_s14 + $0x18] sm:$0xff] }
 0x140   : > { %v840_v42 = vpop.permute.xlu1 %839  ;;  %v838_v37 = vpop.permute.xlu0 %837 }
 0x141   : > { %v860_v13 = vsel %vm857_vm7, %v836_v7, %v838_v37  ;;  %v861_v43 = vsel %vm857_vm7, %v838_v37, %v840_v42 }
 0x142   : > { %884 = vst [vmem:[#allocation2 + $0x190] sm:$0xf] %v860_v13  ;;  %885 = vst [vmem:[#allocation2 + $0x198] sm:$0xf] %v861_v43  ;;  %1185 = vrot.lane.b32.xlu1 %v3832_v45, %s3439_s26  ;;  %1183 = vrot.lane.b32.xlu0 %v3893_v17, %s3439_s26  ;;  %v4086_v43 = vcombine.low %v4057_v33, %v4057_v33 }
 0x144   : > { %v844_v46 = vpop.permute.xlu1 %843  ;;  %v842_v19 = vpop.permute.xlu0 %841 }
 0x145   : > { %v862_v41 = vsel %vm857_vm7, %v840_v42, %v842_v19  ;;  %v863_v5 = vsel %vm857_vm7, %v842_v19, %v844_v46 }
 0x146   : > { %886 = vst [vmem:[#allocation2 + $0x1a0] sm:$0xf] %v862_v41  ;;  %887 = vst [vmem:[#allocation2 + $0x1a8] sm:$0xf] %v863_v5  ;;  %1253 = vrot.lane.b32.xlu1 %v3791_v26, %s3440_s27  ;;  %1251 = vrot.lane.b32.xlu0 %v3769_v15, %s3440_s27 }
 0x148   : > { %v848_v47 = vpop.permute.xlu1 %847  ;;  %v846_v45 = vpop.permute.xlu0 %845 }
 0x149   : > { %v864_v48 = vsel %vm857_vm7, %v844_v46, %v846_v45  ;;  %v865_v17 = vsel %vm857_vm7, %v846_v45, %v848_v47 }
 0x14a   : > { %888 = vst [vmem:[#allocation2 + $0x1b0] sm:$0xf] %v864_v48  ;;  %889 = vst [vmem:[#allocation2 + $0x1b8] sm:$0xf] %v865_v17  ;;  %1257 = vrot.lane.b32.xlu1 %v3804_v36, %s3440_s27  ;;  %1255 = vrot.lane.b32.xlu0 %v3781_v25, %s3440_s27 }
 0x14c   : > { %v852_v50 = vpop.permute.xlu1 %851  ;;  %v850_v21 = vpop.permute.xlu0 %849 }
 0x14d   : > { %v866_v51 = vsel %vm857_vm7, %v848_v47, %v850_v21  ;;  %v867_v52 = vsel %vm857_vm7, %v850_v21, %v852_v50  ;;  %v4096_v47 = vcombine.low %v4076_v40, %v4076_v40 }
 0x14e   : > { %890 = vst [vmem:[#allocation2 + $0x1c0] sm:$0xf] %v866_v51  ;;  %891 = vst [vmem:[#allocation2 + $0x1c8] sm:$0xf] %v867_v52  ;;  %1336 = vrot.lane.b32.xlu1 %v3781_v25, %s3441_s28  ;;  %1334 = vrot.lane.b32.xlu0 %v3855_v58, %s3441_s28 }
 0x150   : > { %v856_v53 = vpop.permute.xlu1 %855  ;;  %v854_v54 = vpop.permute.xlu0 %853 }
 0x151   : > { %v868_v55 = vsel %vm857_vm7, %v852_v50, %v854_v54  ;;  %v869_v56 = vsel %vm857_vm7, %v854_v54, %v856_v53  ;;  %vm2193_vm7 = vcmask 588800  }
 0x152   : > { %892 = vst [vmem:[#allocation2 + $0x1d0] sm:$0xf] %v868_v55  ;;  %893 = vst [vmem:[#allocation2 + $0x1d8] sm:$0xf] %v869_v56  ;;  %1340 = vrot.lane.b32.xlu1 %v3794_v32, %s3441_s28  ;;  %1338 = vrot.lane.b32.xlu0 %v3864_v62, %s3441_s28 }
 0x154   : > { %v918_v57 = vpop.permute.xlu1 %917  ;;  %v916_v8 = vpop.permute.xlu0 %915 }
 0x155   : > { %v942_v1 = vsel %vm941_vm8, %v916_v8, %v918_v57 }
 0x156   : > { %966 = vst [vmem:[#allocation2 + $0x180] sm:$0xf0] %v942_v1  ;;  %1420 = vrot.lane.b32.xlu1 %v3791_v26, %s3442_s29  ;;  %1418 = vrot.lane.b32.xlu0 %v3769_v15, %s3442_s29 }
 0x158   : > { %v922_v59 = vpop.permute.xlu1 %921  ;;  %v920_v60 = vpop.permute.xlu0 %919 }
 0x159   : > { %v943_v61 = vsel %vm941_vm8, %v918_v57, %v920_v60  ;;  %v944_v44 = vsel %vm941_vm8, %v920_v60, %v922_v59 }
 0x15a   : > { %967 = vst [vmem:[#allocation2 + $0x188] sm:$0xf0] %v943_v61  ;;  %968 = vst [vmem:[#allocation2 + $0x190] sm:$0xf0] %v944_v44  ;;  %1424 = vrot.lane.b32.xlu1 %v3804_v36, %s3442_s29  ;;  %1422 = vrot.lane.b32.xlu0 %v3781_v25, %s3442_s29 }
 0x15c   : > { %v926_v63 = vpop.permute.xlu1 %925  ;;  %v924_v9 = vpop.permute.xlu0 %923 }
 0x15d   : > { %v945_v0 = vsel %vm941_vm8, %v922_v59, %v924_v9  ;;  %v946_v4 = vsel %vm941_vm8, %v924_v9, %v926_v63 }
 0x15e   : > { %969 = vst [vmem:[#allocation2 + $0x198] sm:$0xf0] %v945_v0  ;;  %970 = vst [vmem:[#allocation2 + $0x1a0] sm:$0xf0] %v946_v4  ;;  %1332 = vrot.lane.b32.xlu1 %v3769_v15, %s3441_s28  ;;  %1249 = vrot.lane.b32.xlu0 %v3778_v20, %s3440_s27 }
 0x160   : > { %v930_v49 = vpop.permute.xlu1 %929  ;;  %v928_v11 = vpop.permute.xlu0 %927 }
 0x161   : > { %v947_v12 = vsel %vm941_vm8, %v926_v63, %v928_v11  ;;  %v948_v3 = vsel %vm941_vm8, %v928_v11, %v930_v49  ;;  %v2447_v11 = vld [vmem:[#allocation2 + $0x188] sm:$0xff] }
 0x162   : > { %971 = vst [vmem:[#allocation2 + $0x1a8] sm:$0xf0] %v947_v12  ;;  %972 = vst [vmem:[#allocation2 + $0x1b0] sm:$0xf0] %v948_v3  ;;  %1501 = vrot.lane.b32.xlu1 %v3855_v58, %s3443_s30  ;;  %1416 = vrot.lane.b32.xlu0 %v3778_v20, %s3442_s29 }
 0x164   : > { %v934_v6 = vpop.permute.xlu1 %933  ;;  %v932_v14 = vpop.permute.xlu0 %931 }
 0x165   : > { %v949_v23 = vsel %vm941_vm8, %v930_v49, %v932_v14  ;;  %v950_v16 = vsel %vm941_vm8, %v932_v14, %v934_v6 }
 0x166   : > { %973 = vst [vmem:[#allocation2 + $0x1b8] sm:$0xf0] %v949_v23  ;;  %974 = vst [vmem:[#allocation2 + $0x1c0] sm:$0xf0] %v950_v16  ;;  %1505 = vrot.lane.b32.xlu1 %v3864_v62, %s3443_s30  ;;  %1503 = vrot.lane.b32.xlu0 %v3781_v25, %s3443_s30  ;;  %v4045_v62 = vld [vmem:[%s3486_s14 + $0x8] sm:$0xff] }
 0x167   : > { %v4054_v31 = vcombine.high %v4045_v62, %v4045_v62  ;;  %v4108_v54 = vcombine.low %v4045_v62, %v4045_v62 }
 0x168   : > { %v938_v18 = vpop.permute.xlu1 %937  ;;  %v936_v58 = vpop.permute.xlu0 %935 }
 0x169   : > { %v951_v24 = vsel %vm941_vm8, %v934_v6, %v936_v58  ;;  %v952_v22 = vsel %vm941_vm8, %v936_v58, %v938_v18  ;;  %v2446_v6 = vld [vmem:[#allocation2 + $0x180] sm:$0xff] }
 0x16a   : > { %975 = vst [vmem:[#allocation2 + $0x1c8] sm:$0xf0] %v951_v24  ;;  %976 = vst [vmem:[#allocation2 + $0x1d0] sm:$0xf0] %v952_v22  ;;  %1585 = vrot.lane.b32.xlu1 %v3769_v15, %s3444_s3  ;;  %1507 = vrot.lane.b32.xlu0 %v3794_v32, %s3443_s30  ;;  %v2449_v22 = vld [vmem:[#allocation2 + $0x198] sm:$0xff] }
 0x16c   : > { %v999_v27 = vpop.permute.xlu1 %998  ;;  %v940_v29 = vpop.permute.xlu0 %939 }
 0x16d   : > { %v953_v30 = vsel %vm941_vm8, %v938_v18, %v940_v29  ;;  %vm2277_vm8 = vcmask 580608  }
 0x16e   : > { %977 = vst [vmem:[#allocation2 + $0x1d8] sm:$0xf0] %v953_v30  ;;  %1589 = vrot.lane.b32.xlu1 %v3781_v25, %s3444_s3  ;;  %1587 = vrot.lane.b32.xlu0 %v3791_v26, %s3444_s3  ;;  %v4067_v25 = vcombine.high %v4057_v33, %v4057_v33  ;;  %v2448_v30 = vld [vmem:[#allocation2 + $0x190] sm:$0xff] }
 0x170   : > { %v1003_v32 = vpop.permute.xlu1 %1002  ;;  %v1001_v34 = vpop.permute.xlu0 %1000 }
 0x171   : > { %v1025_v2 = vsel %vm1024_vm9, %v999_v27, %v1001_v34  ;;  %v1026_v35 = vsel %vm1024_vm9, %v1001_v34, %v1003_v32 }
 0x172   : > { %1049 = vst [vmem:[#allocation2 + $0x1e0] sm:$0xf] %v1025_v2  ;;  %1050 = vst [vmem:[#allocation2 + $0x1e8] sm:$0xf] %v1026_v35  ;;  %1668 = vrot.lane.b32.xlu1 %v4054_v31, %s3445_s4  ;;  %1591 = vrot.lane.b32.xlu0 %v3804_v36, %s3444_s3 }
 0x174   : > { %v1007_v26 = vpop.permute.xlu1 %1006  ;;  %v1005_v7 = vpop.permute.xlu0 %1004 }
 0x175   : > { %v1027_v38 = vsel %vm1024_vm9, %v1003_v32, %v1005_v7  ;;  %v1028_v39 = vsel %vm1024_vm9, %v1005_v7, %v1007_v26 }
 0x176   : > { %1051 = vst [vmem:[#allocation2 + $0x1f0] sm:$0xf] %v1027_v38  ;;  %1052 = vst [vmem:[#allocation2 + $0x1f8] sm:$0xf] %v1028_v39  ;;  %1672 = vrot.lane.b32.xlu1 %v4067_v25, %s3445_s4  ;;  %1670 = vrot.lane.b32.xlu0 %v4057_v33, %s3445_s4 }
 0x178   : > { %v1011_v36 = vpop.permute.xlu1 %1010  ;;  %v1009_v42 = vpop.permute.xlu0 %1008 }
 0x179   : > { %v1029_v37 = vsel %vm1024_vm9, %v1007_v26, %v1009_v42  ;;  %v1030_v13 = vsel %vm1024_vm9, %v1009_v42, %v1011_v36 }
 0x17a   : > { %1053 = vst [vmem:[#allocation2 + $0x200] sm:$0xf] %v1029_v37  ;;  %1054 = vst [vmem:[#allocation2 + $0x208] sm:$0xf] %v1030_v13  ;;  %1752 = vrot.lane.b32.xlu1 %v4045_v62, %s3446_s5  ;;  %1674 = vrot.lane.b32.xlu0 %v4076_v40, %s3445_s4 }
 0x17c   : > { %v1015_v46 = vpop.permute.xlu1 %1014  ;;  %v1013_v19 = vpop.permute.xlu0 %1012 }
 0x17d   : > { %v1031_v41 = vsel %vm1024_vm9, %v1011_v36, %v1013_v19  ;;  %v1032_v5 = vsel %vm1024_vm9, %v1013_v19, %v1015_v46 }
 0x17e   : > { %1055 = vst [vmem:[#allocation2 + $0x210] sm:$0xf] %v1031_v41  ;;  %1056 = vst [vmem:[#allocation2 + $0x218] sm:$0xf] %v1032_v5  ;;  %1756 = vrot.lane.b32.xlu1 %v4057_v33, %s3446_s5  ;;  %1754 = vrot.lane.b32.xlu0 %v4086_v43, %s3446_s5 }
 0x180   : > { %v1019_v45 = vpop.permute.xlu1 %1018  ;;  %v1017_v48 = vpop.permute.xlu0 %1016 }
 0x181   : > { %v1033_v17 = vsel %vm1024_vm9, %v1015_v46, %v1017_v48  ;;  %v1034_v50 = vsel %vm1024_vm9, %v1017_v48, %v1019_v45 }
 0x182   : > { %1057 = vst [vmem:[#allocation2 + $0x220] sm:$0xf] %v1033_v17  ;;  %1058 = vst [vmem:[#allocation2 + $0x228] sm:$0xf] %v1034_v50  ;;  %1499 = vrot.lane.b32.xlu1 %v3769_v15, %s3443_s30  ;;  %1758 = vrot.lane.b32.xlu0 %v4096_v47, %s3446_s5 }
 0x184   : > { %v1023_v21 = vpop.permute.xlu1 %1022  ;;  %v1021_v51 = vpop.permute.xlu0 %1020 }
 0x185   : > { %v1035_v52 = vsel %vm1024_vm9, %v1019_v45, %v1021_v51  ;;  %v1036_v53 = vsel %vm1024_vm9, %v1021_v51, %v1023_v21  ;;  %vm2360_vm9 = vcmask 572416  }
 0x186   : > { %1059 = vst [vmem:[#allocation2 + $0x230] sm:$0xf] %v1035_v52  ;;  %1060 = vst [vmem:[#allocation2 + $0x238] sm:$0xf] %v1036_v53  ;;  %1666 = vrot.lane.b32.xlu1 %v4045_v62, %s3445_s4  ;;  %1583 = vrot.lane.b32.xlu0 %v3778_v20, %s3444_s3 }
 0x188   : > { %v1085_v15 = vpop.permute.xlu1 %1084  ;;  %v1083_v55 = vpop.permute.xlu0 %1082 }
 0x189   : > { %v1109_v56 = vsel %vm1108_vm10, %v1083_v55, %v1085_v15 }
 0x18a   : > { %1133 = vst [vmem:[#allocation2 + $0x1e0] sm:$0xf0] %v1109_v56  ;;  %1835 = vrot.lane.b32.xlu1 %v4054_v31, %s3447_s6  ;;  %1750 = vrot.lane.b32.xlu0 %v4108_v54, %s3446_s5 }
 0x18c   : > { %v1089_v57 = vpop.permute.xlu1 %1088  ;;  %v1087_v8 = vpop.permute.xlu0 %1086 }
 0x18d   : > { %v1110_v1 = vsel %vm1108_vm10, %v1085_v15, %v1087_v8  ;;  %v1111_v59 = vsel %vm1108_vm10, %v1087_v8, %v1089_v57 }
 0x18e   : > { %1134 = vst [vmem:[#allocation2 + $0x1e8] sm:$0xf0] %v1110_v1  ;;  %1135 = vst [vmem:[#allocation2 + $0x1f0] sm:$0xf0] %v1111_v59  ;;  %1839 = vrot.lane.b32.xlu1 %v4067_v25, %s3447_s6  ;;  %1837 = vrot.lane.b32.xlu0 %v4057_v33, %s3447_s6 }
 0x190   : > { %v1093_v20 = vpop.permute.xlu1 %1092  ;;  %v1091_v60 = vpop.permute.xlu0 %1090 }
 0x191   : > { %v1112_v61 = vsel %vm1108_vm10, %v1089_v57, %v1091_v60  ;;  %v1113_v44 = vsel %vm1108_vm10, %v1091_v60, %v1093_v20  ;;  %v2458_v0 = vld [vmem:[#allocation2 + $0x1e0] sm:$0xff]  ;;  %v3454_v60 = vmov 1.0  }
 0x192   : > { %1136 = vst [vmem:[#allocation2 + $0x1f8] sm:$0xf0] %v1112_v61  ;;  %1137 = vst [vmem:[#allocation2 + $0x200] sm:$0xf0] %v1113_v44  ;;  %1919 = vrot.lane.b32.xlu1 %v4045_v62, %s3448_s7  ;;  %1841 = vrot.lane.b32.xlu0 %v4076_v40, %s3447_s6  ;;  %v3138_v14 = vpack.c.bf16 %v2458_v0, %v2446_v6 }
 0x194   : > { %v1097_v63 = vpop.permute.xlu1 %1096  ;;  %v1095_v9 = vpop.permute.xlu0 %1094 }
 0x195   : > { %v1114_v4 = vsel %vm1108_vm10, %v1093_v20, %v1095_v9  ;;  %v1115_v49 = vsel %vm1108_vm10, %v1095_v9, %v1097_v63  ;;  %v2459_v12 = vld [vmem:[#allocation2 + $0x1e8] sm:$0xff]  ;;  %v2460_v18 = vld [vmem:[#allocation2 + $0x1f0] sm:$0xff]  ;;  %v3452_v20 = vmov 0.0  }
 0x196   : > { %1138 = vst [vmem:[#allocation2 + $0x208] sm:$0xf0] %v1114_v4  ;;  %1139 = vst [vmem:[#allocation2 + $0x210] sm:$0xf0] %v1115_v49  ;;  %1923 = vrot.lane.b32.xlu1 %v4057_v33, %s3448_s7  ;;  %1921 = vrot.lane.b32.xlu0 %v4086_v43, %s3448_s7  ;;  %v3136_v3 = vpack.c.bf16 %v2459_v12, %v2447_v11  ;;  %v3170_v32 = vpack.c.bf16 %v2460_v18, %v2448_v30 }
 0x197   : > { %144 = vst [vmem:[#allocation2 + $0x4e0] sm:$0xf0] %v3452_v20  ;;  %145 = vst [vmem:[#allocation2 + $0x4e8] sm:$0xf0] %v3452_v20  ;;  %2725 = vmatprep.mubr.f32.mxu1 %v3452_v20  ;;  %2654 = vmatprep.mubr.f32.mxu0 %v3452_v20 }
 0x198   : > { %v1101_v23 = vpop.permute.xlu1 %1100  ;;  %v1099_v16 = vpop.permute.xlu0 %1098  ;;  %3137 = vmatprep.subr.bf16.mxu0 %v3136_v3  ;;  %146 = vst [vmem:[#allocation2 + $0x4f0] sm:$0xf0] %v3452_v20  ;;  %147 = vst [vmem:[#allocation2 + $0x4f8] sm:$0xf0] %v3452_v20 }
 0x199   : > { %v1116_v58 = vsel %vm1108_vm10, %v1097_v63, %v1099_v16  ;;  %v1117_v24 = vsel %vm1108_vm10, %v1099_v16, %v1101_v23  ;;  %3139 = vmatpush1.bf16.msra.mxu0 %v3138_v14  ;;  %v2461_v27 = vld [vmem:[#allocation2 + $0x1f8] sm:$0xff]  ;;  %148 = vst [vmem:[#allocation2 + $0x500] sm:$0xf0] %v3452_v20  ;;  %149 = vst [vmem:[#allocation2 + $0x508] sm:$0xf0] %v3452_v20 }
 0x19a   : > { %1140 = vst [vmem:[#allocation2 + $0x218] sm:$0xf0] %v1116_v58  ;;  %1141 = vst [vmem:[#allocation2 + $0x220] sm:$0xf0] %v1117_v24  ;;  %2002 = vrot.lane.b32.xlu1 %v4054_v31, %s3449_s8  ;;  %1925 = vrot.lane.b32.xlu0 %v4096_v47, %s3448_s7  ;;  %v3168_v29 = vpack.c.bf16 %v2461_v27, %v2449_v22  ;;  %v4241_v14 = vld [vmem:[%s3486_s14 + $0x1c] sm:$0xff]  ;;  %v4257_v58 = vld [vmem:[%s3486_s14 + $0x24] sm:$0xff] }
 0x19b   : > { %150 = vst [vmem:[#allocation2 + $0x510] sm:$0xf0] %v3452_v20  ;;  %151 = vst [vmem:[#allocation2 + $0x518] sm:$0xf0] %v3452_v20  ;;  %v4254_v18 = vcombine.low %v4241_v14, %v4241_v14 }
 0x19c   : > { %v1105_v34 = vpop.permute.xlu1 %1104  ;;  %v1103_v2 = vpop.permute.xlu0 %1102  ;;  %3169 = vmatprep.subr.bf16.mxu1 %v3168_v29  ;;  %152 = vst [vmem:[#allocation2 + $0x520] sm:$0xf0] %v3452_v20  ;;  %153 = vst [vmem:[#allocation2 + $0x528] sm:$0xf0] %v3452_v20 }
 0x19d   : > { %v1118_v35 = vsel %vm1108_vm10, %v1101_v23, %v1103_v2  ;;  %v1119_v26 = vsel %vm1108_vm10, %v1103_v2, %v1105_v34  ;;  %3171 = vmatpush1.bf16.msra.mxu1 %v3170_v32  ;;  %154 = vst [vmem:[#allocation2 + $0x530] sm:$0xf0] %v3452_v20  ;;  %155 = vst [vmem:[#allocation2 + $0x538] sm:$0xf0] %v3452_v20 }
 0x19e   : > { %1142 = vst [vmem:[#allocation2 + $0x228] sm:$0xf0] %v1118_v35  ;;  %1143 = vst [vmem:[#allocation2 + $0x230] sm:$0xf0] %v1119_v26  ;;  %2006 = vrot.lane.b32.xlu1 %v4067_v25, %s3449_s8  ;;  %2004 = vrot.lane.b32.xlu0 %v4057_v33, %s3449_s8 }
 0x19f   : > { %156 = vst [vmem:[#allocation2 + $0x540] sm:$0xff] %v3452_v20  ;;  %181 = vst [vmem:[#allocation2 + $0x4e4] ss:$8 sm:$0xf] %v3454_v60 }
 0x1a0   : > { %v1166_v7 = vpop.permute.xlu1 %1165  ;;  %v1107_v38 = vpop.permute.xlu0 %1106  ;;  %182 = vst [vmem:[#allocation2 + $0x4e4] ss:$8 sm:$0xf0] %v3454_v60 }
 0x1a1   : > { %v1120_v39 = vsel %vm1108_vm10, %v1105_v34, %v1107_v38  ;;  %v4271_v34 = vcombine.low %v4257_v58, %v4257_v58 }
 0x1a2   : > { %1144 = vst [vmem:[#allocation2 + $0x238] sm:$0xf0] %v1120_v39  ;;  %2086 = vrot.lane.b32.xlu1 %v4045_v62, %s3450_s11  ;;  %2008 = vrot.lane.b32.xlu0 %v4076_v40, %s3449_s8 }
 0x1a4   : > { %v1170_v36 = vpop.permute.xlu1 %1169  ;;  %v1168_v42 = vpop.permute.xlu0 %1167 }
 0x1a5   : > { %v1192_v37 = vsel %vm1191_vm11, %v1166_v7, %v1168_v42  ;;  %v1193_v13 = vsel %vm1191_vm11, %v1168_v42, %v1170_v36 }
 0x1a6   : > { %1216 = vst [vmem:[#allocation2 + $0x240] sm:$0xf] %v1192_v37  ;;  %1217 = vst [vmem:[#allocation2 + $0x248] sm:$0xf] %v1193_v13  ;;  %2090 = vrot.lane.b32.xlu1 %v4057_v33, %s3450_s11  ;;  %2088 = vrot.lane.b32.xlu0 %v4086_v43, %s3450_s11 }
 0x1a8   : > { %v1174_v46 = vpop.permute.xlu1 %1173  ;;  %v1172_v19 = vpop.permute.xlu0 %1171 }
 0x1a9   : > { %v1194_v41 = vsel %vm1191_vm11, %v1170_v36, %v1172_v19  ;;  %v1195_v5 = vsel %vm1191_vm11, %v1172_v19, %v1174_v46 }
 0x1aa   : > { %1218 = vst [vmem:[#allocation2 + $0x250] sm:$0xf] %v1194_v41  ;;  %1219 = vst [vmem:[#allocation2 + $0x258] sm:$0xf] %v1195_v5  ;;  %1833 = vrot.lane.b32.xlu1 %v4045_v62, %s3447_s6  ;;  %2092 = vrot.lane.b32.xlu0 %v4096_v47, %s3450_s11  ;;  %v1329_v5 = vcombine.high %v4241_v14, %v4241_v14 }
 0x1ac   : > { %v1178_v45 = vpop.permute.xlu1 %1177  ;;  %v1176_v48 = vpop.permute.xlu0 %1175 }
 0x1ad   : > { %v1196_v17 = vsel %vm1191_vm11, %v1174_v46, %v1176_v48  ;;  %v1197_v50 = vsel %vm1191_vm11, %v1176_v48, %v1178_v45 }
 0x1ae   : > { %1220 = vst [vmem:[#allocation2 + $0x260] sm:$0xf] %v1196_v17  ;;  %1221 = vst [vmem:[#allocation2 + $0x268] sm:$0xf] %v1197_v50  ;;  %2000 = vrot.lane.b32.xlu1 %v4045_v62, %s3449_s8  ;;  %1917 = vrot.lane.b32.xlu0 %v4108_v54, %s3448_s7 }
 0x1b0   : > { %v1182_v21 = vpop.permute.xlu1 %1181  ;;  %v1180_v51 = vpop.permute.xlu0 %1179 }
 0x1b1   : > { %v1198_v52 = vsel %vm1191_vm11, %v1178_v45, %v1180_v51  ;;  %v1199_v53 = vsel %vm1191_vm11, %v1180_v51, %v1182_v21 }
 0x1b2   : > { %1222 = vst [vmem:[#allocation2 + $0x270] sm:$0xf] %v1198_v52  ;;  %1223 = vst [vmem:[#allocation2 + $0x278] sm:$0xf] %v1199_v53  ;;  %2169 = vrot.lane.b32.xlu1 %v4054_v31, %s3451_s12  ;;  %2084 = vrot.lane.b32.xlu0 %v4108_v54, %s3450_s11 }
 0x1b4   : > { %v4178_v15 = vpop.permute.xlu1 %1185  ;;  %v1184_v55 = vpop.permute.xlu0 %1183 }
 0x1b5   : > { %v1200_v56 = vsel %vm1191_vm11, %v1182_v21, %v1184_v55  ;;  %v1201_v57 = vsel %vm1191_vm11, %v1184_v55, %v4178_v15 }
 0x1b6   : > { %1224 = vst [vmem:[#allocation2 + $0x280] sm:$0xf] %v1200_v56  ;;  %1225 = vst [vmem:[#allocation2 + $0x288] sm:$0xf] %v1201_v57  ;;  %2173 = vrot.lane.b32.xlu1 %v4067_v25, %s3451_s12  ;;  %2171 = vrot.lane.b32.xlu0 %v4057_v33, %s3451_s12 }
 0x1b8   : > { %v1254_v8 = vpop.permute.xlu1 %1253  ;;  %v4187_v1 = vpop.permute.xlu0 %1251 }
 0x1b9   : > { %v1277_v59 = vsel %vm1275_vm12, %v4187_v1, %v1254_v8 }
 0x1ba   : > { %1301 = vst [vmem:[#allocation2 + $0x248] sm:$0xf0] %v1277_v59  ;;  %2253 = vrot.lane.b32.xlu1 %v4045_v62, %s3453_s13  ;;  %2175 = vrot.lane.b32.xlu0 %v4076_v40, %s3451_s12 }
 0x1bc   : > { %v4212_v61 = vpop.permute.xlu1 %1257  ;;  %v1256_v44 = vpop.permute.xlu0 %1255 }
 0x1bd   : > { %v1278_v63 = vsel %vm1275_vm12, %v1254_v8, %v1256_v44  ;;  %v1279_v9 = vsel %vm1275_vm12, %v1256_v44, %v4212_v61 }
 0x1be   : > { %1302 = vst [vmem:[#allocation2 + $0x250] sm:$0xf0] %v1278_v63  ;;  %1303 = vst [vmem:[#allocation2 + $0x258] sm:$0xf0] %v1279_v9  ;;  %2257 = vrot.lane.b32.xlu1 %v4057_v33, %s3453_s13  ;;  %2255 = vrot.lane.b32.xlu0 %v4086_v43, %s3453_s13 }
 0x1c0   : > { %v1337_v0 = vpop.permute.xlu1 %1336  ;;  %v1335_v4 = vpop.permute.xlu0 %1334 }
 0x1c1   : > { %v1360_v49 = vsel %vm1358_vm13, %v1335_v4, %v1337_v0  ;;  %v2471_v30 = vld [vmem:[#allocation2 + $0x248] sm:$0xff] }
 0x1c2   : > { %1384 = vst [vmem:[#allocation2 + $0x2a8] sm:$0xf] %v1360_v49  ;;  %2336 = vrot.lane.b32.xlu1 %v4054_v31, %s3455_s15  ;;  %2259 = vrot.lane.b32.xlu0 %v4096_v47, %s3453_s13 }
 0x1c4   : > { %v4226_v11 = vpop.permute.xlu1 %1340  ;;  %v1339_v12 = vpop.permute.xlu0 %1338 }
 0x1c5   : > { %v1361_v3 = vsel %vm1358_vm13, %v1337_v0, %v1339_v12  ;;  %v1362_v43 = vsel %vm1358_vm13, %v1339_v12, %v4226_v11  ;;  %v2473_v26 = vld [vmem:[#allocation2 + $0x258] sm:$0xff]  ;;  %v2472_v39 = vld [vmem:[#allocation2 + $0x250] sm:$0xff] }
 0x1c6   : > { %1385 = vst [vmem:[#allocation2 + $0x2b0] sm:$0xf] %v1361_v3  ;;  %1386 = vst [vmem:[#allocation2 + $0x2b8] sm:$0xf] %v1362_v43  ;;  %2340 = vrot.lane.b32.xlu1 %v4067_v25, %s3455_s15  ;;  %2338 = vrot.lane.b32.xlu0 %v4057_v33, %s3455_s15 }
 0x1c8   : > { %v1421_v31 = vpop.permute.xlu1 %1420  ;;  %v1419_v47 = vpop.permute.xlu0 %1418 }
 0x1c9   : > { %v1444_v6 = vsel %vm1442_vm14, %v1419_v47, %v1421_v31 }
 0x1ca   : > { %1468 = vst [vmem:[#allocation2 + $0x2a8] sm:$0xf0] %v1444_v6  ;;  %2167 = vrot.lane.b32.xlu1 %v4045_v62, %s3451_s12  ;;  %2342 = vrot.lane.b32.xlu0 %v4076_v40, %s3455_s15 }
 0x1cc   : > { %v4243_v23 = vpop.permute.xlu1 %1424  ;;  %v1423_v25 = vpop.permute.xlu0 %1422 }
 0x1cd   : > { %v1445_v33 = vsel %vm1442_vm14, %v1421_v31, %v1423_v25  ;;  %v1446_v16 = vsel %vm1442_vm14, %v1423_v25, %v4243_v23 }
 0x1ce   : > { %1469 = vst [vmem:[#allocation2 + $0x2b0] sm:$0xf0] %v1445_v33  ;;  %1470 = vst [vmem:[#allocation2 + $0x2b8] sm:$0xf0] %v1446_v16  ;;  %2334 = vrot.lane.b32.xlu1 %v4045_v62, %s3455_s15  ;;  %2251 = vrot.lane.b32.xlu0 %v4108_v54, %s3453_s13  ;;  %v4265_v62 = vld [vmem:[%s3486_s14 + $0x14] sm:$0xff]  ;;  %v4340_v33 = vcombine.high %v4076_v40, %v4076_v40  ;;  %v4347_v16 = vld [vmem:[%s3486_s14 + $0x20] sm:$0xff] }
 0x1d0   : > { %v1333_v24 = vpop.permute.xlu1 %1332  ;;  %v1250_v22 = vpop.permute.xlu0 %1249 }
 0x1d1   : > { %v1359_v27 = vsel %vm1358_vm13, %v1333_v24, %v1335_v4  ;;  %v1276_v29 = vsel %vm1275_vm12, %v1250_v22, %v4187_v1  ;;  %v2483_v32 = vld [vmem:[#allocation2 + $0x2a8] sm:$0xff] }
 0x1d2   : > { %1383 = vst [vmem:[#allocation2 + $0x2a0] sm:$0xf] %v1359_v27  ;;  %1300 = vst [vmem:[#allocation2 + $0x240] sm:$0xf0] %v1276_v29  ;;  %1261 = vrot.lane.b32.xlu1 %v4254_v18, %s3440_s27  ;;  %1259 = vrot.lane.b32.xlu0 %v4265_v62, %s3440_s27  ;;  %v3140_v54 = vpack.c.bf16 %v2483_v32, %v2471_v30  ;;  %v4354_v32 = vcombine.high %v4347_v16, %v4347_v16 }
 0x1d4   : > { %v4273_v2 = vpop.permute.xlu1 %1501  ;;  %v1417_v35 = vpop.permute.xlu0 %1416  ;;  %3141 = vmatprep.subr.bf16.mxu0 %v3140_v54 }
 0x1d5   : > { %v1443_v7 = vsel %vm1442_vm14, %v1417_v35, %v1419_v47  ;;  %v2485_v38 = vld [vmem:[#allocation2 + $0x2b8] sm:$0xff]  ;;  %v2484_v36 = vld [vmem:[#allocation2 + $0x2b0] sm:$0xff] }
 0x1d6   : > { %1467 = vst [vmem:[#allocation2 + $0x2a0] sm:$0xf0] %v1443_v7  ;;  %1265 = vrot.lane.b32.xlu1 %v4271_v34, %s3440_s27  ;;  %1263 = vrot.lane.b32.xlu0 %v4241_v14, %s3440_s27  ;;  %v3172_v42 = vpack.c.bf16 %v2485_v38, %v2473_v26  ;;  %v3174_v37 = vpack.c.bf16 %v2484_v36, %v2472_v39 }
 0x1d7   : > { %v4372_v36 = vcombine.low %v4347_v16, %v4347_v16 }
 0x1d8   : > { %v1506_v13 = vpop.permute.xlu1 %1505  ;;  %v1504_v46 = vpop.permute.xlu0 %1503  ;;  %3173 = vmatprep.subr.bf16.mxu1 %v3172_v42 }
 0x1d9   : > { %v1527_v19 = vsel %vm1525_vm15, %v4273_v2, %v1504_v46  ;;  %v1528_v41 = vsel %vm1525_vm15, %v1504_v46, %v1506_v13  ;;  %3175 = vmatpush1.bf16.msra.mxu1 %v3174_v37  ;;  %v2470_v50 = vld [vmem:[#allocation2 + $0x240] sm:$0xff] }
 0x1da   : > { %1551 = vst [vmem:[#allocation2 + $0x308] sm:$0xf] %v1527_v19  ;;  %1552 = vst [vmem:[#allocation2 + $0x310] sm:$0xf] %v1528_v41  ;;  %1344 = vrot.lane.b32.xlu1 %v4241_v14, %s3441_s28  ;;  %1342 = vrot.lane.b32.xlu0 %v3874_v10, %s3441_s28 }
 0x1dc   : > { %v4289_v45 = vpop.permute.xlu1 %1585  ;;  %v4291_v48 = vpop.permute.xlu0 %1507 }
 0x1dd   : > { %v1529_v17 = vsel %vm1525_vm15, %v1506_v13, %v4291_v48  ;;  %v2482_v21 = vld [vmem:[#allocation2 + $0x2a0] sm:$0xff] }
 0x1de   : > { %1553 = vst [vmem:[#allocation2 + $0x318] sm:$0xf] %v1529_v17  ;;  %1348 = vrot.lane.b32.xlu1 %v4257_v58, %s3441_s28  ;;  %1346 = vrot.lane.b32.xlu0 %v1329_v5, %s3441_s28  ;;  %v3142_v51 = vpack.c.bf16 %v2482_v21, %v2470_v50 }
 0x1e0   : > { %v1590_v52 = vpop.permute.xlu1 %1589  ;;  %v1588_v53 = vpop.permute.xlu0 %1587  ;;  %3143 = vmatpush1.bf16.msra.mxu0 %v3142_v51 }
 0x1e1   : > { %v1611_v55 = vsel %vm1609_vm0, %v4289_v45, %v1588_v53  ;;  %v1612_v56 = vsel %vm1609_vm0, %v1588_v53, %v1590_v52 }
 0x1e2   : > { %1635 = vst [vmem:[#allocation2 + $0x308] sm:$0xf0] %v1611_v55  ;;  %1636 = vst [vmem:[#allocation2 + $0x310] sm:$0xf0] %v1612_v56  ;;  %1428 = vrot.lane.b32.xlu1 %v4254_v18, %s3442_s29  ;;  %1426 = vrot.lane.b32.xlu0 %v4265_v62, %s3442_s29 }
 0x1e4   : > { %v1669_v57 = vpop.permute.xlu1 %1668  ;;  %v4305_v8 = vpop.permute.xlu0 %1591 }
 0x1e5   : > { %v1613_v1 = vsel %vm1609_vm0, %v1590_v52, %v4305_v8 }
 0x1e6   : > { %1637 = vst [vmem:[#allocation2 + $0x318] sm:$0xf0] %v1613_v1  ;;  %1432 = vrot.lane.b32.xlu1 %v4271_v34, %s3442_s29  ;;  %1430 = vrot.lane.b32.xlu0 %v4241_v14, %s3442_s29 }
 0x1e8   : > { %v1673_v59 = vpop.permute.xlu1 %1672  ;;  %v1671_v44 = vpop.permute.xlu0 %1670 }
 0x1e9   : > { %v1694_v63 = vsel %vm1692_vm1, %v1669_v57, %v1671_v44  ;;  %v1695_v9 = vsel %vm1692_vm1, %v1671_v44, %v1673_v59  ;;  %v2495_v29 = vld [vmem:[#allocation2 + $0x308] sm:$0xff]  ;;  %v2496_v39 = vld [vmem:[#allocation2 + $0x310] sm:$0xff] }
 0x1ea   : > { %1718 = vst [vmem:[#allocation2 + $0x368] sm:$0xf] %v1694_v63  ;;  %1719 = vst [vmem:[#allocation2 + $0x370] sm:$0xf] %v1695_v9  ;;  %1511 = vrot.lane.b32.xlu1 %v4241_v14, %s3443_s30  ;;  %1509 = vrot.lane.b32.xlu0 %v3874_v10, %s3443_s30 }
 0x1ec   : > { %v1753_v0 = vpop.permute.xlu1 %1752  ;;  %v4319_v4 = vpop.permute.xlu0 %1674 }
 0x1ed   : > { %v1696_v49 = vsel %vm1692_vm1, %v1673_v59, %v4319_v4  ;;  %v2497_v26 = vld [vmem:[#allocation2 + $0x318] sm:$0xff] }
 0x1ee   : > { %1720 = vst [vmem:[#allocation2 + $0x378] sm:$0xf] %v1696_v49  ;;  %1515 = vrot.lane.b32.xlu1 %v4257_v58, %s3443_s30  ;;  %1513 = vrot.lane.b32.xlu0 %v1329_v5, %s3443_s30 }
 0x1f0   : > { %v1757_v12 = vpop.permute.xlu1 %1756  ;;  %v1755_v3 = vpop.permute.xlu0 %1754 }
 0x1f1   : > { %v1778_v43 = vsel %vm1776_vm2, %v1753_v0, %v1755_v3  ;;  %v1779_v10 = vsel %vm1776_vm2, %v1755_v3, %v1757_v12 }
 0x1f2   : > { %1802 = vst [vmem:[#allocation2 + $0x368] sm:$0xf0] %v1778_v43  ;;  %1803 = vst [vmem:[#allocation2 + $0x370] sm:$0xf0] %v1779_v10  ;;  %1595 = vrot.lane.b32.xlu1 %v4254_v18, %s3444_s3  ;;  %1593 = vrot.lane.b32.xlu0 %v4265_v62, %s3444_s3  ;;  %v4361_v62 = vld [vmem:[%s3486_s14 + $0x28] sm:$0xff] }
 0x1f3   : > { %v4383_v41 = vcombine.low %v4361_v62, %v4361_v62 }
 0x1f4   : > { %v1500_v31 = vpop.permute.xlu1 %1499  ;;  %v4332_v47 = vpop.permute.xlu0 %1758 }
 0x1f5   : > { %v1526_v6 = vsel %vm1525_vm15, %v1500_v31, %v4273_v2  ;;  %v1780_v25 = vsel %vm1776_vm2, %v1757_v12, %v4332_v47 }
 0x1f6   : > { %1550 = vst [vmem:[#allocation2 + $0x300] sm:$0xf] %v1526_v6  ;;  %1804 = vst [vmem:[#allocation2 + $0x378] sm:$0xf0] %v1780_v25  ;;  %1599 = vrot.lane.b32.xlu1 %v4271_v34, %s3444_s3  ;;  %1597 = vrot.lane.b32.xlu0 %v4241_v14, %s3444_s3 }
 0x1f8   : > { %v1667_v18 = vpop.permute.xlu1 %1666  ;;  %v1584_v24 = vpop.permute.xlu0 %1583 }
 0x1f9   : > { %v1693_v22 = vsel %vm1692_vm1, %v1667_v18, %v1669_v57  ;;  %v1610_v27 = vsel %vm1609_vm0, %v1584_v24, %v4289_v45  ;;  %v2507_v30 = vld [vmem:[#allocation2 + $0x368] sm:$0xff]  ;;  %v2508_v2 = vld [vmem:[#allocation2 + $0x370] sm:$0xff] }
 0x1fa   : > { %1717 = vst [vmem:[#allocation2 + $0x360] sm:$0xf] %v1693_v22  ;;  %1634 = vst [vmem:[#allocation2 + $0x300] sm:$0xf0] %v1610_v27  ;;  %1678 = vrot.lane.b32.xlu1 %v4347_v16, %s3445_s4  ;;  %1676 = vrot.lane.b32.xlu0 %v4340_v33, %s3445_s4  ;;  %v3144_v14 = vpack.c.bf16 %v2507_v30, %v2495_v29  ;;  %v3178_v42 = vpack.c.bf16 %v2508_v2, %v2496_v39 }
 0x1fc   : > { %v4363_v54 = vpop.permute.xlu1 %1835  ;;  %v1751_v34 = vpop.permute.xlu0 %1750  ;;  %3145 = vmatprep.subr.bf16.mxu0 %v3144_v14 }
 0x1fd   : > { %v1777_v35 = vsel %vm1776_vm2, %v1751_v34, %v1753_v0  ;;  %v2509_v7 = vld [vmem:[#allocation2 + $0x378] sm:$0xff] }
 0x1fe   : > { %1801 = vst [vmem:[#allocation2 + $0x360] sm:$0xf0] %v1777_v35  ;;  %1682 = vrot.lane.b32.xlu1 %v4361_v62, %s3445_s4  ;;  %1680 = vrot.lane.b32.xlu0 %v4354_v32, %s3445_s4  ;;  %v3176_v38 = vpack.c.bf16 %v2509_v7, %v2497_v26 }
 0x200   : > { %v1840_v37 = vpop.permute.xlu1 %1839  ;;  %v1838_v13 = vpop.permute.xlu0 %1837  ;;  %3177 = vmatprep.subr.bf16.mxu1 %v3176_v38 }
 0x201   : > { %v1861_v46 = vsel %vm1859_vm3, %v4363_v54, %v1838_v13  ;;  %v1862_v19 = vsel %vm1859_vm3, %v1838_v13, %v1840_v37  ;;  %3179 = vmatpush1.bf16.msra.mxu1 %v3178_v42  ;;  %v2494_v50 = vld [vmem:[#allocation2 + $0x300] sm:$0xff] }
 0x202   : > { %1885 = vst [vmem:[#allocation2 + $0x3c8] sm:$0xf] %v1861_v46  ;;  %1886 = vst [vmem:[#allocation2 + $0x3d0] sm:$0xf] %v1862_v19  ;;  %1762 = vrot.lane.b32.xlu1 %v4372_v36, %s3446_s5  ;;  %1760 = vrot.lane.b32.xlu0 %v4076_v40, %s3446_s5 }
 0x204   : > { %v1920_v5 = vpop.permute.xlu1 %1919  ;;  %v4385_v45 = vpop.permute.xlu0 %1841 }
 0x205   : > { %v1863_v17 = vsel %vm1859_vm3, %v1840_v37, %v4385_v45  ;;  %v2506_v21 = vld [vmem:[#allocation2 + $0x360] sm:$0xff] }
 0x206   : > { %1887 = vst [vmem:[#allocation2 + $0x3d8] sm:$0xf] %v1863_v17  ;;  %1766 = vrot.lane.b32.xlu1 %v4383_v41, %s3446_s5  ;;  %1764 = vrot.lane.b32.xlu0 %v4347_v16, %s3446_s5  ;;  %v3146_v51 = vpack.c.bf16 %v2506_v21, %v2494_v50 }
 0x208   : > { %v1924_v52 = vpop.permute.xlu1 %1923  ;;  %v1922_v53 = vpop.permute.xlu0 %1921  ;;  %3147 = vmatpush1.bf16.msra.mxu0 %v3146_v51 }
 0x209   : > { %v1945_v55 = vsel %vm1943_vm4, %v1920_v5, %v1922_v53  ;;  %v1946_v56 = vsel %vm1943_vm4, %v1922_v53, %v1924_v52 }
 0x20a   : > { %1969 = vst [vmem:[#allocation2 + $0x3c8] sm:$0xf0] %v1945_v55  ;;  %1970 = vst [vmem:[#allocation2 + $0x3d0] sm:$0xf0] %v1946_v56  ;;  %1845 = vrot.lane.b32.xlu1 %v4347_v16, %s3447_s6  ;;  %1843 = vrot.lane.b32.xlu0 %v4340_v33, %s3447_s6 }
 0x20c   : > { %v2003_v57 = vpop.permute.xlu1 %2002  ;;  %v4399_v1 = vpop.permute.xlu0 %1925 }
 0x20d   : > { %v1947_v59 = vsel %vm1943_vm4, %v1924_v52, %v4399_v1 }
 0x20e   : > { %1971 = vst [vmem:[#allocation2 + $0x3d8] sm:$0xf0] %v1947_v59  ;;  %1849 = vrot.lane.b32.xlu1 %v4361_v62, %s3447_s6  ;;  %1847 = vrot.lane.b32.xlu0 %v4354_v32, %s3447_s6 }
 0x210   : > { %v2007_v44 = vpop.permute.xlu1 %2006  ;;  %v2005_v63 = vpop.permute.xlu0 %2004 }
 0x211   : > { %v2028_v9 = vsel %vm2026_vm5, %v2003_v57, %v2005_v63  ;;  %v2029_v0 = vsel %vm2026_vm5, %v2005_v63, %v2007_v44  ;;  %v2519_v34 = vld [vmem:[#allocation2 + $0x3c8] sm:$0xff]  ;;  %v2520_v13 = vld [vmem:[#allocation2 + $0x3d0] sm:$0xff] }
 0x212   : > { %2052 = vst [vmem:[#allocation2 + $0x428] sm:$0xf] %v2028_v9  ;;  %2053 = vst [vmem:[#allocation2 + $0x430] sm:$0xf] %v2029_v0  ;;  %1929 = vrot.lane.b32.xlu1 %v4372_v36, %s3448_s7  ;;  %1927 = vrot.lane.b32.xlu0 %v4076_v40, %s3448_s7 }
 0x214   : > { %v2087_v49 = vpop.permute.xlu1 %2086  ;;  %v4413_v12 = vpop.permute.xlu0 %2008 }
 0x215   : > { %v2030_v3 = vsel %vm2026_vm5, %v2007_v44, %v4413_v12  ;;  %v2521_v39 = vld [vmem:[#allocation2 + $0x3d8] sm:$0xff] }
 0x216   : > { %2054 = vst [vmem:[#allocation2 + $0x438] sm:$0xf] %v2030_v3  ;;  %1933 = vrot.lane.b32.xlu1 %v4383_v41, %s3448_s7  ;;  %1931 = vrot.lane.b32.xlu0 %v4347_v16, %s3448_s7 }
 0x218   : > { %v2091_v43 = vpop.permute.xlu1 %2090  ;;  %v2089_v10 = vpop.permute.xlu0 %2088 }
 0x219   : > { %v2112_v31 = vsel %vm2110_vm6, %v2087_v49, %v2089_v10  ;;  %v2113_v6 = vsel %vm2110_vm6, %v2089_v10, %v2091_v43 }
 0x21a   : > { %2136 = vst [vmem:[#allocation2 + $0x428] sm:$0xf0] %v2112_v31  ;;  %2137 = vst [vmem:[#allocation2 + $0x430] sm:$0xf0] %v2113_v6  ;;  %2012 = vrot.lane.b32.xlu1 %v4347_v16, %s3449_s8  ;;  %2010 = vrot.lane.b32.xlu0 %v4340_v33, %s3449_s8 }
 0x21c   : > { %v1834_v25 = vpop.permute.xlu1 %1833  ;;  %v4427_v18 = vpop.permute.xlu0 %2092 }
 0x21d   : > { %v1860_v24 = vsel %vm1859_vm3, %v1834_v25, %v4363_v54  ;;  %v2114_v22 = vsel %vm2110_vm6, %v2091_v43, %v4427_v18  ;;  %v4493_v25 = vld [vmem:[%s3486_s14 + $0x2c] sm:$0xff] }
 0x21e   : > { %1884 = vst [vmem:[#allocation2 + $0x3c0] sm:$0xf] %v1860_v24  ;;  %2138 = vst [vmem:[#allocation2 + $0x438] sm:$0xf0] %v2114_v22  ;;  %2016 = vrot.lane.b32.xlu1 %v4361_v62, %s3449_s8  ;;  %2014 = vrot.lane.b32.xlu0 %v4354_v32, %s3449_s8 }
 0x220   : > { %v2001_v27 = vpop.permute.xlu1 %2000  ;;  %v1918_v29 = vpop.permute.xlu0 %1917 }
 0x221   : > { %v2027_v30 = vsel %vm2026_vm5, %v2001_v27, %v2003_v57  ;;  %v1944_v14 = vsel %vm1943_vm4, %v1918_v29, %v1920_v5  ;;  %v2531_v2 = vld [vmem:[#allocation2 + $0x428] sm:$0xff]  ;;  %v2532_v7 = vld [vmem:[#allocation2 + $0x430] sm:$0xff] }
 0x222   : > { %2051 = vst [vmem:[#allocation2 + $0x420] sm:$0xf] %v2027_v30  ;;  %1968 = vst [vmem:[#allocation2 + $0x3c0] sm:$0xf0] %v1944_v14  ;;  %2096 = vrot.lane.b32.xlu1 %v4372_v36, %s3450_s11  ;;  %2094 = vrot.lane.b32.xlu0 %v4076_v40, %s3450_s11  ;;  %v3148_v54 = vpack.c.bf16 %v2531_v2, %v2519_v34  ;;  %v3182_v46 = vpack.c.bf16 %v2532_v7, %v2520_v13 }
 0x224   : > { %v2170_v35 = vpop.permute.xlu1 %2169  ;;  %v2085_v26 = vpop.permute.xlu0 %2084  ;;  %3149 = vmatprep.subr.bf16.mxu0 %v3148_v54 }
 0x225   : > { %v2111_v38 = vsel %vm2110_vm6, %v2085_v26, %v2087_v49  ;;  %v2533_v42 = vld [vmem:[#allocation2 + $0x438] sm:$0xff] }
 0x226   : > { %2135 = vst [vmem:[#allocation2 + $0x420] sm:$0xf0] %v2111_v38  ;;  %2100 = vrot.lane.b32.xlu1 %v4383_v41, %s3450_s11  ;;  %2098 = vrot.lane.b32.xlu0 %v4347_v16, %s3450_s11  ;;  %v3180_v37 = vpack.c.bf16 %v2533_v42, %v2521_v39  ;;  %v3403_v42 = vld [vmem:[%s3486_s14 + $0x34] ss:$0 sps:$4 sm:$0xff]  }
 0x228   : > { %v2174_v19 = vpop.permute.xlu1 %2173  ;;  %v2172_v5 = vpop.permute.xlu0 %2171  ;;  %3181 = vmatprep.subr.bf16.mxu1 %v3180_v37 }
 0x229   : > { %v2195_v17 = vsel %vm2193_vm7, %v2170_v35, %v2172_v5  ;;  %v2196_v50 = vsel %vm2193_vm7, %v2172_v5, %v2174_v19  ;;  %3183 = vmatpush1.bf16.msra.mxu1 %v3182_v46  ;;  %v2518_v53 = vld [vmem:[#allocation2 + $0x3c0] sm:$0xff] }
 0x22a   : > { %2219 = vst [vmem:[#allocation2 + $0x488] sm:$0xf] %v2195_v17  ;;  %2220 = vst [vmem:[#allocation2 + $0x490] sm:$0xf] %v2196_v50  ;;  %2179 = vrot.lane.b32.xlu1 %v4347_v16, %s3451_s12  ;;  %2177 = vrot.lane.b32.xlu0 %v4340_v33, %s3451_s12  ;;  %v4519_v50 = vcombine.high %v4257_v58, %v4257_v58 }
 0x22c   : > { %v2254_v21 = vpop.permute.xlu1 %2253  ;;  %v4454_v51 = vpop.permute.xlu0 %2175 }
 0x22d   : > { %v2197_v52 = vsel %vm2193_vm7, %v2174_v19, %v4454_v51  ;;  %v2530_v55 = vld [vmem:[#allocation2 + $0x420] sm:$0xff] }
 0x22e   : > { %2221 = vst [vmem:[#allocation2 + $0x498] sm:$0xf] %v2197_v52  ;;  %2183 = vrot.lane.b32.xlu1 %v4361_v62, %s3451_s12  ;;  %2181 = vrot.lane.b32.xlu0 %v4354_v32, %s3451_s12  ;;  %v3150_v56 = vpack.c.bf16 %v2530_v55, %v2518_v53  ;;  %v2417_v52 = vld [vmem:[#allocation2 + $0x98] sm:$0xff]  ;;  %v3456_v53 = vmov 0.0|0.0  }
 0x230   : > { %v2258_v57 = vpop.permute.xlu1 %2257  ;;  %v2256_v59 = vpop.permute.xlu0 %2255  ;;  %3151 = vmatpush1.bf16.msra.mxu0 %v3150_v56 }
 0x231   : > { %v2279_v44 = vsel %vm2277_vm8, %v2254_v21, %v2256_v59  ;;  %v2280_v63 = vsel %vm2277_vm8, %v2256_v59, %v2258_v57  ;;  %v2415_v59 = vld [vmem:[#allocation2 + $0x88] sm:$0xff] }
 0x232   : > { %2303 = vst [vmem:[#allocation2 + $0x488] sm:$0xf0] %v2279_v44  ;;  %2304 = vst [vmem:[#allocation2 + $0x490] sm:$0xf0] %v2280_v63  ;;  %2263 = vrot.lane.b32.xlu1 %v4372_v36, %s3453_s13  ;;  %2261 = vrot.lane.b32.xlu0 %v4076_v40, %s3453_s13  ;;  %v2416_v44 = vld [vmem:[#allocation2 + $0x90] sm:$0xff] }
 0x234   : > { %v2337_v9 = vpop.permute.xlu1 %2336  ;;  %v4468_v0 = vpop.permute.xlu0 %2259 }
 0x235   : > { %v2281_v49 = vsel %vm2277_vm8, %v2258_v57, %v4468_v0  ;;  %v2405_v57 = vld [vmem:[#allocation2 + $0x38] sm:$0xff] }
 0x236   : > { %2305 = vst [vmem:[#allocation2 + $0x498] sm:$0xf0] %v2281_v49  ;;  %2267 = vrot.lane.b32.xlu1 %v4383_v41, %s3453_s13  ;;  %2265 = vrot.lane.b32.xlu0 %v4347_v16, %s3453_s13  ;;  %v3224_v49 = vpack.c.bf16 %v2417_v52, %v2405_v57  ;;  %v2426_v52 = vld [vmem:[#allocation2 + $0xe0] sm:$0xff]  ;;  %v2452_v57 = vld [vmem:[#allocation2 + $0x1b0] sm:$0xff] }
 0x238   : > { %v2341_v3 = vpop.permute.xlu1 %2340  ;;  %v2339_v36 = vpop.permute.xlu0 %2338 }
 0x239   : > { %v2362_v40 = vsel %vm2360_vm9, %v2337_v9, %v2339_v36  ;;  %v2363_v43 = vsel %vm2360_vm9, %v2339_v36, %v2341_v3  ;;  %v2543_v29 = vld [vmem:[#allocation2 + $0x488] sm:$0xff]  ;;  %v2544_v39 = vld [vmem:[#allocation2 + $0x490] sm:$0xff]  ;;  %v4537_v36 = vcombine.high %v4493_v25, %v4493_v25 }
 0x23a   : > { %2386 = vst [vmem:[#allocation2 + $0x4e8] sm:$0xf] %v2362_v40  ;;  %2387 = vst [vmem:[#allocation2 + $0x4f0] sm:$0xf] %v2363_v43  ;;  %2346 = vrot.lane.b32.xlu1 %v4347_v16, %s3455_s15  ;;  %2344 = vrot.lane.b32.xlu0 %v4340_v33, %s3455_s15  ;;  %v1151_v16 = vld [vmem:[%s3486_s14 + $0x34] sm:$0xf] }
 0x23b   : > { %v2404_v40 = vld [vmem:[#allocation2 + $0x30] sm:$0xff]  ;;  %v2441_v43 = vld [vmem:[#allocation2 + $0x158] sm:$0xff] }
 0x23c   : > { %v2168_v41 = vpop.permute.xlu1 %2167  ;;  %v4482_v10 = vpop.permute.xlu0 %2342 }
 0x23d   : > { %v2194_v31 = vsel %vm2193_vm7, %v2168_v41, %v2170_v35  ;;  %v2364_v6 = vsel %vm2360_vm9, %v2341_v3, %v4482_v10  ;;  %v2545_v7 = vld [vmem:[#allocation2 + $0x498] sm:$0xff]  ;;  %v4533_v3 = vld [vmem:[%s4875_s1] sm:$0xff] }
 0x23e   : > { %2218 = vst [vmem:[#allocation2 + $0x480] sm:$0xf] %v2194_v31  ;;  %2388 = vst [vmem:[#allocation2 + $0x4f8] sm:$0xf] %v2364_v6  ;;  %2350 = vrot.lane.b32.xlu1 %v4361_v62, %s3455_s15  ;;  %2348 = vrot.lane.b32.xlu0 %v4354_v32, %s3455_s15  ;;  %v4502_v32 = vcombine.low %v4493_v25, %v4493_v25  ;;  %v3226_v31 = vpack.c.bf16 %v2416_v44, %v2404_v40  ;;  %v1318_v6 = vld [vmem:[%s3486_s14 + $0x34] sm:$0xf] }
 0x240   : > { %v2335_v33 = vpop.permute.xlu1 %2334  ;;  %v2252_v24 = vpop.permute.xlu0 %2251 }
 0x241   : > { %v2361_v22 = vsel %vm2360_vm9, %v2335_v33, %v2337_v9  ;;  %v2278_v27 = vsel %vm2277_vm8, %v2252_v24, %v2254_v21  ;;  %v2555_v30 = vld [vmem:[#allocation2 + $0x4e8] sm:$0xff]  ;;  %v2556_v54 = vld [vmem:[#allocation2 + $0x4f0] sm:$0xff] }
 0x242   : > { %2385 = vst [vmem:[#allocation2 + $0x4e0] sm:$0xf] %v2361_v22  ;;  %2302 = vst [vmem:[#allocation2 + $0x480] sm:$0xf0] %v2278_v27  ;;  %1189 = vrot.lane.b32.xlu1 %v1151_v16, %s3439_s26  ;;  %1187 = vrot.lane.b32.xlu0 %v3903_v28, %s3439_s26  ;;  %v3152_v14 = vpack.c.bf16 %v2555_v30, %v2543_v29  ;;  %v3186_v37 = vpack.c.bf16 %v2556_v54, %v2544_v39  ;;  %v2414_v16 = vld [vmem:[#allocation2 + $0x80] sm:$0xff]  ;;  %v2429_v22 = vld [vmem:[#allocation2 + $0xf8] sm:$0xff] }
 0x243   : > { %v2439_v27 = vld [vmem:[#allocation2 + $0x148] sm:$0xff]  ;;  %v2440_v29 = vld [vmem:[#allocation2 + $0x150] sm:$0xff]  ;;  %v2438_v39 = vld [vmem:[#allocation2 + $0x140] sm:$0xff] }
 0x244   : > { %v1262_v34 = vpop.permute.xlu1 %1261  ;;  %v1260_v2 = vpop.permute.xlu0 %1259  ;;  %3153 = vmatprep.subr.bf16.mxu0 %v3152_v14 }
 0x245   : > { %v1280_v35 = vsel %vm1275_vm12, %v4212_v61, %v1260_v2  ;;  %v1281_v26 = vsel %vm1275_vm12, %v1260_v2, %v1262_v34  ;;  %v2557_v38 = vld [vmem:[#allocation2 + $0x4f8] sm:$0xff]  ;;  %v2402_v2 = vld [vmem:[#allocation2 + $0x20] sm:$0xff] }
 0x246   : > { %1304 = vst [vmem:[#allocation2 + $0x260] sm:$0xf0] %v1280_v35  ;;  %1305 = vst [vmem:[#allocation2 + $0x268] sm:$0xf0] %v1281_v26  ;;  %1269 = vrot.lane.b32.xlu1 %v4502_v32, %s3440_s27  ;;  %1267 = vrot.lane.b32.xlu0 %v4257_v58, %s3440_s27  ;;  %v3184_v28 = vpack.c.bf16 %v2557_v38, %v2545_v7  ;;  %v3194_v54 = vpack.c.bf16 %v2414_v16, %v2402_v2  ;;  %v2427_v35 = vld [vmem:[#allocation2 + $0xe8] sm:$0xff]  ;;  %v2428_v26 = vld [vmem:[#allocation2 + $0xf0] sm:$0xff] }
 0x247   : > { %v2465_v7 = vld [vmem:[#allocation2 + $0x218] sm:$0xff]  ;;  %v3196_v38 = vpack.c.bf16 %v2439_v27, %v2427_v35 }
 0x248   : > { %v4512_v13 = vpop.permute.xlu1 %1265  ;;  %v1264_v46 = vpop.permute.xlu0 %1263  ;;  %3185 = vmatprep.subr.bf16.mxu1 %v3184_v28  ;;  %v3230_v28 = vpack.c.bf16 %v2440_v29, %v2428_v26 }
 0x249   : > { %v1282_v61 = vsel %vm1275_vm12, %v1262_v34, %v1264_v46  ;;  %v1283_v19 = vsel %vm1275_vm12, %v1264_v46, %v4512_v13  ;;  %3187 = vmatpush1.bf16.msra.mxu1 %v3186_v37  ;;  %v2542_v5 = vld [vmem:[#allocation2 + $0x480] sm:$0xff]  ;;  %v3228_v34 = vpack.c.bf16 %v2441_v43, %v2429_v22  ;;  %v2453_v46 = vld [vmem:[#allocation2 + $0x1b8] sm:$0xff] }
 0x24a   : > { %v2554_v17 = vld [vmem:[#allocation2 + $0x4e0] sm:$0xff]  ;;  %1306 = vst [vmem:[#allocation2 + $0x270] sm:$0xf0] %v1282_v61  ;;  %1307 = vst [vmem:[#allocation2 + $0x278] sm:$0xf0] %v1283_v19  ;;  %1273 = vrot.lane.b32.xlu1 %v3403_v42, %s3440_s27  ;;  %1271 = vrot.lane.b32.xlu0 %v4493_v25, %s3440_s27  ;;  %v2463_v61 = vld [vmem:[#allocation2 + $0x208] sm:$0xff] }
 0x24b   : > { %v3154_v21 = vpack.c.bf16 %v2554_v17, %v2542_v5  ;;  %3189 = vmatprep.subr.bf16.mxu1 %v3456_v53  ;;  %v2464_v19 = vld [vmem:[#allocation2 + $0x210] sm:$0xff]  ;;  %v2450_v43 = vld [vmem:[#allocation2 + $0x1a0] sm:$0xff] }
 0x24c   : > { %v1345_v55 = vpop.permute.xlu1 %1344  ;;  %v1343_v56 = vpop.permute.xlu0 %1342  ;;  %v3234_v44 = vpack.c.bf16 %v2464_v19, %v2452_v57 }
 0x24d   : > { %3155 = vmatpush1.bf16.msra.mxu0 %v3154_v21  ;;  %v1363_v63 = vsel %vm1358_vm13, %v4226_v11, %v1343_v56  ;;  %v1364_v9 = vsel %vm1358_vm13, %v1343_v56, %v1345_v55  ;;  %3191 = vmatpush1.bf16.msra.mxu1 %v3456_v53  ;;  %v2403_v11 = vld [vmem:[#allocation2 + $0x28] sm:$0xff]  ;;  %v3232_v21 = vpack.c.bf16 %v2465_v7, %v2453_v46  ;;  %v2474_v27 = vld [vmem:[#allocation2 + $0x260] sm:$0xff] }
 0x24e   : > { %3157 = vmatprep.subr.bf16.mxu0 %v3456_v53  ;;  %1387 = vst [vmem:[#allocation2 + $0x2c0] sm:$0xf] %v1363_v63  ;;  %1388 = vst [vmem:[#allocation2 + $0x2c8] sm:$0xf] %v1364_v9  ;;  %1352 = vrot.lane.b32.xlu1 %v4493_v25, %s3441_s28  ;;  %v3192_v41 = vpack.c.bf16 %v2415_v59, %v2403_v11  ;;  %v2451_v56 = vld [vmem:[#allocation2 + $0x1a8] sm:$0xff]  ;;  %v2462_v63 = vld [vmem:[#allocation2 + $0x200] sm:$0xff] }
 0x24f   : > { %1350 = vrot.lane.b32.xlu0 %v4519_v50, %s3441_s28  ;;  %3225 = vmatprep.subr.bf16.mxu1 %v3224_v49  ;;  %v3406_v59 = vld [vmem:[%s3486_s14 + $0x34] ss:$0 sps:$4 sm:$0xff]  }
 0x250   : > { %v4544_v33 = vpop.permute.xlu1 %1348  ;;  %v1347_v24 = vpop.permute.xlu0 %1346  ;;  %2726 = vmatmul.mubr.f32.vlgmr.msra.gmra.mrb[0].mxu1 %v4533_v3 }
 0x251   : > { %3159 = vmatpush1.bf16.msra.mxu0 %v3456_v53  ;;  %v1365_v30 = vsel %vm1358_vm13, %v1345_v55, %v1347_v24  ;;  %v1366_v14 = vsel %vm1358_vm13, %v1347_v24, %v4544_v33  ;;  %3227 = vmatpush1.bf16.msra.mxu1 %v3226_v31  ;;  %v3198_v55 = vpack.c.bf16 %v2438_v39, %v2426_v52 }
 0x252   : > { %3193 = vmatprep.subr.bf16.mxu0 %v3192_v41  ;;  %1389 = vst [vmem:[#allocation2 + $0x2d0] sm:$0xf] %v1365_v30  ;;  %1390 = vst [vmem:[#allocation2 + $0x2d8] sm:$0xf] %v1366_v14  ;;  %1356 = vrot.lane.b32.xlu1 %v1318_v6, %s3441_s28  ;;  %v2475_v6 = vld [vmem:[#allocation2 + $0x268] sm:$0xff] }
 0x253   : > { %1354 = vrot.lane.b32.xlu0 %v4537_v36, %s3441_s28  ;;  %3229 = vmatprep.subr.bf16.mxu1 %v3228_v34  ;;  %v1485_v34 = vld [vmem:[%s3486_s14 + $0x34] sm:$0xf] }
 0x254   : > { %2655 = vmatmul.mubr.f32.vlgmr.msra.gmra.mrb[0].mxu0 %v4533_v3  ;;  %v1429_v42 = vpop.permute.xlu1 %1428  ;;  %v1427_v37 = vpop.permute.xlu0 %1426  ;;  %2867 = vmatprep.mubr.f32.mxu1 %v3452_v20 }
 0x255   : > { %3195 = vmatpush1.bf16.msra.mxu0 %v3194_v54  ;;  %2796 = vmatprep.mubr.f32.mxu0 %v3452_v20  ;;  %v1447_v5 = vsel %vm1442_vm14, %v4243_v23, %v1427_v37  ;;  %v1448_v17 = vsel %vm1442_vm14, %v1427_v37, %v1429_v42  ;;  %v3200_v23 = vpack.c.bf16 %v2463_v61, %v2451_v56 }
 0x256   : > { %3197 = vmatprep.subr.bf16.mxu0 %v3196_v38  ;;  %3231 = vmatpush1.bf16.msra.mxu1 %v3230_v28  ;;  %1471 = vst [vmem:[#allocation2 + $0x2c0] sm:$0xf0] %v1447_v5  ;;  %1472 = vst [vmem:[#allocation2 + $0x2c8] sm:$0xf0] %v1448_v17  ;;  %v3202_v20 = vpack.c.bf16 %v2462_v63, %v2450_v43  ;;  %v2476_v38 = vld [vmem:[#allocation2 + $0x270] sm:$0xff] }
 0x257   : > { %1436 = vrot.lane.b32.xlu1 %v4502_v32, %s3442_s29  ;;  %1434 = vrot.lane.b32.xlu0 %v4257_v58, %s3442_s29 }
 0x258   : > { %3233 = vmatprep.subr.bf16.mxu1 %v3232_v21  ;;  %v4565_v9 = vpop.permute.xlu1 %1432  ;;  %v1431_v49 = vpop.permute.xlu0 %1430  ;;  %v4604_v21 = vcombine.high %v4361_v62, %v4361_v62 }
 0x259   : > { %3199 = vmatpush1.bf16.msra.mxu0 %v3198_v55  ;;  %v1449_v11 = vsel %vm1442_vm14, %v1429_v42, %v1431_v49  ;;  %v1450_v40 = vsel %vm1442_vm14, %v1431_v49, %v4565_v9 }
 0x25a   : > { %3201 = vmatprep.subr.bf16.mxu0 %v3200_v23  ;;  %3235 = vmatpush1.bf16.msra.mxu1 %v3234_v44  ;;  %1473 = vst [vmem:[#allocation2 + $0x2d0] sm:$0xf0] %v1449_v11  ;;  %1474 = vst [vmem:[#allocation2 + $0x2d8] sm:$0xf0] %v1450_v40 }
 0x25b   : > { %1440 = vrot.lane.b32.xlu1 %v3406_v59, %s3442_s29  ;;  %1438 = vrot.lane.b32.xlu0 %v4493_v25, %s3442_s29 }
 0x25c   : > { %v1512_v41 = vpop.permute.xlu1 %1511  ;;  %v1510_v31 = vpop.permute.xlu0 %1509 }
 0x25d   : > { %3203 = vmatpush1.bf16.msra.mxu0 %v3202_v20  ;;  %v1530_v16 = vsel %vm1525_vm15, %v4291_v48, %v1510_v31  ;;  %v1531_v24 = vsel %vm1525_vm15, %v1510_v31, %v1512_v41  ;;  %v2487_v22 = vld [vmem:[#allocation2 + $0x2c8] sm:$0xff]  ;;  %v2486_v29 = vld [vmem:[#allocation2 + $0x2c0] sm:$0xff]  ;;  %v2477_v48 = vld [vmem:[#allocation2 + $0x278] sm:$0xff] }
 0x25e   : > { %1554 = vst [vmem:[#allocation2 + $0x320] sm:$0xf] %v1530_v16  ;;  %1555 = vst [vmem:[#allocation2 + $0x328] sm:$0xf] %v1531_v24  ;;  %v3204_v30 = vpack.c.bf16 %v2487_v22, %v2475_v6  ;;  %v3206_v14 = vpack.c.bf16 %v2486_v29, %v2474_v27  ;;  %v3410_v20 = vld [vmem:[%s3486_s14 + $0x38] ss:$0 sps:$4 sm:$0xff]  }
 0x25f   : > { %1519 = vrot.lane.b32.xlu1 %v4493_v25, %s3443_s30  ;;  %1517 = vrot.lane.b32.xlu0 %v4519_v50, %s3443_s30 }
 0x260   : > { %v4581_v2 = vpop.permute.xlu1 %1515  ;;  %v1514_v54 = vpop.permute.xlu0 %1513  ;;  %3205 = vmatprep.subr.bf16.mxu0 %v3204_v30 }
 0x261   : > { %v1532_v35 = vsel %vm1525_vm15, %v1512_v41, %v1514_v54  ;;  %v1533_v26 = vsel %vm1525_vm15, %v1514_v54, %v4581_v2  ;;  %3207 = vmatpush1.bf16.msra.mxu0 %v3206_v14  ;;  %v2489_v7 = vld [vmem:[#allocation2 + $0x2d8] sm:$0xff]  ;;  %v2488_v28 = vld [vmem:[#allocation2 + $0x2d0] sm:$0xff] }
 0x262   : > { %1556 = vst [vmem:[#allocation2 + $0x330] sm:$0xf] %v1532_v35  ;;  %1557 = vst [vmem:[#allocation2 + $0x338] sm:$0xf] %v1533_v26  ;;  %v3236_v50 = vpack.c.bf16 %v2489_v7, %v2477_v48  ;;  %v3238_v39 = vpack.c.bf16 %v2488_v28, %v2476_v38  ;;  %v1819_v35 = vld [vmem:[%s3486_s14 + $0x38] sm:$0xf] }
 0x263   : > { %1523 = vrot.lane.b32.xlu1 %v1485_v34, %s3443_s30  ;;  %1521 = vrot.lane.b32.xlu0 %v4537_v36, %s3443_s30  ;;  %v3407_v36 = vld [vmem:[%s3486_s14 + $0x34] ss:$0 sps:$4 sm:$0xff]  }
 0x264   : > { %v1596_v42 = vpop.permute.xlu1 %1595  ;;  %v1594_v37 = vpop.permute.xlu0 %1593  ;;  %3237 = vmatprep.subr.bf16.mxu1 %v3236_v50 }
 0x265   : > { %v1614_v46 = vsel %vm1609_vm0, %v4305_v8, %v1594_v37  ;;  %v1615_v61 = vsel %vm1609_vm0, %v1594_v37, %v1596_v42  ;;  %3239 = vmatpush1.bf16.msra.mxu1 %v3238_v39 }
 0x266   : > { %1638 = vst [vmem:[#allocation2 + $0x320] sm:$0xf0] %v1614_v46  ;;  %1639 = vst [vmem:[#allocation2 + $0x328] sm:$0xf0] %v1615_v61 }
 0x267   : > { %1603 = vrot.lane.b32.xlu1 %v4502_v32, %s3444_s3  ;;  %1601 = vrot.lane.b32.xlu0 %v4257_v58, %s3444_s3  ;;  %v4610_v58 = vld [vmem:[%s3486_s14 + $0x30] sm:$0xff] }
 0x268   : > { %v4597_v19 = vpop.permute.xlu1 %1599  ;;  %v1598_v5 = vpop.permute.xlu0 %1597  ;;  %v4617_v57 = vcombine.high %v4610_v58, %v4610_v58  ;;  %v4634_v63 = vcombine.low %v4610_v58, %v4610_v58 }
 0x269   : > { %v1616_v17 = vsel %vm1609_vm0, %v1596_v42, %v1598_v5  ;;  %v1617_v8 = vsel %vm1609_vm0, %v1598_v5, %v4597_v19 }
 0x26a   : > { %1640 = vst [vmem:[#allocation2 + $0x330] sm:$0xf0] %v1616_v17  ;;  %1641 = vst [vmem:[#allocation2 + $0x338] sm:$0xf0] %v1617_v8  ;;  %v3411_v8 = vld [vmem:[%s3486_s14 + $0x38] ss:$0 sps:$4 sm:$0xff]  }
 0x26b   : > { %1607 = vrot.lane.b32.xlu1 %v3407_v36, %s3444_s3  ;;  %1605 = vrot.lane.b32.xlu0 %v4493_v25, %s3444_s3  ;;  %v1652_v25 = vld [vmem:[%s3486_s14 + $0x38] sm:$0xf] }
 0x26c   : > { %v1679_v32 = vpop.permute.xlu1 %1678  ;;  %v1677_v52 = vpop.permute.xlu0 %1676 }
 0x26d   : > { %v1697_v55 = vsel %vm1692_vm1, %v4319_v4, %v1677_v52  ;;  %v1698_v56 = vsel %vm1692_vm1, %v1677_v52, %v1679_v32  ;;  %v2499_v22 = vld [vmem:[#allocation2 + $0x328] sm:$0xff]  ;;  %v2498_v14 = vld [vmem:[#allocation2 + $0x320] sm:$0xff] }
 0x26e   : > { %1721 = vst [vmem:[#allocation2 + $0x380] sm:$0xf] %v1697_v55  ;;  %1722 = vst [vmem:[#allocation2 + $0x388] sm:$0xf] %v1698_v56 }
 0x26f   : > { %1686 = vrot.lane.b32.xlu1 %v4610_v58, %s3445_s4  ;;  %1684 = vrot.lane.b32.xlu0 %v4604_v21, %s3445_s4 }
 0x270   : > { %v4624_v59 = vpop.permute.xlu1 %1682  ;;  %v1681_v23 = vpop.permute.xlu0 %1680 }
 0x271   : > { %v1699_v4 = vsel %vm1692_vm1, %v1679_v32, %v1681_v23  ;;  %v1700_v44 = vsel %vm1692_vm1, %v1681_v23, %v4624_v59  ;;  %v2500_v39 = vld [vmem:[#allocation2 + $0x330] sm:$0xff] }
 0x272   : > { %1723 = vst [vmem:[#allocation2 + $0x390] sm:$0xf] %v1699_v4  ;;  %1724 = vst [vmem:[#allocation2 + $0x398] sm:$0xf] %v1700_v44  ;;  %v1986_v44 = vld [vmem:[%s3486_s14 + $0x38] sm:$0xf] }
 0x273   : > { %1690 = vrot.lane.b32.xlu1 %v1652_v25, %s3445_s4  ;;  %1688 = vrot.lane.b32.xlu0 %v4617_v57, %s3445_s4 }
 0x274   : > { %v1763_v49 = vpop.permute.xlu1 %1762  ;;  %v1761_v11 = vpop.permute.xlu0 %1760 }
 0x275   : > { %v1781_v40 = vsel %vm1776_vm2, %v4332_v47, %v1761_v11  ;;  %v1782_v43 = vsel %vm1776_vm2, %v1761_v11, %v1763_v49 }
 0x276   : > { %1805 = vst [vmem:[#allocation2 + $0x380] sm:$0xf0] %v1781_v40  ;;  %1806 = vst [vmem:[#allocation2 + $0x388] sm:$0xf0] %v1782_v43 }
 0x277   : > { %1770 = vrot.lane.b32.xlu1 %v4634_v63, %s3446_s5  ;;  %1768 = vrot.lane.b32.xlu0 %v4361_v62, %s3446_s5 }
 0x278   : > { %v4644_v41 = vpop.permute.xlu1 %1766  ;;  %v1765_v31 = vpop.permute.xlu0 %1764 }
 0x279   : > { %v1783_v6 = vsel %vm1776_vm2, %v1763_v49, %v1765_v31  ;;  %v1784_v16 = vsel %vm1776_vm2, %v1765_v31, %v4644_v41 }
 0x27a   : > { %1807 = vst [vmem:[#allocation2 + $0x390] sm:$0xf0] %v1783_v6  ;;  %1808 = vst [vmem:[#allocation2 + $0x398] sm:$0xf0] %v1784_v16  ;;  %v3412_v16 = vld [vmem:[%s3486_s14 + $0x38] ss:$0 sps:$4 sm:$0xff]  }
 0x27b   : > { %1774 = vrot.lane.b32.xlu1 %v3410_v20, %s3446_s5  ;;  %1772 = vrot.lane.b32.xlu0 %v4610_v58, %s3446_s5 }
 0x27c   : > { %v1846_v47 = vpop.permute.xlu1 %1845  ;;  %v1844_v24 = vpop.permute.xlu0 %1843 }
 0x27d   : > { %v1864_v27 = vsel %vm1859_vm3, %v4385_v45, %v1844_v24  ;;  %v1865_v29 = vsel %vm1859_vm3, %v1844_v24, %v1846_v47  ;;  %v2511_v30 = vld [vmem:[#allocation2 + $0x388] sm:$0xff]  ;;  %v2510_v34 = vld [vmem:[#allocation2 + $0x380] sm:$0xff]  ;;  %v2501_v45 = vld [vmem:[#allocation2 + $0x338] sm:$0xff] }
 0x27e   : > { %1888 = vst [vmem:[#allocation2 + $0x3e0] sm:$0xf] %v1864_v27  ;;  %1889 = vst [vmem:[#allocation2 + $0x3e8] sm:$0xf] %v1865_v29  ;;  %v3208_v54 = vpack.c.bf16 %v2511_v30, %v2499_v22  ;;  %v3210_v48 = vpack.c.bf16 %v2510_v34, %v2498_v14 }
 0x27f   : > { %1853 = vrot.lane.b32.xlu1 %v4610_v58, %s3447_s6  ;;  %1851 = vrot.lane.b32.xlu0 %v4604_v21, %s3447_s6 }
 0x280   : > { %v4660_v26 = vpop.permute.xlu1 %1849  ;;  %v1848_v7 = vpop.permute.xlu0 %1847  ;;  %3209 = vmatprep.subr.bf16.mxu0 %v3208_v54 }
 0x281   : > { %v1866_v38 = vsel %vm1859_vm3, %v1846_v47, %v1848_v7  ;;  %v1867_v28 = vsel %vm1859_vm3, %v1848_v7, %v4660_v26  ;;  %3211 = vmatpush1.bf16.msra.mxu0 %v3210_v48  ;;  %v2513_v50 = vld [vmem:[#allocation2 + $0x398] sm:$0xff]  ;;  %v2512_v42 = vld [vmem:[#allocation2 + $0x390] sm:$0xff] }
 0x282   : > { %1890 = vst [vmem:[#allocation2 + $0x3f0] sm:$0xf] %v1866_v38  ;;  %1891 = vst [vmem:[#allocation2 + $0x3f8] sm:$0xf] %v1867_v28  ;;  %v3240_v37 = vpack.c.bf16 %v2513_v50, %v2501_v45  ;;  %v3242_v46 = vpack.c.bf16 %v2512_v42, %v2500_v39  ;;  %v2153_v45 = vld [vmem:[%s3486_s14 + $0x38] sm:$0xf]  ;;  %v183_v50 = vlaneseq }
 0x283   : > { %1857 = vrot.lane.b32.xlu1 %v1819_v35, %s3447_s6  ;;  %1855 = vrot.lane.b32.xlu0 %v4617_v57, %s3447_s6 }
 0x284   : > { %v1930_v61 = vpop.permute.xlu1 %1929  ;;  %v1928_v36 = vpop.permute.xlu0 %1927  ;;  %3241 = vmatprep.subr.bf16.mxu1 %v3240_v37  ;;  %vm185_vm10 = vcmp.lt.s32.totalorder %v183_v50, 512 }
 0x285   : > { %v1948_v5 = vsel %vm1943_vm4, %v4399_v1, %v1928_v36  ;;  %v1949_v17 = vsel %vm1943_vm4, %v1928_v36, %v1930_v61  ;;  %3243 = vmatpush1.bf16.msra.mxu1 %v3242_v46  ;;  %188 = vst.msk [vmem:[#allocation2 + $0x524] ss:$8 sm:$0xf] %vm185_vm10, %v3454_v60 }
 0x286   : > { %1972 = vst [vmem:[#allocation2 + $0x3e0] sm:$0xf0] %v1948_v5  ;;  %1973 = vst [vmem:[#allocation2 + $0x3e8] sm:$0xf0] %v1949_v17 }
 0x287   : > { %1937 = vrot.lane.b32.xlu1 %v4634_v63, %s3448_s7  ;;  %1935 = vrot.lane.b32.xlu0 %v4361_v62, %s3448_s7 }
 0x288   : > { %v4676_v32 = vpop.permute.xlu1 %1933  ;;  %v1932_v52 = vpop.permute.xlu0 %1931 }
 0x289   : > { %v1950_v55 = vsel %vm1943_vm4, %v1930_v61, %v1932_v52  ;;  %v1951_v1 = vsel %vm1943_vm4, %v1932_v52, %v4676_v32 }
 0x28a   : > { %1974 = vst [vmem:[#allocation2 + $0x3f0] sm:$0xf0] %v1950_v55  ;;  %1975 = vst [vmem:[#allocation2 + $0x3f8] sm:$0xf0] %v1951_v1  ;;  %v3417_v1 = vld [vmem:[%s3486_s14 + $0x28] sm:$0xff] }
 0x28b   : > { %1941 = vrot.lane.b32.xlu1 %v3411_v8, %s3448_s7  ;;  %1939 = vrot.lane.b32.xlu0 %v4610_v58, %s3448_s7 }
 0x28c   : > { %v2013_v56 = vpop.permute.xlu1 %2012  ;;  %v2011_v25 = vpop.permute.xlu0 %2010 }
 0x28d   : > { %v2031_v23 = vsel %vm2026_vm5, %v4413_v12, %v2011_v25  ;;  %v2032_v4 = vsel %vm2026_vm5, %v2011_v25, %v2013_v56  ;;  %v2522_v54 = vld [vmem:[#allocation2 + $0x3e0] sm:$0xff] }
 0x28e   : > { %2055 = vst [vmem:[#allocation2 + $0x440] sm:$0xf] %v2031_v23  ;;  %2056 = vst [vmem:[#allocation2 + $0x448] sm:$0xf] %v2032_v4 }
 0x28f   : > { %2020 = vrot.lane.b32.xlu1 %v4610_v58, %s3449_s8  ;;  %2018 = vrot.lane.b32.xlu0 %v4604_v21, %s3449_s8 }
 0x290   : > { %v4692_v49 = vpop.permute.xlu1 %2016  ;;  %v2015_v11 = vpop.permute.xlu0 %2014 }
 0x291   : > { %v2033_v40 = vsel %vm2026_vm5, %v2013_v56, %v2015_v11  ;;  %v2034_v12 = vsel %vm2026_vm5, %v2015_v11, %v4692_v49  ;;  %v2524_v46 = vld [vmem:[#allocation2 + $0x3f0] sm:$0xff]  ;;  %v3413_v56 = vld [vmem:[%s3486_s14 + $0x38] ss:$0 sps:$4 sm:$0xff]  }
 0x292   : > { %2057 = vst [vmem:[#allocation2 + $0x450] sm:$0xf] %v2033_v40  ;;  %2058 = vst [vmem:[#allocation2 + $0x458] sm:$0xf] %v2034_v12  ;;  %v2320_v40 = vld [vmem:[%s3486_s14 + $0x38] sm:$0xf] }
 0x293   : > { %2024 = vrot.lane.b32.xlu1 %v1986_v44, %s3449_s8  ;;  %2022 = vrot.lane.b32.xlu0 %v4617_v57, %s3449_s8  ;;  %s3321_s14 = smul.u32 96, %s4878_s10 }
 0x294   : > { %v2097_v43 = vpop.permute.xlu1 %2096  ;;  %v2095_v20 = vpop.permute.xlu0 %2094 }
 0x295   : > { %v2115_v31 = vsel %vm2110_vm6, %v4427_v18, %v2095_v20  ;;  %v2116_v6 = vsel %vm2110_vm6, %v2095_v20, %v2097_v43  ;;  %s4850_s20 = scalar_lea.vmem %s4876_s2, %s3321_s14 }
 0x296   : > { %2139 = vst [vmem:[#allocation2 + $0x440] sm:$0xf0] %v2115_v31  ;;  %2140 = vst [vmem:[#allocation2 + $0x448] sm:$0xf0] %v2116_v6 }
 0x297   : > { %2104 = vrot.lane.b32.xlu1 %v4634_v63, %s3450_s11  ;;  %2102 = vrot.lane.b32.xlu0 %v4361_v62, %s3450_s11  ;;  %v2523_v62 = vld [vmem:[#allocation2 + $0x3e8] sm:$0xff] }
 0x298   : > { %v4708_v47 = vpop.permute.xlu1 %2100  ;;  %v2099_v24 = vpop.permute.xlu0 %2098 }
 0x299   : > { %v2117_v22 = vsel %vm2110_vm6, %v2097_v43, %v2099_v24  ;;  %v2118_v27 = vsel %vm2110_vm6, %v2099_v24, %v4708_v47 }
 0x29a   : > { %2141 = vst [vmem:[#allocation2 + $0x450] sm:$0xf0] %v2117_v22  ;;  %2142 = vst [vmem:[#allocation2 + $0x458] sm:$0xf0] %v2118_v27 }
 0x29b   : > { %2108 = vrot.lane.b32.xlu1 %v3412_v16, %s3450_s11  ;;  %2106 = vrot.lane.b32.xlu0 %v4610_v58, %s3450_s11 }
 0x29c   : > { %v2180_v18 = vpop.permute.xlu1 %2179  ;;  %v2178_v29 = vpop.permute.xlu0 %2177 }
 0x29d   : > { %v2198_v30 = vsel %vm2193_vm7, %v4454_v51, %v2178_v29  ;;  %v2199_v14 = vsel %vm2193_vm7, %v2178_v29, %v2180_v18  ;;  %v2535_v34 = vld [vmem:[#allocation2 + $0x448] sm:$0xff]  ;;  %v2534_v48 = vld [vmem:[#allocation2 + $0x440] sm:$0xff]  ;;  %v2525_v51 = vld [vmem:[#allocation2 + $0x3f8] sm:$0xff] }
 0x29e   : > { %2222 = vst [vmem:[#allocation2 + $0x4a0] sm:$0xf] %v2198_v30  ;;  %2223 = vst [vmem:[#allocation2 + $0x4a8] sm:$0xf] %v2199_v14  ;;  %v3212_v35 = vpack.c.bf16 %v2535_v34, %v2523_v62  ;;  %v3214_v7 = vpack.c.bf16 %v2534_v48, %v2522_v54 }
 0x29f   : > { %2187 = vrot.lane.b32.xlu1 %v4610_v58, %s3451_s12  ;;  %2185 = vrot.lane.b32.xlu0 %v4604_v21, %s3451_s12 }
 0x2a0   : > { %v4724_v38 = vpop.permute.xlu1 %2183  ;;  %v2182_v28 = vpop.permute.xlu0 %2181  ;;  %3213 = vmatprep.subr.bf16.mxu0 %v3212_v35 }
 0x2a1   : > { %v2200_v39 = vsel %vm2193_vm7, %v2180_v18, %v2182_v28  ;;  %v2201_v42 = vsel %vm2193_vm7, %v2182_v28, %v4724_v38  ;;  %3215 = vmatpush1.bf16.msra.mxu0 %v3214_v7  ;;  %v2537_v37 = vld [vmem:[#allocation2 + $0x458] sm:$0xff]  ;;  %v2536_v61 = vld [vmem:[#allocation2 + $0x450] sm:$0xff]  ;;  %v2407_v28 = vld [vmem:[#allocation2 + $0x48] sm:$0xff] }
 0x2a2   : > { %2224 = vst [vmem:[#allocation2 + $0x4b0] sm:$0xf] %v2200_v39  ;;  %2225 = vst [vmem:[#allocation2 + $0x4b8] sm:$0xf] %v2201_v42  ;;  %v3244_v36 = vpack.c.bf16 %v2537_v37, %v2525_v51  ;;  %v3246_v5 = vpack.c.bf16 %v2536_v61, %v2524_v46  ;;  %v2418_v42 = vld [vmem:[#allocation2 + $0xa0] sm:$0xff]  ;;  %v2443_v46 = vld [vmem:[#allocation2 + $0x168] sm:$0xff] }
 0x2a3   : > { %2191 = vrot.lane.b32.xlu1 %v2153_v45, %s3451_s12  ;;  %2189 = vrot.lane.b32.xlu0 %v4617_v57, %s3451_s12  ;;  %v2421_v61 = vld [vmem:[#allocation2 + $0xb8] sm:$0xff] }
 0x2a4   : > { %v2264_v17 = vpop.permute.xlu1 %2263  ;;  %v2262_v8 = vpop.permute.xlu0 %2261  ;;  %3245 = vmatprep.subr.bf16.mxu1 %v3244_v36  ;;  %v2406_v36 = vld [vmem:[#allocation2 + $0x40] sm:$0xff] }
 0x2a5   : > { %v2282_v52 = vsel %vm2277_vm8, %v4468_v0, %v2262_v8  ;;  %v2283_v55 = vsel %vm2277_vm8, %v2262_v8, %v2264_v17  ;;  %3247 = vmatpush1.bf16.msra.mxu1 %v3246_v5  ;;  %v3258_v5 = vpack.c.bf16 %v2418_v42, %v2406_v36  ;;  %v2409_v8 = vld [vmem:[#allocation2 + $0x58] sm:$0xff] }
 0x2a6   : > { %2306 = vst [vmem:[#allocation2 + $0x4a0] sm:$0xf0] %v2282_v52  ;;  %2307 = vst [vmem:[#allocation2 + $0x4a8] sm:$0xf0] %v2283_v55 }
 0x2a7   : > { %2271 = vrot.lane.b32.xlu1 %v4634_v63, %s3453_s13  ;;  %2269 = vrot.lane.b32.xlu0 %v3417_v1, %s3453_s13 }
 0x2a8   : > { %v4741_v25 = vpop.permute.xlu1 %2267  ;;  %v2266_v60 = vpop.permute.xlu0 %2265 }
 0x2a9   : > { %v2284_v23 = vsel %vm2277_vm8, %v2264_v17, %v2266_v60  ;;  %v2285_v0 = vsel %vm2277_vm8, %v2266_v60, %v4741_v25  ;;  %v2431_v17 = vld [vmem:[#allocation2 + $0x108] sm:$0xff]  ;;  %v2442_v60 = vld [vmem:[#allocation2 + $0x160] sm:$0xff] }
 0x2aa   : > { %2308 = vst [vmem:[#allocation2 + $0x4b0] sm:$0xf0] %v2284_v23  ;;  %2309 = vst [vmem:[#allocation2 + $0x4b8] sm:$0xf0] %v2285_v0  ;;  %v3260_v1 = vpack.c.bf16 %v2443_v46, %v2431_v17  ;;  %v2420_v23 = vld [vmem:[#allocation2 + $0xb0] sm:$0xff] }
 0x2ab   : > { %2275 = vrot.lane.b32.xlu1 %v3413_v56, %s3453_s13  ;;  %2273 = vrot.lane.b32.xlu0 %v4610_v58, %s3453_s13  ;;  %v3288_v56 = vpack.c.bf16 %v2421_v61, %v2409_v8 }
 0x2ac   : > { %v2347_v63 = vpop.permute.xlu1 %2346  ;;  %v2345_v4 = vpop.permute.xlu0 %2344 }
 0x2ad   : > { %v2365_v44 = vsel %vm2360_vm9, %v4482_v10, %v2345_v4  ;;  %v2366_v11 = vsel %vm2360_vm9, %v2345_v4, %v2347_v63  ;;  %v2547_v6 = vld [vmem:[#allocation2 + $0x4a8] sm:$0xff]  ;;  %v2546_v22 = vld [vmem:[#allocation2 + $0x4a0] sm:$0xff] }
 0x2ae   : > { %2389 = vst [vmem:[#allocation2 + $0x500] sm:$0xf] %v2365_v44  ;;  %2390 = vst [vmem:[#allocation2 + $0x508] sm:$0xf] %v2366_v11  ;;  %v2467_v4 = vld [vmem:[#allocation2 + $0x228] sm:$0xff]  ;;  %v2445_v44 = vld [vmem:[#allocation2 + $0x178] sm:$0xff] }
 0x2af   : > { %2354 = vrot.lane.b32.xlu1 %v4610_v58, %s3455_s15  ;;  %2352 = vrot.lane.b32.xlu0 %v4604_v21, %s3455_s15  ;;  %v2430_v11 = vld [vmem:[#allocation2 + $0x100] sm:$0xff] }
 0x2b0   : > { %v4757_v12 = vpop.permute.xlu1 %2350  ;;  %v2349_v43 = vpop.permute.xlu0 %2348 }
 0x2b1   : > { %v2367_v20 = vsel %vm2360_vm9, %v2347_v63, %v2349_v43  ;;  %v2368_v31 = vsel %vm2360_vm9, %v2349_v43, %v4757_v12  ;;  %v2549_v14 = vld [vmem:[#allocation2 + $0x4b8] sm:$0xff]  ;;  %v2548_v48 = vld [vmem:[#allocation2 + $0x4b0] sm:$0xff]  ;;  %v3262_v43 = vpack.c.bf16 %v2442_v60, %v2430_v11 }
 0x2b2   : > { %2391 = vst [vmem:[#allocation2 + $0x510] sm:$0xf] %v2367_v20  ;;  %2392 = vst [vmem:[#allocation2 + $0x518] sm:$0xf] %v2368_v31  ;;  %v2455_v31 = vld [vmem:[#allocation2 + $0x1c8] sm:$0xff] }
 0x2b3   : > { %2358 = vrot.lane.b32.xlu1 %v2320_v40, %s3455_s15  ;;  %2356 = vrot.lane.b32.xlu0 %v4617_v57, %s3455_s15  ;;  %v2419_v57 = vld [vmem:[#allocation2 + $0xa8] sm:$0xff]  ;;  %v2408_v40 = vld [vmem:[#allocation2 + $0x50] sm:$0xff] }
 0x2b4   : > { %v1190_v10 = vpop.permute.xlu1 %1189  ;;  %v1188_v58 = vpop.permute.xlu0 %1187  ;;  %v3256_v39 = vpack.c.bf16 %v2419_v57, %v2407_v28  ;;  %v3290_v20 = vpack.c.bf16 %v2420_v23, %v2408_v40 }
 0x2b5   : > { %v1202_v21 = vsel %vm1191_vm11, %v4178_v15, %v1188_v58  ;;  %v1203_v16 = vsel %vm1191_vm11, %v1188_v58, %v1190_v10  ;;  %v2559_v24 = vld [vmem:[#allocation2 + $0x508] sm:$0xff]  ;;  %v2558_v27 = vld [vmem:[#allocation2 + $0x500] sm:$0xff]  ;;  %v2433_v10 = vld [vmem:[#allocation2 + $0x118] sm:$0xff] }
 0x2b6   : > { %1226 = vst [vmem:[#allocation2 + $0x290] sm:$0xf] %v1202_v21  ;;  %1227 = vst [vmem:[#allocation2 + $0x298] sm:$0xf] %v1203_v16  ;;  %v3216_v18 = vpack.c.bf16 %v2559_v24, %v2547_v6  ;;  %v3218_v29 = vpack.c.bf16 %v2558_v27, %v2546_v22  ;;  %v4781_v58 = vld [vmem:[#allocation2 + $0x540] sm:$0xff]  ;;  %v3292_v21 = vpack.c.bf16 %v2445_v44, %v2433_v10  ;;  %v2444_v24 = vld [vmem:[#allocation2 + $0x170] sm:$0xff] }
 0x2b7   : > { %v2466_v16 = vld [vmem:[#allocation2 + $0x220] sm:$0xff] }
 0x2b8   : > { %v1270_v62 = vpop.permute.xlu1 %1269  ;;  %v1268_v30 = vpop.permute.xlu0 %1267  ;;  %3217 = vmatprep.subr.bf16.mxu0 %v3216_v18  ;;  %v2469_v18 = vld [vmem:[#allocation2 + $0x238] sm:$0xff] }
 0x2b9   : > { %v1284_v34 = vsel %vm1275_vm12, %v4512_v13, %v1268_v30  ;;  %v1285_v54 = vsel %vm1275_vm12, %v1268_v30, %v1270_v62  ;;  %3219 = vmatpush1.bf16.msra.mxu0 %v3218_v29  ;;  %v2561_v15 = vld [vmem:[#allocation2 + $0x518] sm:$0xff]  ;;  %v2560_v35 = vld [vmem:[#allocation2 + $0x510] sm:$0xff]  ;;  %v2454_v29 = vld [vmem:[#allocation2 + $0x1c0] sm:$0xff] }
 0x2ba   : > { %1308 = vst [vmem:[#allocation2 + $0x280] sm:$0xf0] %v1284_v34  ;;  %1309 = vst [vmem:[#allocation2 + $0x288] sm:$0xf0] %v1285_v54  ;;  %3221 = vmatprep.subr.bf16.mxu0 %v3456_v53  ;;  %v3248_v7 = vpack.c.bf16 %v2561_v15, %v2549_v14  ;;  %v3250_v45 = vpack.c.bf16 %v2560_v35, %v2548_v48  ;;  %v3266_v30 = vpack.c.bf16 %v2466_v16, %v2454_v29  ;;  %v2468_v15 = vld [vmem:[#allocation2 + $0x230] sm:$0xff] }
 0x2bc   : > { %v1274_v51 = vpop.permute.xlu1 %1273  ;;  %v1272_v50 = vpop.permute.xlu0 %1271  ;;  %3249 = vmatprep.subr.bf16.mxu1 %v3248_v7  ;;  %v2456_v7 = vld [vmem:[#allocation2 + $0x1d0] sm:$0xff] }
 0x2bd   : > { %v1286_v13 = vsel %vm1275_vm12, %v1270_v62, %v1272_v50  ;;  %v1287_v37 = vsel %vm1275_vm12, %v1272_v50, %v1274_v51  ;;  %3223 = vmatpush1.bf16.msra.mxu0 %v3456_v53  ;;  %3251 = vmatpush1.bf16.msra.mxu1 %v3250_v45  ;;  %v2432_v62 = vld [vmem:[#allocation2 + $0x110] sm:$0xff]  ;;  %v3298_v45 = vpack.c.bf16 %v2468_v15, %v2456_v7 }
 0x2be   : > { %1310 = vst [vmem:[#allocation2 + $0x290] sm:$0xf0] %v1286_v13  ;;  %1311 = vst [vmem:[#allocation2 + $0x298] sm:$0xf0] %v1287_v37  ;;  %3257 = vmatprep.subr.bf16.mxu0 %v3256_v39  ;;  %3253 = vmatprep.subr.bf16.mxu1 %v3456_v53  ;;  %v3294_v14 = vpack.c.bf16 %v2444_v24, %v2432_v62 }
 0x2c0   : > { %v1353_v52 = vpop.permute.xlu1 %1352  ;;  %2797 = vmatmul.mubr.f32.vlgmr.msra.gmra.mrb[2].mxu0 %v4533_v3 }
 0x2c1   : > { %v1351_v55 = vpop.permute.xlu0 %1350  ;;  %3255 = vmatpush1.bf16.msra.mxu1 %v3456_v53  ;;  %3259 = vmatpush1.bf16.msra.mxu0 %v3258_v5  ;;  %v3264_v53 = vpack.c.bf16 %v2467_v4, %v2455_v31  ;;  %v2479_v13 = vld [vmem:[#allocation2 + $0x288] sm:$0xff]  ;;  %v2478_v36 = vld [vmem:[#allocation2 + $0x280] sm:$0xff] }
 0x2c2   : > { %v1367_v0 = vsel %vm1358_vm13, %v4544_v33, %v1351_v55  ;;  %v1368_v63 = vsel %vm1358_vm13, %v1351_v55, %v1353_v52  ;;  %3261 = vmatprep.subr.bf16.mxu0 %v3260_v1  ;;  %3289 = vmatprep.subr.bf16.mxu1 %v3288_v56 }
 0x2c3   : > { %1391 = vst [vmem:[#allocation2 + $0x2e0] sm:$0xf] %v1367_v0  ;;  %1392 = vst [vmem:[#allocation2 + $0x2e8] sm:$0xf] %v1368_v63  ;;  %2938 = vmatprep.mubr.f32.mxu0 %v4781_v58 }
 0x2c4   : > { %v1357_v33 = vpop.permute.xlu1 %1356  ;;  %2868 = vmatmul.mubr.f32.vlgmr.msra.gmra.mrb[2].mxu1 %v4533_v3  ;;  %v2457_v3 = vld [vmem:[#allocation2 + $0x1d8] sm:$0xff] }
 0x2c5   : > { %v1355_v6 = vpop.permute.xlu0 %1354  ;;  %3263 = vmatpush1.bf16.msra.mxu0 %v3262_v43  ;;  %3291 = vmatpush1.bf16.msra.mxu1 %v3290_v20  ;;  %v3296_v54 = vpack.c.bf16 %v2469_v18, %v2457_v3  ;;  %v2481_v1 = vld [vmem:[#allocation2 + $0x298] sm:$0xff] }
 0x2c6   : > { %v1369_v22 = vsel %vm1358_vm13, %v1353_v52, %v1355_v6  ;;  %v1370_v27 = vsel %vm1358_vm13, %v1355_v6, %v1357_v33  ;;  %3265 = vmatprep.subr.bf16.mxu0 %v3264_v53  ;;  %3293 = vmatprep.subr.bf16.mxu1 %v3292_v21 }
 0x2c7   : > { %1393 = vst [vmem:[#allocation2 + $0x2f0] sm:$0xf] %v1369_v22  ;;  %1394 = vst [vmem:[#allocation2 + $0x2f8] sm:$0xf] %v1370_v27  ;;  %3009 = vmatprep.mubr.f32.mxu1 %v4781_v58 }
 0x2c9   : > { %v1437_v57 = vpop.permute.xlu1 %1436  ;;  %v1435_v34 = vpop.permute.xlu0 %1434  ;;  %3267 = vmatpush1.bf16.msra.mxu0 %v3266_v30  ;;  %3295 = vmatpush1.bf16.msra.mxu1 %v3294_v14 }
 0x2ca   : > { %v1451_v48 = vsel %vm1442_vm14, %v4565_v9, %v1435_v34  ;;  %v1452_v35 = vsel %vm1442_vm14, %v1435_v34, %v1437_v57  ;;  %3297 = vmatprep.subr.bf16.mxu1 %v3296_v54 }
 0x2cb   : > { %1475 = vst [vmem:[#allocation2 + $0x2e0] sm:$0xf0] %v1451_v48  ;;  %1476 = vst [vmem:[#allocation2 + $0x2e8] sm:$0xf0] %v1452_v35 }
 0x2cd   : > { %v1441_v28 = vpop.permute.xlu1 %1440  ;;  %v1439_v51 = vpop.permute.xlu0 %1438  ;;  %3299 = vmatpush1.bf16.msra.mxu1 %v3298_v45 }
 0x2ce   : > { %v1453_v50 = vsel %vm1442_vm14, %v1437_v57, %v1439_v51  ;;  %v1454_v39 = vsel %vm1442_vm14, %v1439_v51, %v1441_v28 }
 0x2cf   : > { %1477 = vst [vmem:[#allocation2 + $0x2f0] sm:$0xf0] %v1453_v50  ;;  %1478 = vst [vmem:[#allocation2 + $0x2f8] sm:$0xf0] %v1454_v39 }
 0x2d1   : > { %v1520_v42 = vpop.permute.xlu1 %1519  ;;  %v1518_v9 = vpop.permute.xlu0 %1517 }
 0x2d2   : > { %v1534_v37 = vsel %vm1525_vm15, %v4581_v2, %v1518_v9  ;;  %v1535_v46 = vsel %vm1525_vm15, %v1518_v9, %v1520_v42  ;;  %v2491_v61 = vld [vmem:[#allocation2 + $0x2e8] sm:$0xff]  ;;  %v2490_v5 = vld [vmem:[#allocation2 + $0x2e0] sm:$0xff]  ;;  %v2480_v2 = vld [vmem:[#allocation2 + $0x290] sm:$0xff] }
 0x2d3   : > { %1558 = vst [vmem:[#allocation2 + $0x340] sm:$0xf] %v1534_v37  ;;  %1559 = vst [vmem:[#allocation2 + $0x348] sm:$0xf] %v1535_v46  ;;  %v3268_v17 = vpack.c.bf16 %v2491_v61, %v2479_v13  ;;  %v3270_v8 = vpack.c.bf16 %v2490_v5, %v2478_v36 }
 0x2d5   : > { %v1524_v52 = vpop.permute.xlu1 %1523  ;;  %v1522_v55 = vpop.permute.xlu0 %1521  ;;  %3269 = vmatprep.subr.bf16.mxu0 %v3268_v17 }
 0x2d6   : > { %v1536_v56 = vsel %vm1525_vm15, %v1520_v42, %v1522_v55  ;;  %v1537_v60 = vsel %vm1525_vm15, %v1522_v55, %v1524_v52  ;;  %3271 = vmatpush1.bf16.msra.mxu0 %v3270_v8  ;;  %v2493_v23 = vld [vmem:[#allocation2 + $0x2f8] sm:$0xff]  ;;  %v2492_v0 = vld [vmem:[#allocation2 + $0x2f0] sm:$0xff] }
 0x2d7   : > { %1560 = vst [vmem:[#allocation2 + $0x350] sm:$0xf] %v1536_v56  ;;  %1561 = vst [vmem:[#allocation2 + $0x358] sm:$0xf] %v1537_v60  ;;  %v3300_v63 = vpack.c.bf16 %v2493_v23, %v2481_v1  ;;  %v3302_v4 = vpack.c.bf16 %v2492_v0, %v2480_v2 }
 0x2d9   : > { %v1604_v44 = vpop.permute.xlu1 %1603  ;;  %v1602_v11 = vpop.permute.xlu0 %1601  ;;  %3301 = vmatprep.subr.bf16.mxu1 %v3300_v63 }
 0x2da   : > { %v1618_v40 = vsel %vm1609_vm0, %v4597_v19, %v1602_v11  ;;  %v1619_v43 = vsel %vm1609_vm0, %v1602_v11, %v1604_v44  ;;  %3303 = vmatpush1.bf16.msra.mxu1 %v3302_v4 }
 0x2db   : > { %1642 = vst [vmem:[#allocation2 + $0x340] sm:$0xf0] %v1618_v40  ;;  %1643 = vst [vmem:[#allocation2 + $0x348] sm:$0xf0] %v1619_v43 }
 0x2dd   : > { %v1608_v20 = vpop.permute.xlu1 %1607  ;;  %v1606_v31 = vpop.permute.xlu0 %1605 }
 0x2de   : > { %v1620_v10 = vsel %vm1609_vm0, %v1604_v44, %v1606_v31  ;;  %v1621_v33 = vsel %vm1609_vm0, %v1606_v31, %v1608_v20 }
 0x2df   : > { %1644 = vst [vmem:[#allocation2 + $0x350] sm:$0xf0] %v1620_v10  ;;  %1645 = vst [vmem:[#allocation2 + $0x358] sm:$0xf0] %v1621_v33 }
 0x2e1   : > { %v1687_v6 = vpop.permute.xlu1 %1686  ;;  %v1685_v53 = vpop.permute.xlu0 %1684 }
 0x2e2   : > { %v1701_v21 = vsel %vm1692_vm1, %v4624_v59, %v1685_v53  ;;  %v1702_v19 = vsel %vm1692_vm1, %v1685_v53, %v1687_v6  ;;  %v2503_v15 = vld [vmem:[#allocation2 + $0x348] sm:$0xff]  ;;  %v2502_v7 = vld [vmem:[#allocation2 + $0x340] sm:$0xff] }
 0x2e3   : > { %1725 = vst [vmem:[#allocation2 + $0x3a0] sm:$0xf] %v1701_v21  ;;  %1726 = vst [vmem:[#allocation2 + $0x3a8] sm:$0xf] %v1702_v19 }
 0x2e5   : > { %v1691_v16 = vpop.permute.xlu1 %1690  ;;  %v1689_v24 = vpop.permute.xlu0 %1688 }
 0x2e6   : > { %v1703_v22 = vsel %vm1692_vm1, %v1687_v6, %v1689_v24  ;;  %v1704_v27 = vsel %vm1692_vm1, %v1689_v24, %v1691_v16  ;;  %v2505_v42 = vld [vmem:[#allocation2 + $0x358] sm:$0xff] }
 0x2e7   : > { %1727 = vst [vmem:[#allocation2 + $0x3b0] sm:$0xf] %v1703_v22  ;;  %1728 = vst [vmem:[#allocation2 + $0x3b8] sm:$0xf] %v1704_v27 }
 0x2e9   : > { %v1771_v18 = vpop.permute.xlu1 %1770  ;;  %v1769_v29 = vpop.permute.xlu0 %1768 }
 0x2ea   : > { %v1785_v62 = vsel %vm1776_vm2, %v4644_v41, %v1769_v29  ;;  %v1786_v30 = vsel %vm1776_vm2, %v1769_v29, %v1771_v18 }
 0x2eb   : > { %1809 = vst [vmem:[#allocation2 + $0x3a0] sm:$0xf0] %v1785_v62  ;;  %1810 = vst [vmem:[#allocation2 + $0x3a8] sm:$0xf0] %v1786_v30 }
 0x2ed   : > { %v1775_v59 = vpop.permute.xlu1 %1774  ;;  %v1773_v14 = vpop.permute.xlu0 %1772 }
 0x2ee   : > { %v1787_v3 = vsel %vm1776_vm2, %v1771_v18, %v1773_v14  ;;  %v1788_v57 = vsel %vm1776_vm2, %v1773_v14, %v1775_v59 }
 0x2ef   : > { %1811 = vst [vmem:[#allocation2 + $0x3b0] sm:$0xf0] %v1787_v3  ;;  %1812 = vst [vmem:[#allocation2 + $0x3b8] sm:$0xf0] %v1788_v57 }
 0x2f1   : > { %v1854_v34 = vpop.permute.xlu1 %1853  ;;  %v1852_v54 = vpop.permute.xlu0 %1851 }
 0x2f2   : > { %v1868_v48 = vsel %vm1859_vm3, %v4660_v26, %v1852_v54  ;;  %v1869_v41 = vsel %vm1859_vm3, %v1852_v54, %v1854_v34  ;;  %v2515_v35 = vld [vmem:[#allocation2 + $0x3a8] sm:$0xff]  ;;  %v2514_v45 = vld [vmem:[#allocation2 + $0x3a0] sm:$0xff]  ;;  %v2504_v26 = vld [vmem:[#allocation2 + $0x350] sm:$0xff] }
 0x2f3   : > { %1892 = vst [vmem:[#allocation2 + $0x400] sm:$0xf] %v1868_v48  ;;  %1893 = vst [vmem:[#allocation2 + $0x408] sm:$0xf] %v1869_v41  ;;  %v3272_v28 = vpack.c.bf16 %v2515_v35, %v2503_v15  ;;  %v3274_v51 = vpack.c.bf16 %v2514_v45, %v2502_v7 }
 0x2f5   : > { %v1858_v50 = vpop.permute.xlu1 %1857  ;;  %v1856_v39 = vpop.permute.xlu0 %1855  ;;  %3273 = vmatprep.subr.bf16.mxu0 %v3272_v28 }
 0x2f6   : > { %v1870_v9 = vsel %vm1859_vm3, %v1854_v34, %v1856_v39  ;;  %v1871_v13 = vsel %vm1859_vm3, %v1856_v39, %v1858_v50  ;;  %3275 = vmatpush1.bf16.msra.mxu0 %v3274_v51  ;;  %v2517_v37 = vld [vmem:[#allocation2 + $0x3b8] sm:$0xff]  ;;  %v2516_v46 = vld [vmem:[#allocation2 + $0x3b0] sm:$0xff] }
 0x2f7   : > { %1894 = vst [vmem:[#allocation2 + $0x410] sm:$0xf] %v1870_v9  ;;  %1895 = vst [vmem:[#allocation2 + $0x418] sm:$0xf] %v1871_v13  ;;  %v3304_v61 = vpack.c.bf16 %v2517_v37, %v2505_v42  ;;  %v3306_v36 = vpack.c.bf16 %v2516_v46, %v2504_v26 }
 0x2f9   : > { %v1938_v5 = vpop.permute.xlu1 %1937  ;;  %v1936_v17 = vpop.permute.xlu0 %1935  ;;  %3305 = vmatprep.subr.bf16.mxu1 %v3304_v61 }
 0x2fa   : > { %v1952_v8 = vsel %vm1943_vm4, %v4676_v32, %v1936_v17  ;;  %v1953_v52 = vsel %vm1943_vm4, %v1936_v17, %v1938_v5  ;;  %3307 = vmatpush1.bf16.msra.mxu1 %v3306_v36 }
 0x2fb   : > { %1976 = vst [vmem:[#allocation2 + $0x400] sm:$0xf0] %v1952_v8  ;;  %1977 = vst [vmem:[#allocation2 + $0x408] sm:$0xf0] %v1953_v52 }
 0x2fd   : > { %v1942_v55 = vpop.permute.xlu1 %1941  ;;  %v1940_v1 = vpop.permute.xlu0 %1939 }
 0x2fe   : > { %v1954_v56 = vsel %vm1943_vm4, %v1938_v5, %v1940_v1  ;;  %v1955_v60 = vsel %vm1943_vm4, %v1940_v1, %v1942_v55 }
 0x2ff   : > { %1978 = vst [vmem:[#allocation2 + $0x410] sm:$0xf0] %v1954_v56  ;;  %1979 = vst [vmem:[#allocation2 + $0x418] sm:$0xf0] %v1955_v60 }
 0x301   : > { %v2021_v23 = vpop.permute.xlu1 %2020  ;;  %v2019_v2 = vpop.permute.xlu0 %2018 }
 0x302   : > { %v2035_v0 = vsel %vm2026_vm5, %v4692_v49, %v2019_v2  ;;  %v2036_v32 = vsel %vm2026_vm5, %v2019_v2, %v2021_v23  ;;  %v2527_v19 = vld [vmem:[#allocation2 + $0x408] sm:$0xff]  ;;  %v2526_v22 = vld [vmem:[#allocation2 + $0x400] sm:$0xff] }
 0x303   : > { %2059 = vst [vmem:[#allocation2 + $0x460] sm:$0xf] %v2035_v0  ;;  %2060 = vst [vmem:[#allocation2 + $0x468] sm:$0xf] %v2036_v32 }
 0x305   : > { %v2025_v63 = vpop.permute.xlu1 %2024  ;;  %v2023_v4 = vpop.permute.xlu0 %2022 }
 0x306   : > { %v2037_v44 = vsel %vm2026_vm5, %v2021_v23, %v2023_v4  ;;  %v2038_v11 = vsel %vm2026_vm5, %v2023_v4, %v2025_v63  ;;  %v2529_v59 = vld [vmem:[#allocation2 + $0x418] sm:$0xff] }
 0x307   : > { %2061 = vst [vmem:[#allocation2 + $0x470] sm:$0xf] %v2037_v44  ;;  %2062 = vst [vmem:[#allocation2 + $0x478] sm:$0xf] %v2038_v11  ;;  %v3284_v44 = vpack.c.bf16 %v4781_v58, %v4781_v58  ;;  %v3419_v58 = vld [vmem:[%s4875_s1] sm:$0xff] }
 0x309   : > { %v2105_v40 = vpop.permute.xlu1 %2104  ;;  %v2103_v43 = vpop.permute.xlu0 %2102 }
 0x30a   : > { %v2119_v20 = vsel %vm2110_vm6, %v4708_v47, %v2103_v43  ;;  %v2120_v31 = vsel %vm2110_vm6, %v2103_v43, %v2105_v40 }
 0x30b   : > { %2143 = vst [vmem:[#allocation2 + $0x460] sm:$0xf0] %v2119_v20  ;;  %2144 = vst [vmem:[#allocation2 + $0x468] sm:$0xf0] %v2120_v31 }
 0x30d   : > { %v2109_v49 = vpop.permute.xlu1 %2108  ;;  %v2107_v10 = vpop.permute.xlu0 %2106 }
 0x30e   : > { %v2121_v33 = vsel %vm2110_vm6, %v2105_v40, %v2107_v10  ;;  %v2122_v6 = vsel %vm2110_vm6, %v2107_v10, %v2109_v49 }
 0x30f   : > { %2145 = vst [vmem:[#allocation2 + $0x470] sm:$0xf0] %v2121_v33  ;;  %2146 = vst [vmem:[#allocation2 + $0x478] sm:$0xf0] %v2122_v6 }
 0x311   : > { %v2188_v53 = vpop.permute.xlu1 %2187  ;;  %v2186_v21 = vpop.permute.xlu0 %2185 }
 0x312   : > { %v2202_v16 = vsel %vm2193_vm7, %v4724_v38, %v2186_v21  ;;  %v2203_v47 = vsel %vm2193_vm7, %v2186_v21, %v2188_v53  ;;  %v2539_v24 = vld [vmem:[#allocation2 + $0x468] sm:$0xff]  ;;  %v2538_v27 = vld [vmem:[#allocation2 + $0x460] sm:$0xff]  ;;  %v2528_v38 = vld [vmem:[#allocation2 + $0x410] sm:$0xff] }
 0x313   : > { %2226 = vst [vmem:[#allocation2 + $0x4c0] sm:$0xf] %v2202_v16  ;;  %2227 = vst [vmem:[#allocation2 + $0x4c8] sm:$0xf] %v2203_v47  ;;  %v3276_v18 = vpack.c.bf16 %v2539_v24, %v2527_v19  ;;  %v3278_v29 = vpack.c.bf16 %v2538_v27, %v2526_v22 }
 0x315   : > { %v2192_v62 = vpop.permute.xlu1 %2191  ;;  %v2190_v30 = vpop.permute.xlu0 %2189  ;;  %3277 = vmatprep.subr.bf16.mxu0 %v3276_v18 }
 0x316   : > { %v2204_v14 = vsel %vm2193_vm7, %v2188_v53, %v2190_v30  ;;  %v2205_v3 = vsel %vm2193_vm7, %v2190_v30, %v2192_v62  ;;  %3279 = vmatpush1.bf16.msra.mxu0 %v3278_v29  ;;  %v2541_v57 = vld [vmem:[#allocation2 + $0x478] sm:$0xff]  ;;  %v2540_v34 = vld [vmem:[#allocation2 + $0x470] sm:$0xff] }
 0x317   : > { %2228 = vst [vmem:[#allocation2 + $0x4d0] sm:$0xf] %v2204_v14  ;;  %2229 = vst [vmem:[#allocation2 + $0x4d8] sm:$0xf] %v2205_v3  ;;  %v3308_v54 = vpack.c.bf16 %v2541_v57, %v2529_v59  ;;  %v3310_v15 = vpack.c.bf16 %v2540_v34, %v2528_v38 }
 0x319   : > { %v2272_v48 = vpop.permute.xlu1 %2271  ;;  %v2270_v41 = vpop.permute.xlu0 %2269  ;;  %3309 = vmatprep.subr.bf16.mxu1 %v3308_v54 }
 0x31a   : > { %v2286_v35 = vsel %vm2277_vm8, %v4741_v25, %v2270_v41  ;;  %v2287_v7 = vsel %vm2277_vm8, %v2270_v41, %v2272_v48  ;;  %3311 = vmatpush1.bf16.msra.mxu1 %v3310_v15 }
 0x31b   : > { %2310 = vst [vmem:[#allocation2 + $0x4c0] sm:$0xf0] %v2286_v35  ;;  %2311 = vst [vmem:[#allocation2 + $0x4c8] sm:$0xf0] %v2287_v7 }
 0x31d   : > { %v2276_v45 = vpop.permute.xlu1 %2275  ;;  %v2274_v28 = vpop.permute.xlu0 %2273 }
 0x31e   : > { %v2288_v51 = vsel %vm2277_vm8, %v2272_v48, %v2274_v28  ;;  %v2289_v50 = vsel %vm2277_vm8, %v2274_v28, %v2276_v45 }
 0x31f   : > { %2312 = vst [vmem:[#allocation2 + $0x4d0] sm:$0xf0] %v2288_v51  ;;  %2313 = vst [vmem:[#allocation2 + $0x4d8] sm:$0xf0] %v2289_v50 }
 0x321   : > { %v2355_v39 = vpop.permute.xlu1 %2354  ;;  %v2353_v42 = vpop.permute.xlu0 %2352 }
 0x322   : > { %v2369_v9 = vsel %vm2360_vm9, %v4757_v12, %v2353_v42  ;;  %v2370_v25 = vsel %vm2360_vm9, %v2353_v42, %v2355_v39  ;;  %v2551_v1 = vld [vmem:[#allocation2 + $0x4c8] sm:$0xff]  ;;  %v2550_v2 = vld [vmem:[#allocation2 + $0x4c0] sm:$0xff] }
 0x323   : > { %2393 = vst [vmem:[#allocation2 + $0x520] sm:$0xf] %v2369_v9  ;;  %2394 = vst [vmem:[#allocation2 + $0x528] sm:$0xf] %v2370_v25  ;;  %v2727_v13 = vpop.f32.mrb[0].mxu1 }
 0x324   : > { %vm3018_vm11 = vcmp.ge.f32.partialorder %v2727_v13, 0.0  ;;  %v3030_v46 = vmul.f32 0.2, %v2727_v13  ;;  %v2729_v12 = vpop.f32.mrb[1].mxu1 }
 0x325   : > { %v2359_v37 = vpop.permute.xlu1 %2358  ;;  %v2357_v26 = vpop.permute.xlu0 %2356  ;;  %vm3019_vm12 = vcmp.ge.f32.partialorder %v2729_v12, 0.0  ;;  %v3031_v8 = vmul.f32 0.2, %v2729_v12 }
 0x326   : > { %v2371_v61 = vsel %vm2360_vm9, %v2355_v39, %v2357_v26  ;;  %v2372_v36 = vsel %vm2360_vm9, %v2357_v26, %v2359_v37  ;;  %v3042_v17 = vsel %vm3018_vm11, %v2727_v13, %v3030_v46  ;;  %v2553_v40 = vld [vmem:[#allocation2 + $0x4d8] sm:$0xff]  ;;  %v2552_v20 = vld [vmem:[#allocation2 + $0x4d0] sm:$0xff] }
 0x327   : > { %2395 = vst [vmem:[#allocation2 + $0x530] sm:$0xf] %v2371_v61  ;;  %2396 = vst [vmem:[#allocation2 + $0x538] sm:$0xf] %v2372_v36  ;;  %v2656_v5 = vpop.f32.mrb[0].mxu0  ;;  %v3043_v60 = vsel %vm3019_vm12, %v2729_v12, %v3031_v8 }
 0x328   : > { %vm3016_vm13 = vcmp.ge.f32.partialorder %v2656_v5, 0.0  ;;  %v3028_v52 = vmul.f32 0.2, %v2656_v5  ;;  %3054 = vst [vmem:[%s4850_s20 + $0x10] sm:$0xff] %v3042_v17  ;;  %v2658_v55 = vpop.f32.mrb[1].mxu0  ;;  %3055 = vst [vmem:[%s4850_s20 + $0x18] sm:$0xff] %v3043_v60 }
 0x329   : > { %vm3017_vm14 = vcmp.ge.f32.partialorder %v2658_v55, 0.0  ;;  %v3029_v56 = vmul.f32 0.2, %v2658_v55 }
 0x32a   : > { %v2563_v23 = vld [vmem:[#allocation2 + $0x528] sm:$0xff]  ;;  %v2562_v0 = vld [vmem:[#allocation2 + $0x520] sm:$0xff]  ;;  %v3040_v32 = vsel %vm3016_vm13, %v2656_v5, %v3028_v52 }
 0x32b   : > { %v3280_v63 = vpack.c.bf16 %v2563_v23, %v2551_v1  ;;  %v3282_v4 = vpack.c.bf16 %v2562_v0, %v2550_v2  ;;  %3052 = vst [vmem:[%s4850_s20] sm:$0xff] %v3040_v32  ;;  %v3041_v11 = vsel %vm3017_vm14, %v2658_v55, %v3029_v56 }
 0x32c   : > { %3053 = vst [vmem:[%s4850_s20 + $0x8] sm:$0xff] %v3041_v11 }
 0x32d   : > { %3281 = vmatprep.subr.bf16.mxu0 %v3280_v63 }
 0x32e   : > { %3283 = vmatpush1.bf16.msra.mxu0 %v3282_v4  ;;  %v2565_v43 = vld [vmem:[#allocation2 + $0x538] sm:$0xff]  ;;  %v2564_v31 = vld [vmem:[#allocation2 + $0x530] sm:$0xff] }
 0x32f   : > { %v3312_v49 = vpack.c.bf16 %v2565_v43, %v2553_v40  ;;  %3285 = vmatprep.subr.bf16.mxu0 %v3284_v44  ;;  %v3314_v10 = vpack.c.bf16 %v2564_v31, %v2552_v20 }
 0x331   : > { %3313 = vmatprep.subr.bf16.mxu1 %v3312_v49 }
 0x332   : > { %3315 = vmatpush1.bf16.msra.mxu1 %v3314_v10  ;;  %3287 = vmatpush1.bf16.msra.mxu0 %v3284_v44 }
 0x333   : > { %3317 = vmatprep.subr.bf16.mxu1 %v3284_v44 }
 0x335   : > { %2939 = vmatmul.mubr.f32.vlgmr.msra.gmra.mrb[4].mxu0 %v3419_v58 }
 0x336   : > { %3319 = vmatpush1.bf16.msra.mxu1 %v3284_v44 }
 0x339   : > { %3010 = vmatmul.mubr.f32.vlgmr.msra.gmra.mrb[4].mxu1 %v3419_v58 }
 0x393   : > { %v2798_v33 = vpop.f32.mrb[2].mxu0 }
 0x394   : > { %vm3020_vm15 = vcmp.ge.f32.partialorder %v2798_v33, 0.0  ;;  %v3032_v6 = vmul.f32 0.2, %v2798_v33  ;;  %v2800_v53 = vpop.f32.mrb[3].mxu0 }
 0x395   : > { %vm3021_vm0 = vcmp.ge.f32.partialorder %v2800_v53, 0.0  ;;  %v3033_v21 = vmul.f32 0.2, %v2800_v53 }
 0x396   : > { %v3044_v19 = vsel %vm3020_vm15, %v2798_v33, %v3032_v6 }
 0x397   : > { %3056 = vst [vmem:[%s4850_s20 + $0x20] sm:$0xff] %v3044_v19  ;;  %v2869_v16 = vpop.f32.mrb[2].mxu1  ;;  %v3045_v47 = vsel %vm3021_vm0, %v2800_v53, %v3033_v21 }
 0x398   : > { %vm3022_vm1 = vcmp.ge.f32.partialorder %v2869_v16, 0.0  ;;  %v3034_v24 = vmul.f32 0.2, %v2869_v16  ;;  %3057 = vst [vmem:[%s4850_s20 + $0x28] sm:$0xff] %v3045_v47  ;;  %v2871_v22 = vpop.f32.mrb[3].mxu1 }
 0x399   : > { %vm3023_vm2 = vcmp.ge.f32.partialorder %v2871_v22, 0.0  ;;  %v3035_v27 = vmul.f32 0.2, %v2871_v22 }
 0x39a   : > { %v3046_v18 = vsel %vm3022_vm1, %v2869_v16, %v3034_v24 }
 0x39b   : > { %3058 = vst [vmem:[%s4850_s20 + $0x30] sm:$0xff] %v3046_v18  ;;  %v3047_v29 = vsel %vm3023_vm2, %v2871_v22, %v3035_v27 }
 0x39c   : > { %3059 = vst [vmem:[%s4850_s20 + $0x38] sm:$0xff] %v3047_v29 }
 0x408   : > { %v2940_v62 = vpop.f32.mrb[4].mxu0 }
 0x409   : > { %vm3024_vm3 = vcmp.ge.f32.partialorder %v2940_v62, 0.0  ;;  %v3036_v30 = vmul.f32 0.2, %v2940_v62  ;;  %v2942_v59 = vpop.f32.mrb[5].mxu0 }
 0x40a   : > { %vm3025_vm4 = vcmp.ge.f32.partialorder %v2942_v59, 0.0  ;;  %v3037_v14 = vmul.f32 0.2, %v2942_v59 }
 0x40b   : > { %v3048_v3 = vsel %vm3024_vm3, %v2940_v62, %v3036_v30 }
 0x40c   : > { %3060 = vst [vmem:[%s4850_s20 + $0x40] sm:$0xff] %v3048_v3  ;;  %v3049_v57 = vsel %vm3025_vm4, %v2942_v59, %v3037_v14  ;;  %v3011_v38 = vpop.f32.mrb[4].mxu1 }
 0x40d   : > { %3061 = vst [vmem:[%s4850_s20 + $0x48] sm:$0xff] %v3049_v57  ;;  %vm3026_vm5 = vcmp.ge.f32.partialorder %v3011_v38, 0.0  ;;  %v3038_v34 = vmul.f32 0.2, %v3011_v38  ;;  %v3013_v54 = vpop.f32.mrb[5].mxu1 }
 0x40e   : > { %vm3027_vm6 = vcmp.ge.f32.partialorder %v3013_v54, 0.0  ;;  %v3039_v15 = vmul.f32 0.2, %v3013_v54 }
 0x40f   : > { %v3050_v48 = vsel %vm3026_vm5, %v3011_v38, %v3038_v34 }
 0x410   : > { %3062 = vst [vmem:[%s4850_s20 + $0x50] sm:$0xff] %v3050_v48  ;;  %v3051_v41 = vsel %vm3027_vm6, %v3013_v54, %v3039_v15 }
 0x411   : > { %3063 = vst [vmem:[%s4850_s20 + $0x58] sm:$0xff] %v3051_v41 }
 0x412 PF: > { %s12_s9 = sadd.s32 1, %s3426_s9  }
 0x413   : > { %p9_p4 = scmp.ge.s32.totalorder %s12_s9, 10  }
 0x415   :  { %11 = sbr.rel (!%p9_p4) target bundleno = 1 (0x1), region = 60 }

</bundles_post_ra>
